<compile_context>
chip_gen: v7x
topology: tpu7x:2x2x1
jax: 0.10.0
libtpu: 0.0.40
codegen_flags: <defaults>
</compile_context>

<pallas_src>
import functools

import jax
import jax.numpy as jnp
import numpy as np
from jax.experimental import pallas as pl
from jax.experimental.pallas import tpu as pltpu


# ------------------------------ kernel bodies --------------------------------
def _make_stats_kernel(d_out, s0):
    """1x1 conv (no bias) + per-channel partial sum / sum-of-squares for one (batch, hw-tile)."""

    def kernel(x_ref, w_ref, psum_ref, psq_ref):
        w = w_ref[...]                                   # (O, C) bf16, resident
        o = w.shape[0]
        acc_s = jnp.zeros((o, 1), jnp.float32)
        acc_q = jnp.zeros((o, 1), jnp.float32)
        for dd in range(d_out):                          # static, unrolled
            xs = x_ref[0, :, dd * s0, :]                 # (C, TILE_S) bf16
            y = jnp.dot(w, xs, preferred_element_type=jnp.float32)   # (O, TILE_S) f32
            acc_s = acc_s + jnp.sum(y, axis=1, keepdims=True)
            acc_q = acc_q + jnp.sum(y * y, axis=1, keepdims=True)
        psum_ref[0, 0, :, :] = acc_s
        psq_ref[0, 0, :, :] = acc_q

    return kernel


def _make_apply_kernel(d_out, s0):
    """1x1 conv (no bias) + folded BatchNorm affine (y * scale + shift) for one (batch, hw-tile)."""

    def kernel(x_ref, w_ref, scale_ref, shift_ref, out_ref):
        w = w_ref[...]                                   # (O, C) bf16, resident
        o = w.shape[0]
        tile_s = x_ref.shape[-1]
        # hoist the per-channel broadcasts out of the depth loop
        scale = jnp.broadcast_to(scale_ref[...], (o, tile_s))   # (O, TILE_S) f32
        shift = jnp.broadcast_to(shift_ref[...], (o, tile_s))   # (O, TILE_S) f32
        for dd in range(d_out):                          # static, unrolled
            xs = x_ref[0, :, dd * s0, :]                 # (C, TILE_S) bf16
            y = jnp.dot(w, xs, preferred_element_type=jnp.float32)   # (O, TILE_S) f32
            out_ref[0, :, dd, :] = (y * scale + shift).astype(out_ref.dtype)

    return kernel


# --------------------------------- wrapper ------------------------------------
def _pick_tile(hw_pad):
    for t in (1024, 512, 256, 128):
        if hw_pad % t == 0:
            return t
    return 128


@functools.partial(jax.jit, static_argnames=("stride", "eps"))
def projfeat3d_forward(x, conv_weight, bn_gamma, bn_beta, *, stride=(1, 1, 1), eps=1e-5):
    b, c, d, h, w = x.shape
    o = conv_weight.shape[0]
    s0, s1 = int(stride[0]), int(stride[1])
    # The PyTorch module's final .view() is only consistent under these conditions too.
    assert s1 == 1, "projfeat3d requires stride[1] == 1 for the final view to be valid"
    assert d % s0 == 0, "projfeat3d requires d divisible by stride[0]"
    d_out = d // s0

    hw = h * w
    hw_pad = ((hw + 127) // 128) * 128
    tile_s = _pick_tile(hw_pad)
    n_t = hw_pad // tile_s

    x3 = x.reshape(b, c, d, hw)                          # free reshape, no transpose
    if hw_pad != hw:
        x3 = jnp.pad(x3, ((0, 0), (0, 0), (0, 0), (0, hw_pad - hw)))
    # bf16 matmul inputs, f32 MXU accumulation (native fast path on v6e/v7x; VPU math stays f32).
    x3 = x3.astype(jnp.bfloat16)
    w_b = conv_weight.astype(jnp.bfloat16)

    grid = (b, n_t)
    x_spec = pl.BlockSpec((1, c, d, tile_s), lambda i, t: (i, 0, 0, t))
    w_spec = pl.BlockSpec((o, c), lambda i, t: (0, 0))   # weights resident across the grid
    par = pltpu.CompilerParams(dimension_semantics=("parallel", "parallel"))

    conv_flops = 2 * b * d_out * hw_pad * c * o
    x_bytes = b * c * d * hw_pad * 2
    w_bytes = o * c * 2

    # ---- pass 1: conv + per-tile partial batch statistics (training-mode BN) ----
    stat_spec = pl.BlockSpec((1, 1, o, 1), lambda i, t: (i, t, 0, 0))
    psum, psq = pl.pallas_call(
        _make_stats_kernel(d_out, s0),
        grid=grid,
        in_specs=[x_spec, w_spec],
        out_specs=[stat_spec, stat_spec],
        out_shape=[jax.ShapeDtypeStruct((b, n_t, o, 1), jnp.float32)] * 2,
        compiler_params=par,
        cost_estimate=pl.CostEstimate(
            flops=conv_flops, transcendentals=0,
            bytes_accessed=x_bytes + w_bytes + 2 * b * n_t * o * 4),
    )(x3, w_b)

    # ---- batch statistics -> folded per-channel affine (tiny O-sized glue math) ----
    n = b * d_out * hw                                   # true count; zero padding contributes 0
    mean = jnp.sum(psum, axis=(0, 1, 3)) / n
    var = jnp.maximum(jnp.sum(psq, axis=(0, 1, 3)) / n - mean * mean, 0.0)   # biased, as BN uses
    inv = bn_gamma * jax.lax.rsqrt(var + eps)
    scale = inv.astype(jnp.float32).reshape(o, 1)
    shift = (bn_beta - mean * inv).astype(jnp.float32).reshape(o, 1)

    # ---- pass 2: conv + normalization, written lane-dense in the final layout ----
    y = pl.pallas_call(
        _make_apply_kernel(d_out, s0),
        grid=grid,
        in_specs=[x_spec, w_spec,
                  pl.BlockSpec((o, 1), lambda i, t: (0, 0)),
                  pl.BlockSpec((o, 1), lambda i, t: (0, 0))],
        out_specs=pl.BlockSpec((1, o, d_out, tile_s), lambda i, t: (i, 0, 0, t)),
        out_shape=jax.ShapeDtypeStruct((b, o, d_out, hw_pad), jnp.float32),
        compiler_params=par,
        cost_estimate=pl.CostEstimate(
            flops=conv_flops, transcendentals=0,
            bytes_accessed=x_bytes + w_bytes + 2 * o * 4 + b * o * d_out * hw_pad * 4),
    )(x3, w_b, scale, shift)

    if hw_pad != hw:
        y = y[:, :, :, :hw]
    # matches x.view(b, -1, d // stride[0], h, w)
    return y.reshape(b, o, d_out, h, w)
    # TODO(synk): nn.BatchNorm2d's running_mean/running_var update (training-time module state,
    # not part of the returned tensor) is not reproduced.


# ----------------------------- pure-JAX reference ------------------------------
def reference_forward(x, conv_weight, bn_gamma, bn_beta, stride, eps=1e-5):
    b, c, d, h, w = x.shape
    s0, s1 = stride[0], stride[1]
    x2 = x.reshape(b, c, d, h * w)[:, :, ::s0, ::s1]
    # match the kernel's matmul precision: bf16 inputs, f32 accumulation
    xq = x2.astype(jnp.bfloat16).astype(jnp.float32)
    wq = conv_weight.astype(jnp.bfloat16).astype(jnp.float32)
    y = jnp.einsum("oc,bcds->bods", wq, xq)
    mean = y.mean(axis=(0, 2, 3))
    var = y.var(axis=(0, 2, 3))                          # biased, as BN normalization uses
    yn = (y - mean[None, :, None, None]) * jax.lax.rsqrt(var + eps)[None, :, None, None]
    yn = yn * bn_gamma[None, :, None, None] + bn_beta[None, :, None, None]
    return yn.reshape(b, -1, d // s0, h, w)


# ------------------------------------ main --------------------------------------
if __name__ == "__main__":
    key = jax.random.PRNGKey(0)
    kx, kw, kg, kb = jax.random.split(key, 4)

    B, C_IN, DEPTH, H, W = 2, 16, 8, 16, 16
    C_OUT = 32
    STRIDE = (2, 1, 1)

    x = jax.random.normal(kx, (B, C_IN, DEPTH, H, W), jnp.float32)
    bound = 1.0 / np.sqrt(C_IN)
    conv_weight = jax.random.uniform(kw, (C_OUT, C_IN), jnp.float32, -bound, bound)
    bn_gamma = 1.0 + 0.1 * jax.random.normal(kg, (C_OUT,), jnp.float32)
    bn_beta = 0.1 * jax.random.normal(kb, (C_OUT,), jnp.float32)

    out = projfeat3d_forward(x, conv_weight, bn_gamma, bn_beta, stride=STRIDE)
    out = jax.block_until_ready(out)

    ref = reference_forward(x, conv_weight, bn_gamma, bn_beta, STRIDE)
    assert out.shape == (B, C_OUT, DEPTH // STRIDE[0], H, W), out.shape
    max_err = np.max(np.abs(np.asarray(out) - np.asarray(ref)))
    assert np.allclose(np.asarray(out), np.asarray(ref), rtol=2e-3, atol=2e-3), max_err

    print("KERNEL_OK")
</pallas_src>

<mosaic_0001>
module attributes {stable_mosaic.version = 11 : i64} {
  func.func @kernel(%arg0: i32, %arg1: i32, %arg2: memref<1x16x8x256xbf16, #tpu.memory_space<vmem>>, %arg3: memref<32x16xbf16, #tpu.memory_space<vmem>>, %arg4: memref<1x1x32x1xf32, #tpu.memory_space<vmem>>, %arg5: memref<1x1x32x1xf32, #tpu.memory_space<vmem>>) attributes {dimension_semantics = [#tpu.dimension_semantics<parallel>, #tpu.dimension_semantics<parallel>], iteration_bounds = array<i64: 2, 1>, scalar_prefetch = 0 : i64, scratch_operands = 0 : i64, tpu.core_type = #tpu.core_type<tc>, window_params = [{transform_indices = @transform_0, window_bounds = array<i64: 1, 16, 8, 256>}, {pipeline_mode = #tpu.pipeline_mode<synchronous>, transform_indices = @transform_1, window_bounds = array<i64: 32, 16>}, {transform_indices = @transform_2, window_bounds = array<i64: 1, 1, 32, 1>}, {transform_indices = @transform_3, window_bounds = array<i64: 1, 1, 32, 1>}]} {
    %c0 = arith.constant 0 : index
    %c0_0 = arith.constant 0 : index
    %0 = vector.load %arg3[%c0, %c0_0] : memref<32x16xbf16, #tpu.memory_space<vmem>>, vector<32x16xbf16>
    %cst = arith.constant 0.000000e+00 : f32
    %1 = vector.broadcast %cst : f32 to vector<32x1xf32>
    %cst_1 = arith.constant 0.000000e+00 : f32
    %2 = vector.broadcast %cst_1 : f32 to vector<32x1xf32>
    %c0_2 = arith.constant 0 : index
    %c0_3 = arith.constant 0 : index
    %c0_4 = arith.constant 0 : index
    %c0_5 = arith.constant 0 : index
    %3 = vector.load %arg2[%c0_2, %c0_3, %c0_4, %c0_5] : memref<1x16x8x256xbf16, #tpu.memory_space<vmem>>, vector<1x16x1x256xbf16>
    %4 = vector.shape_cast %3 : vector<1x16x1x256xbf16> to vector<16x256xbf16>
    %cst_6 = arith.constant dense<0.000000e+00> : vector<32x256xf32>
    %5 = tpu.matmul %0, %4, %cst_6 {dimension_numbers = #tpu.dot_dimension_numbers<[1], [0], [0], [1], [0, 0, 1, 1], [], []>} : vector<32x16xbf16>, vector<16x256xbf16>, vector<32x256xf32> -> vector<32x256xf32>
    %cst_7 = arith.constant dense<0.000000e+00> : vector<32xf32>
    %6 = vector.multi_reduction <add>, %5, %cst_7 [1] : vector<32x256xf32> to vector<32xf32>
    %7 = vector.shape_cast %6 : vector<32xf32> to vector<32x1xf32>
    %8 = arith.addf %1, %7 : vector<32x1xf32>
    %9 = arith.mulf %5, %5 : vector<32x256xf32>
    %cst_8 = arith.constant dense<0.000000e+00> : vector<32xf32>
    %10 = vector.multi_reduction <add>, %9, %cst_8 [1] : vector<32x256xf32> to vector<32xf32>
    %11 = vector.shape_cast %10 : vector<32xf32> to vector<32x1xf32>
    %12 = arith.addf %2, %11 : vector<32x1xf32>
    %c0_9 = arith.constant 0 : index
    %c0_10 = arith.constant 0 : index
    %c2 = arith.constant 2 : index
    %c0_11 = arith.constant 0 : index
    %13 = vector.load %arg2[%c0_9, %c0_10, %c2, %c0_11] : memref<1x16x8x256xbf16, #tpu.memory_space<vmem>>, vector<1x16x1x256xbf16>
    %14 = vector.shape_cast %13 : vector<1x16x1x256xbf16> to vector<16x256xbf16>
    %cst_12 = arith.constant dense<0.000000e+00> : vector<32x256xf32>
    %15 = tpu.matmul %0, %14, %cst_12 {dimension_numbers = #tpu.dot_dimension_numbers<[1], [0], [0], [1], [0, 0, 1, 1], [], []>} : vector<32x16xbf16>, vector<16x256xbf16>, vector<32x256xf32> -> vector<32x256xf32>
    %cst_13 = arith.constant dense<0.000000e+00> : vector<32xf32>
    %16 = vector.multi_reduction <add>, %15, %cst_13 [1] : vector<32x256xf32> to vector<32xf32>
    %17 = vector.shape_cast %16 : vector<32xf32> to vector<32x1xf32>
    %18 = arith.addf %8, %17 : vector<32x1xf32>
    %19 = arith.mulf %15, %15 : vector<32x256xf32>
    %cst_14 = arith.constant dense<0.000000e+00> : vector<32xf32>
    %20 = vector.multi_reduction <add>, %19, %cst_14 [1] : vector<32x256xf32> to vector<32xf32>
    %21 = vector.shape_cast %20 : vector<32xf32> to vector<32x1xf32>
    %22 = arith.addf %12, %21 : vector<32x1xf32>
    %c0_15 = arith.constant 0 : index
    %c0_16 = arith.constant 0 : index
    %c4 = arith.constant 4 : index
    %c0_17 = arith.constant 0 : index
    %23 = vector.load %arg2[%c0_15, %c0_16, %c4, %c0_17] : memref<1x16x8x256xbf16, #tpu.memory_space<vmem>>, vector<1x16x1x256xbf16>
    %24 = vector.shape_cast %23 : vector<1x16x1x256xbf16> to vector<16x256xbf16>
    %cst_18 = arith.constant dense<0.000000e+00> : vector<32x256xf32>
    %25 = tpu.matmul %0, %24, %cst_18 {dimension_numbers = #tpu.dot_dimension_numbers<[1], [0], [0], [1], [0, 0, 1, 1], [], []>} : vector<32x16xbf16>, vector<16x256xbf16>, vector<32x256xf32> -> vector<32x256xf32>
    %cst_19 = arith.constant dense<0.000000e+00> : vector<32xf32>
    %26 = vector.multi_reduction <add>, %25, %cst_19 [1] : vector<32x256xf32> to vector<32xf32>
    %27 = vector.shape_cast %26 : vector<32xf32> to vector<32x1xf32>
    %28 = arith.addf %18, %27 : vector<32x1xf32>
    %29 = arith.mulf %25, %25 : vector<32x256xf32>
    %cst_20 = arith.constant dense<0.000000e+00> : vector<32xf32>
    %30 = vector.multi_reduction <add>, %29, %cst_20 [1] : vector<32x256xf32> to vector<32xf32>
    %31 = vector.shape_cast %30 : vector<32xf32> to vector<32x1xf32>
    %32 = arith.addf %22, %31 : vector<32x1xf32>
    %c0_21 = arith.constant 0 : index
    %c0_22 = arith.constant 0 : index
    %c6 = arith.constant 6 : index
    %c0_23 = arith.constant 0 : index
    %33 = vector.load %arg2[%c0_21, %c0_22, %c6, %c0_23] : memref<1x16x8x256xbf16, #tpu.memory_space<vmem>>, vector<1x16x1x256xbf16>
    %34 = vector.shape_cast %33 : vector<1x16x1x256xbf16> to vector<16x256xbf16>
    %cst_24 = arith.constant dense<0.000000e+00> : vector<32x256xf32>
    %35 = tpu.matmul %0, %34, %cst_24 {dimension_numbers = #tpu.dot_dimension_numbers<[1], [0], [0], [1], [0, 0, 1, 1], [], []>} : vector<32x16xbf16>, vector<16x256xbf16>, vector<32x256xf32> -> vector<32x256xf32>
    %cst_25 = arith.constant dense<0.000000e+00> : vector<32xf32>
    %36 = vector.multi_reduction <add>, %35, %cst_25 [1] : vector<32x256xf32> to vector<32xf32>
    %37 = vector.shape_cast %36 : vector<32xf32> to vector<32x1xf32>
    %38 = arith.addf %28, %37 : vector<32x1xf32>
    %39 = arith.mulf %35, %35 : vector<32x256xf32>
    %cst_26 = arith.constant dense<0.000000e+00> : vector<32xf32>
    %40 = vector.multi_reduction <add>, %39, %cst_26 [1] : vector<32x256xf32> to vector<32xf32>
    %41 = vector.shape_cast %40 : vector<32xf32> to vector<32x1xf32>
    %42 = arith.addf %32, %41 : vector<32x1xf32>
    %c0_27 = arith.constant 0 : index
    %c0_28 = arith.constant 0 : index
    %c0_29 = arith.constant 0 : index
    %c0_30 = arith.constant 0 : index
    %43 = vector.load %arg4[%c0_27, %c0_28, %c0_29, %c0_30] : memref<1x1x32x1xf32, #tpu.memory_space<vmem>>, vector<1x1x32x1xf32>
    %44 = vector.shape_cast %43 : vector<1x1x32x1xf32> to vector<32x1xf32>
    %45 = vector.shape_cast %38 : vector<32x1xf32> to vector<1x1x32x1xf32>
    tpu.vector_store %arg4[%c0_27, %c0_28, %c0_29, %c0_30], %45 {strides = array<i32>} : memref<1x1x32x1xf32, #tpu.memory_space<vmem>>, vector<1x1x32x1xf32>,
    %c0_31 = arith.constant 0 : index
    %c0_32 = arith.constant 0 : index
    %c0_33 = arith.constant 0 : index
    %c0_34 = arith.constant 0 : index
    %46 = vector.load %arg5[%c0_31, %c0_32, %c0_33, %c0_34] : memref<1x1x32x1xf32, #tpu.memory_space<vmem>>, vector<1x1x32x1xf32>
    %47 = vector.shape_cast %46 : vector<1x1x32x1xf32> to vector<32x1xf32>
    %48 = vector.shape_cast %42 : vector<32x1xf32> to vector<1x1x32x1xf32>
    tpu.vector_store %arg5[%c0_31, %c0_32, %c0_33, %c0_34], %48 {strides = array<i32>} : memref<1x1x32x1xf32, #tpu.memory_space<vmem>>, vector<1x1x32x1xf32>,
    return
  }
  func.func @transform_0(%arg0: i32, %arg1: i32) -> (i32, i32, i32, i32) {
    %c0_i32 = arith.constant 0 : i32
    %c0_i32_0 = arith.constant 0 : i32
    %c0_i32_1 = arith.constant 0 : i32
    return %arg0, %c0_i32, %c0_i32_0, %arg1 : i32, i32, i32, i32
  }
  func.func @transform_1(%arg0: i32, %arg1: i32) -> (i32, i32) {
    %c0_i32 = arith.constant 0 : i32
    %c0_i32_0 = arith.constant 0 : i32
    %c0_i32_1 = arith.constant 0 : i32
    return %c0_i32, %c0_i32_0 : i32, i32
  }
  func.func @transform_2(%arg0: i32, %arg1: i32) -> (i32, i32, i32, i32) {
    %c0_i32 = arith.constant 0 : i32
    %c0_i32_0 = arith.constant 0 : i32
    %c0_i32_1 = arith.constant 0 : i32
    return %arg0, %arg1, %c0_i32, %c0_i32_0 : i32, i32, i32, i32
  }
  func.func @transform_3(%arg0: i32, %arg1: i32) -> (i32, i32, i32, i32) {
    %c0_i32 = arith.constant 0 : i32
    %c0_i32_0 = arith.constant 0 : i32
    %c0_i32_1 = arith.constant 0 : i32
    return %arg0, %arg1, %c0_i32, %c0_i32_0 : i32, i32, i32, i32
  }
}

module attributes {stable_mosaic.version = 11 : i64} {
  func.func @kernel(%arg0: i32, %arg1: i32, %arg2: memref<1x16x8x256xbf16, #tpu.memory_space<vmem>>, %arg3: memref<32x16xbf16, #tpu.memory_space<vmem>>, %arg4: memref<32x1xf32, #tpu.memory_space<vmem>>, %arg5: memref<32x1xf32, #tpu.memory_space<vmem>>, %arg6: memref<1x32x4x256xf32, #tpu.memory_space<vmem>>) attributes {dimension_semantics = [#tpu.dimension_semantics<parallel>, #tpu.dimension_semantics<parallel>], iteration_bounds = array<i64: 2, 1>, scalar_prefetch = 0 : i64, scratch_operands = 0 : i64, tpu.core_type = #tpu.core_type<tc>, window_params = [{transform_indices = @transform_0, window_bounds = array<i64: 1, 16, 8, 256>}, {pipeline_mode = #tpu.pipeline_mode<synchronous>, transform_indices = @transform_1, window_bounds = array<i64: 32, 16>}, {pipeline_mode = #tpu.pipeline_mode<synchronous>, transform_indices = @transform_2, window_bounds = array<i64: 32, 1>}, {pipeline_mode = #tpu.pipeline_mode<synchronous>, transform_indices = @transform_3, window_bounds = array<i64: 32, 1>}, {transform_indices = @transform_4, window_bounds = array<i64: 1, 32, 4, 256>}]} {
    %c0 = arith.constant 0 : index
    %c0_0 = arith.constant 0 : index
    %0 = vector.load %arg3[%c0, %c0_0] : memref<32x16xbf16, #tpu.memory_space<vmem>>, vector<32x16xbf16>
    %c0_1 = arith.constant 0 : index
    %c0_2 = arith.constant 0 : index
    %1 = vector.load %arg4[%c0_1, %c0_2] : memref<32x1xf32, #tpu.memory_space<vmem>>, vector<32x1xf32>
    %2 = vector.shape_cast %1 : vector<32x1xf32> to vector<32x1xf32>
    %3 = vector.broadcast %2 : vector<32x1xf32> to vector<32x256xf32>
    %c0_3 = arith.constant 0 : index
    %c0_4 = arith.constant 0 : index
    %4 = vector.load %arg5[%c0_3, %c0_4] : memref<32x1xf32, #tpu.memory_space<vmem>>, vector<32x1xf32>
    %5 = vector.shape_cast %4 : vector<32x1xf32> to vector<32x1xf32>
    %6 = vector.broadcast %5 : vector<32x1xf32> to vector<32x256xf32>
    %c0_5 = arith.constant 0 : index
    %c0_6 = arith.constant 0 : index
    %c0_7 = arith.constant 0 : index
    %c0_8 = arith.constant 0 : index
    %7 = vector.load %arg2[%c0_5, %c0_6, %c0_7, %c0_8] : memref<1x16x8x256xbf16, #tpu.memory_space<vmem>>, vector<1x16x1x256xbf16>
    %8 = vector.shape_cast %7 : vector<1x16x1x256xbf16> to vector<16x256xbf16>
    %cst = arith.constant dense<0.000000e+00> : vector<32x256xf32>
    %9 = tpu.matmul %0, %8, %cst {dimension_numbers = #tpu.dot_dimension_numbers<[1], [0], [0], [1], [0, 0, 1, 1], [], []>} : vector<32x16xbf16>, vector<16x256xbf16>, vector<32x256xf32> -> vector<32x256xf32>
    %10 = arith.mulf %9, %3 : vector<32x256xf32>
    %11 = arith.addf %10, %6 : vector<32x256xf32>
    %c0_9 = arith.constant 0 : index
    %c0_10 = arith.constant 0 : index
    %c0_11 = arith.constant 0 : index
    %c0_12 = arith.constant 0 : index
    %12 = vector.load %arg6[%c0_9, %c0_10, %c0_11, %c0_12] : memref<1x32x4x256xf32, #tpu.memory_space<vmem>>, vector<1x32x1x256xf32>
    %13 = vector.shape_cast %12 : vector<1x32x1x256xf32> to vector<32x256xf32>
    %14 = vector.shape_cast %11 : vector<32x256xf32> to vector<1x32x1x256xf32>
    tpu.vector_store %arg6[%c0_9, %c0_10, %c0_11, %c0_12], %14 {strides = array<i32>} : memref<1x32x4x256xf32, #tpu.memory_space<vmem>>, vector<1x32x1x256xf32>,
    %c0_13 = arith.constant 0 : index
    %c0_14 = arith.constant 0 : index
    %c2 = arith.constant 2 : index
    %c0_15 = arith.constant 0 : index
    %15 = vector.load %arg2[%c0_13, %c0_14, %c2, %c0_15] : memref<1x16x8x256xbf16, #tpu.memory_space<vmem>>, vector<1x16x1x256xbf16>
    %16 = vector.shape_cast %15 : vector<1x16x1x256xbf16> to vector<16x256xbf16>
    %cst_16 = arith.constant dense<0.000000e+00> : vector<32x256xf32>
    %17 = tpu.matmul %0, %16, %cst_16 {dimension_numbers = #tpu.dot_dimension_numbers<[1], [0], [0], [1], [0, 0, 1, 1], [], []>} : vector<32x16xbf16>, vector<16x256xbf16>, vector<32x256xf32> -> vector<32x256xf32>
    %18 = arith.mulf %17, %3 : vector<32x256xf32>
    %19 = arith.addf %18, %6 : vector<32x256xf32>
    %c0_17 = arith.constant 0 : index
    %c0_18 = arith.constant 0 : index
    %c1 = arith.constant 1 : index
    %c0_19 = arith.constant 0 : index
    %20 = vector.load %arg6[%c0_17, %c0_18, %c1, %c0_19] : memref<1x32x4x256xf32, #tpu.memory_space<vmem>>, vector<1x32x1x256xf32>
    %21 = vector.shape_cast %20 : vector<1x32x1x256xf32> to vector<32x256xf32>
    %22 = vector.shape_cast %19 : vector<32x256xf32> to vector<1x32x1x256xf32>
    tpu.vector_store %arg6[%c0_17, %c0_18, %c1, %c0_19], %22 {strides = array<i32>} : memref<1x32x4x256xf32, #tpu.memory_space<vmem>>, vector<1x32x1x256xf32>,
    %c0_20 = arith.constant 0 : index
    %c0_21 = arith.constant 0 : index
    %c4 = arith.constant 4 : index
    %c0_22 = arith.constant 0 : index
    %23 = vector.load %arg2[%c0_20, %c0_21, %c4, %c0_22] : memref<1x16x8x256xbf16, #tpu.memory_space<vmem>>, vector<1x16x1x256xbf16>
    %24 = vector.shape_cast %23 : vector<1x16x1x256xbf16> to vector<16x256xbf16>
    %cst_23 = arith.constant dense<0.000000e+00> : vector<32x256xf32>
    %25 = tpu.matmul %0, %24, %cst_23 {dimension_numbers = #tpu.dot_dimension_numbers<[1], [0], [0], [1], [0, 0, 1, 1], [], []>} : vector<32x16xbf16>, vector<16x256xbf16>, vector<32x256xf32> -> vector<32x256xf32>
    %26 = arith.mulf %25, %3 : vector<32x256xf32>
    %27 = arith.addf %26, %6 : vector<32x256xf32>
    %c0_24 = arith.constant 0 : index
    %c0_25 = arith.constant 0 : index
    %c2_26 = arith.constant 2 : index
    %c0_27 = arith.constant 0 : index
    %28 = vector.load %arg6[%c0_24, %c0_25, %c2_26, %c0_27] : memref<1x32x4x256xf32, #tpu.memory_space<vmem>>, vector<1x32x1x256xf32>
    %29 = vector.shape_cast %28 : vector<1x32x1x256xf32> to vector<32x256xf32>
    %30 = vector.shape_cast %27 : vector<32x256xf32> to vector<1x32x1x256xf32>
    tpu.vector_store %arg6[%c0_24, %c0_25, %c2_26, %c0_27], %30 {strides = array<i32>} : memref<1x32x4x256xf32, #tpu.memory_space<vmem>>, vector<1x32x1x256xf32>,
    %c0_28 = arith.constant 0 : index
    %c0_29 = arith.constant 0 : index
    %c6 = arith.constant 6 : index
    %c0_30 = arith.constant 0 : index
    %31 = vector.load %arg2[%c0_28, %c0_29, %c6, %c0_30] : memref<1x16x8x256xbf16, #tpu.memory_space<vmem>>, vector<1x16x1x256xbf16>
    %32 = vector.shape_cast %31 : vector<1x16x1x256xbf16> to vector<16x256xbf16>
    %cst_31 = arith.constant dense<0.000000e+00> : vector<32x256xf32>
    %33 = tpu.matmul %0, %32, %cst_31 {dimension_numbers = #tpu.dot_dimension_numbers<[1], [0], [0], [1], [0, 0, 1, 1], [], []>} : vector<32x16xbf16>, vector<16x256xbf16>, vector<32x256xf32> -> vector<32x256xf32>
    %34 = arith.mulf %33, %3 : vector<32x256xf32>
    %35 = arith.addf %34, %6 : vector<32x256xf32>
    %c0_32 = arith.constant 0 : index
    %c0_33 = arith.constant 0 : index
    %c3 = arith.constant 3 : index
    %c0_34 = arith.constant 0 : index
    %36 = vector.load %arg6[%c0_32, %c0_33, %c3, %c0_34] : memref<1x32x4x256xf32, #tpu.memory_space<vmem>>, vector<1x32x1x256xf32>
    %37 = vector.shape_cast %36 : vector<1x32x1x256xf32> to vector<32x256xf32>
    %38 = vector.shape_cast %35 : vector<32x256xf32> to vector<1x32x1x256xf32>
    tpu.vector_store %arg6[%c0_32, %c0_33, %c3, %c0_34], %38 {strides = array<i32>} : memref<1x32x4x256xf32, #tpu.memory_space<vmem>>, vector<1x32x1x256xf32>,
    return
  }
  func.func @transform_0(%arg0: i32, %arg1: i32) -> (i32, i32, i32, i32) {
    %c0_i32 = arith.constant 0 : i32
    %c0_i32_0 = arith.constant 0 : i32
    %c0_i32_1 = arith.constant 0 : i32
    return %arg0, %c0_i32, %c0_i32_0, %arg1 : i32, i32, i32, i32
  }
  func.func @transform_1(%arg0: i32, %arg1: i32) -> (i32, i32) {
    %c0_i32 = arith.constant 0 : i32
    %c0_i32_0 = arith.constant 0 : i32
    %c0_i32_1 = arith.constant 0 : i32
    return %c0_i32, %c0_i32_0 : i32, i32
  }
  func.func @transform_2(%arg0: i32, %arg1: i32) -> (i32, i32) {
    %c0_i32 = arith.constant 0 : i32
    %c0_i32_0 = arith.constant 0 : i32
    %c0_i32_1 = arith.constant 0 : i32
    return %c0_i32, %c0_i32_0 : i32, i32
  }
  func.func @transform_3(%arg0: i32, %arg1: i32) -> (i32, i32) {
    %c0_i32 = arith.constant 0 : i32
    %c0_i32_0 = arith.constant 0 : i32
    %c0_i32_1 = arith.constant 0 : i32
    return %c0_i32, %c0_i32_0 : i32, i32
  }
  func.func @transform_4(%arg0: i32, %arg1: i32) -> (i32, i32, i32, i32) {
    %c0_i32 = arith.constant 0 : i32
    %c0_i32_0 = arith.constant 0 : i32
    %c0_i32_1 = arith.constant 0 : i32
    return %arg0, %c0_i32, %c0_i32_0, %arg1 : i32, i32, i32, i32
  }
}

</mosaic_0001>

<bundles_post_ra>
// kernel: projfeat3d_forward.2
= control target key start
LH: loop header
LB: loop body
LE: loop exit
PB: predicated region body
PF: predicated region fallthrough
CT: control target
= control target key end

     0   :  { %s1890_s12 = smov 0   ;;  %s1892_s13 = smov 0   ;;  %s2498_s0 = inlined_call_operand.vmem [shape: bf16[2,16,8,256], index: 0, kind: input, shape index: {}]   ;;  %s2499_s1 = inlined_call_operand.vmem [shape: bf16[32,16], index: 1, kind: input, shape index: {}]   ;;  %s2500_s2 = inlined_call_operand.vmem [shape: f32[2,1,32,1], index: 2, kind: output, shape index: {0}]   ;;  %s2501_s3 = inlined_call_operand.vmem [shape: f32[2,1,32,1], index: 3, kind: output, shape index: {1}]  }
   0x1   :  { %s1894_s14 = smov 0  }
   0x2 LB: > { %s26_s15 = sadd.s32 1, %s1863_s13  ;;  %p1540_p0 = scmp.ge.s32.totalorder %s1867_s14, 1  ;;  %s1867_s14 = sphi %s1894_s14, %s14_s14   ;;  %s1863_s13 = sphi %s1892_s13, %s2520_s13   ;;  %s1859_s12 = sphi %s1890_s12, %s2519_s12  }
   0x3   : > { %p28_p1 = scmp.ge.s32.totalorder %s26_s15, 2  ;;  %p163_p2 = scmp.lt.s32.totalorder %s1867_s14, 3 }
   0x5   : > { %s2522_s15 = smov (%p28_p1, %s26_s15), 0  ;;  %p164_p3 = pnand %p1540_p0, %p163_p2 }
   0x7   : > { %167 = sbr.rel (%p164_p3) target bundleno = 537 (0x219), region = 28 }
   0xe   : > { %p205_p4 = scmp.lt.s32.totalorder %s1859_s12, 1  ;;  %v2502_v0 = vmov 0   ;;  %vm376_vm0 = vcmask 1041409   ;;  %vm379_vm1 = vcmask 1042434   ;;  %vm382_vm2 = vcmask 1043459  }
   0xf   : > { %481 = vmatprep.mubr.bf16.mxu0 %v2502_v0  ;;  %762 = vmatprep.mubr.bf16.mxu1 %v2502_v0  ;;  %vm385_vm3 = vcmask 1044484   ;;  %vm388_vm4 = vcmask 1045509   ;;  %vm391_vm5 = vcmask 1046534   ;;  %vm394_vm6 = vcmask 1047559  }
  0x10   : > { %s2524_s12 = smov (!%p205_p4, %s1859_s12), 1  ;;  %vm442_vm7 = vcmask 130048   ;;  %vm1385_vm8 = vcmask 7168  }
  0x11   : > { %s1687_s16 = sshll.u32 %s2524_s12, 7  ;;  %s1688_s24 = sshll.u32 %s2524_s12, 5 }
  0x12   : > { %s1916_s19 = scalar_lea.vmem %s2498_s0, %s1687_s16  ;;  %s2466_s27 = scalar_lea.vmem %s2500_s2, %s1688_s24 }
  0x13   : > { %v1919_v1 = vld [vmem:[%s1916_s19] sm:$0x11]  ;;  %v1922_v2 = vld [vmem:[%s1916_s19 + $0x8] sm:$0x11]  ;;  %v1925_v3 = vld [vmem:[%s1916_s19 + $0x10] sm:$0x11]  ;;  %s2475_s30 = scalar_lea.vmem %s2501_s3, %s1688_s24 }
  0x14   : > { %v1928_v4 = vld [vmem:[%s1916_s19 + $0x18] sm:$0x11]  ;;  %v1931_v5 = vld [vmem:[%s1916_s19 + $0x20] sm:$0x11]  ;;  %v1934_v6 = vld [vmem:[%s1916_s19 + $0x28] sm:$0x11]  ;;  %v1550_v7 = vcombine.high %v1919_v1, %v1919_v1  ;;  %v1552_v8 = vcombine.high %v1922_v2, %v1922_v2  ;;  %v1554_v9 = vcombine.high %v1925_v3, %v1925_v3 }
  0x15   : > { %v1945_v11 = vld [vmem:[%s1916_s19 + $0x30] sm:$0x11]  ;;  %v1948_v12 = vld [vmem:[%s1916_s19 + $0x38] sm:$0x11]  ;;  %v1951_v13 = vld [vmem:[%s1916_s19 + $0x40] sm:$0x11]  ;;  %v1556_v14 = vcombine.high %v1928_v4, %v1928_v4  ;;  %v1558_v15 = vcombine.high %v1931_v5, %v1931_v5  ;;  %v1560_v16 = vcombine.high %v1934_v6, %v1934_v6 }
  0x16   : > { %v1962_v18 = vld [vmem:[%s1916_s19 + $0x48] sm:$0x11]  ;;  %v1965_v19 = vld [vmem:[%s1916_s19 + $0x50] sm:$0x11]  ;;  %v1968_v20 = vld [vmem:[%s1916_s19 + $0x58] sm:$0x11]  ;;  %v1562_v21 = vcombine.high %v1945_v11, %v1945_v11  ;;  %v1564_v22 = vcombine.high %v1948_v12, %v1948_v12  ;;  %v1566_v23 = vcombine.high %v1951_v13, %v1951_v13  ;;  %v344_v24 = vunpack.c.l.b16 %v1550_v7 }
  0x17   : > { %v1977_v25 = vld [vmem:[%s1916_s19 + $0x60] sm:$0x11]  ;;  %v1980_v26 = vld [vmem:[%s1916_s19 + $0x68] sm:$0x11]  ;;  %v1983_v27 = vld [vmem:[%s1916_s19 + $0x70] sm:$0x11]  ;;  %v1568_v28 = vcombine.high %v1962_v18, %v1962_v18  ;;  %v1570_v29 = vcombine.high %v1965_v19, %v1965_v19  ;;  %v1572_v30 = vcombine.high %v1968_v20, %v1968_v20  ;;  %v346_v31 = vunpack.c.l.b16 %v1552_v8 }
  0x18   : > { %v1992_v32 = vld [vmem:[%s1916_s19 + $0x78] sm:$0x11]  ;;  %v1574_v33 = vcombine.high %v1977_v25, %v1977_v25  ;;  %v1576_v34 = vcombine.high %v1980_v26, %v1980_v26  ;;  %v1578_v35 = vcombine.high %v1983_v27, %v1983_v27  ;;  %v348_v36 = vunpack.c.l.b16 %v1554_v9  ;;  %v2003_v53 = vld [vmem:[%s1916_s19] sm:$0x22]  ;;  %v2006_v58 = vld [vmem:[%s1916_s19 + $0x8] sm:$0x22] }
  0x19   : > { %v1580_v37 = vcombine.high %v1992_v32, %v1992_v32  ;;  %v350_v38 = vunpack.c.l.b16 %v1556_v14  ;;  %v352_v39 = vunpack.c.l.b16 %v1558_v15  ;;  %v354_v40 = vunpack.c.l.b16 %v1560_v16  ;;  %v2010_v63 = vld [vmem:[%s1916_s19 + $0x10] sm:$0x22]  ;;  %v2014_v15 = vld [vmem:[%s1916_s19 + $0x18] sm:$0x22] }
  0x1a   : > { %v356_v41 = vunpack.c.l.b16 %v1562_v21  ;;  %v358_v42 = vunpack.c.l.b16 %v1564_v22  ;;  %v360_v43 = vunpack.c.l.b16 %v1566_v23  ;;  %v362_v44 = vunpack.c.l.b16 %v1568_v28  ;;  %v2022_v28 = vld [vmem:[%s1916_s19 + $0x28] sm:$0x22] }
  0x1b   : > { %v364_v45 = vunpack.c.l.b16 %v1570_v29  ;;  %v366_v46 = vunpack.c.l.b16 %v1572_v30  ;;  %v368_v47 = vunpack.c.l.b16 %v1574_v33  ;;  %v370_v48 = vunpack.c.l.b16 %v1576_v34  ;;  %v2030_v33 = vld [vmem:[%s1916_s19 + $0x38] sm:$0x22] }
  0x1c   : > { %v372_v49 = vunpack.c.l.b16 %v1578_v35  ;;  %v374_v50 = vunpack.c.l.b16 %v1580_v37  ;;  %v396_v51 = vrot.slane %v346_v31, 7  ;;  %v398_v52 = vrot.slane %v348_v36, 6  ;;  %v2027_v31 = vld [vmem:[%s1916_s19 + $0x30] sm:$0x22] }
  0x1d   : > { %v400_v54 = vrot.slane %v350_v38, 5  ;;  %v402_v55 = vrot.slane %v352_v39, 4  ;;  %v404_v56 = vrot.slane %v354_v40, 3  ;;  %v406_v57 = vrot.slane %v356_v41, 2  ;;  %v2039_v38 = vld [vmem:[%s1916_s19 + $0x40] sm:$0x22] }
  0x1e   : > { %v397_v59 = vsel %vm376_vm0, %v396_v51, %v344_v24  ;;  %v408_v60 = vrot.slane %v358_v42, 1  ;;  %v424_v61 = vrot.slane %v362_v44, 7  ;;  %v426_v62 = vrot.slane %v364_v45, 6  ;;  %v2019_v24 = vld [vmem:[%s1916_s19 + $0x20] sm:$0x22] }
  0x1f   : > { %v399_v7 = vsel %vm379_vm1, %v398_v52, %v397_v59  ;;  %v428_v8 = vrot.slane %v366_v46, 5  ;;  %v430_v9 = vrot.slane %v368_v47, 4  ;;  %v432_v14 = vrot.slane %v370_v48, 3  ;;  %v2042_v39 = vld [vmem:[%s1916_s19 + $0x48] sm:$0x22] }
  0x20   : > { %v401_v16 = vsel %vm382_vm2, %v400_v54, %v399_v7  ;;  %v425_v21 = vsel %vm376_vm0, %v424_v61, %v360_v43  ;;  %v434_v22 = vrot.slane %v372_v49, 2  ;;  %v436_v23 = vrot.slane %v374_v50, 1  ;;  %v2045_v40 = vld [vmem:[%s1916_s19 + $0x50] sm:$0x22]  ;;  %v2054_v45 = vld [vmem:[%s1916_s19 + $0x58] sm:$0x22] }
  0x21   : > { %v403_v29 = vsel %vm385_vm3, %v402_v55, %v401_v16  ;;  %v427_v30 = vsel %vm379_vm1, %v426_v62, %v425_v21  ;;  %v1584_v34 = vcombine.high %v2003_v53, %v2003_v53  ;;  %v1586_v35 = vcombine.high %v2006_v58, %v2006_v58  ;;  %v2057_v46 = vld [vmem:[%s1916_s19 + $0x60] sm:$0x22]  ;;  %v2060_v47 = vld [vmem:[%s1916_s19 + $0x68] sm:$0x22]  ;;  %v2069_v52 = vld [vmem:[%s1916_s19 + $0x70] sm:$0x22] }
  0x22   : > { %v405_v36 = vsel %vm388_vm4, %v404_v56, %v403_v29  ;;  %v429_v37 = vsel %vm382_vm2, %v428_v8, %v427_v30  ;;  %v1588_v41 = vcombine.high %v2010_v63, %v2010_v63  ;;  %v1590_v42 = vcombine.high %v2014_v15, %v2014_v15  ;;  %2508 = vst [vmem:[#allocation2_spill] sm:$0xff] %v2057_v46  ;;  %v2072_v54 = vld [vmem:[%s1916_s19 + $0x78] sm:$0x22] }
  0x23   : > { %v407_v43 = vsel %vm391_vm5, %v406_v57, %v405_v36  ;;  %v431_v44 = vsel %vm385_vm3, %v430_v9, %v429_v37  ;;  %2509 = vst [vmem:[#allocation3_spill] sm:$0xff] %v2060_v47  ;;  %v1592_v48 = vcombine.high %v2019_v24, %v2019_v24  ;;  %v1594_v49 = vcombine.high %v2022_v28, %v2022_v28 }
  0x24   : > { %v409_v50 = vsel %vm394_vm6, %v408_v60, %v407_v43  ;;  %v433_v51 = vsel %vm388_vm4, %v432_v14, %v431_v44  ;;  %2510 = vst [vmem:[#allocation4_spill] sm:$0xff] %v2069_v52  ;;  %2511 = vst [vmem:[#allocation5_spill] sm:$0xff] %v2072_v54  ;;  %v1596_v55 = vcombine.high %v2027_v31, %v2027_v31  ;;  %v641_v29 = vunpack.c.l.b16 %v1586_v35 }
  0x25   : > { %v1598_v56 = vcombine.high %v2030_v33, %v2030_v33  ;;  %v435_v57 = vsel %vm391_vm5, %v434_v22, %v433_v51  ;;  %v1600_v59 = vcombine.high %v2039_v38, %v2039_v38  ;;  %v1602_v60 = vcombine.high %v2042_v39, %v2042_v39 }
  0x26   : > { %v1604_v61 = vcombine.high %v2045_v40, %v2045_v40  ;;  %v437_v62 = vsel %vm394_vm6, %v436_v23, %v435_v57  ;;  %v1606_v7 = vcombine.high %v2054_v45, %v2054_v45  ;;  %v1608_v8 = vcombine.high %v2057_v46, %v2057_v46 }
  0x27   : > { %v1610_v9 = vcombine.high %v2060_v47, %v2060_v47  ;;  %v439_v14 = vpack.c.b16 %v437_v62, %v409_v50  ;;  %v1612_v16 = vcombine.high %v2069_v52, %v2069_v52  ;;  %v1614_v21 = vcombine.high %v2072_v54, %v2072_v54 }
  0x28   : > { %v639_v22 = vunpack.c.l.b16 %v1584_v34  ;;  %v643_v30 = vunpack.c.l.b16 %v1588_v41  ;;  %v645_v23 = vunpack.c.l.b16 %v1590_v42  ;;  %v647_v36 = vunpack.c.l.b16 %v1592_v48 }
  0x29   : > { %449 = vmatprep.subr.bf16.mxu0 %v439_v14  ;;  %v649_v37 = vunpack.c.l.b16 %v1594_v49  ;;  %v651_v43 = vunpack.c.l.b16 %v1596_v55  ;;  %v653_v44 = vunpack.c.l.b16 %v1598_v56  ;;  %v655_v51 = vunpack.c.l.b16 %v1600_v59 }
  0x2a   : > { %v657_v57 = vunpack.c.l.b16 %v1602_v60  ;;  %v659_v0 = vunpack.c.l.b16 %v1604_v61  ;;  %v661_v17 = vunpack.c.l.b16 %v1606_v7  ;;  %v663_v50 = vunpack.c.l.b16 %v1608_v8 }
  0x2b   : > { %v665_v62 = vunpack.c.l.b16 %v1610_v9  ;;  %v667_v10 = vunpack.c.l.b16 %v1612_v16  ;;  %v669_v52 = vunpack.c.l.b16 %v1614_v21  ;;  %v684_v47 = vrot.slane %v639_v22, 2 }
  0x2c   : > { %v685_v46 = vrot.slane %v641_v29, 1  ;;  %v688_v54 = vrot.slane %v645_v23, 7  ;;  %v690_v34 = vrot.slane %v647_v36, 6  ;;  %v692_v35 = vrot.slane %v649_v37, 5 }
  0x2d   : > { %v694_v41 = vrot.slane %v651_v43, 4  ;;  %v696_v42 = vrot.slane %v653_v44, 3  ;;  %v712_v48 = vrot.slane %v655_v51, 2  ;;  %v713_v14 = vrot.slane %v657_v57, 1 }
  0x2e   : > { %v686_v49 = vsel %vm376_vm0, %v685_v46, %v684_v47  ;;  %v716_v55 = vrot.slane %v661_v17, 7  ;;  %v718_v56 = vrot.slane %v663_v50, 6  ;;  %v720_v59 = vrot.slane %v665_v62, 5 }
  0x2f   : > { %v687_v60 = vsel %vm379_vm1, %v643_v30, %v686_v49  ;;  %v714_v61 = vsel %vm376_vm0, %v713_v14, %v712_v48  ;;  %v722_v7 = vrot.slane %v667_v10, 4  ;;  %v724_v8 = vrot.slane %v669_v52, 3 }
  0x30   : > { %v689_v9 = vsel %vm382_vm2, %v688_v54, %v687_v60  ;;  %v715_v16 = vsel %vm379_vm1, %v659_v0, %v714_v61  ;;  %v1553_v21 = vcombine.low %v1925_v3, %v1925_v3  ;;  %v1555_v22 = vcombine.low %v1928_v4, %v1928_v4 }
  0x31   : > { %v691_v17 = vsel %vm385_vm3, %v690_v34, %v689_v9  ;;  %v717_v46 = vsel %vm382_vm2, %v716_v55, %v715_v16  ;;  %v1557_v47 = vcombine.low %v1931_v5, %v1931_v5  ;;  %v1559_v10 = vcombine.low %v1934_v6, %v1934_v6 }
  0x32   : > { %v693_v52 = vsel %vm388_vm4, %v692_v35, %v691_v17  ;;  %v719_v0 = vsel %vm385_vm3, %v718_v56, %v717_v46  ;;  %v1561_v3 = vcombine.low %v1945_v11, %v1945_v11  ;;  %v1563_v4 = vcombine.low %v1948_v12, %v1948_v12 }
  0x33   : > { %v695_v54 = vsel %vm391_vm5, %v694_v41, %v693_v52  ;;  %v721_v29 = vsel %vm388_vm4, %v720_v59, %v719_v0  ;;  %v1565_v5 = vcombine.low %v1951_v13, %v1951_v13  ;;  %v1567_v6 = vcombine.low %v1962_v18, %v1962_v18 }
  0x34   : > { %v697_v30 = vsel %vm394_vm6, %v696_v42, %v695_v54  ;;  %v723_v23 = vsel %vm391_vm5, %v722_v7, %v721_v29  ;;  %v1569_v11 = vcombine.low %v1965_v19, %v1965_v19  ;;  %v1571_v12 = vcombine.low %v1968_v20, %v1968_v20 }
  0x35   : > { %v725_v36 = vsel %vm394_vm6, %v724_v8, %v723_v23  ;;  %v1573_v37 = vcombine.low %v1977_v25, %v1977_v25  ;;  %v1575_v13 = vcombine.low %v1980_v26, %v1980_v26  ;;  %v1577_v18 = vcombine.low %v1983_v27, %v1983_v27 }
  0x36   : > { %v727_v43 = vpack.c.b16 %v725_v36, %v697_v30  ;;  %v1579_v44 = vcombine.low %v1992_v32, %v1992_v32  ;;  %v2512_v19 = vcombine.low %v1919_v1, %v1919_v1  ;;  %v2513_v20 = vcombine.low %v1922_v2, %v1922_v2 }
  0x37   : > { %v347_v50 = vunpack.c.l.b16 %v1553_v21  ;;  %v349_v25 = vunpack.c.l.b16 %v1555_v22  ;;  %v351_v62 = vunpack.c.l.b16 %v1557_v47  ;;  %v353_v34 = vunpack.c.l.b16 %v1559_v10 }
  0x38   : > { %v343_v51 = vunpack.c.l.b16 %v2512_v19  ;;  %v345_v57 = vunpack.c.l.b16 %v2513_v20  ;;  %730 = vmatprep.subr.bf16.mxu1 %v727_v43  ;;  %v355_v26 = vunpack.c.l.b16 %v1561_v3  ;;  %v357_v35 = vunpack.c.l.b16 %v1563_v4 }
  0x39   : > { %v359_v27 = vunpack.c.l.b16 %v1565_v5  ;;  %v361_v41 = vunpack.c.l.b16 %v1567_v6  ;;  %v363_v42 = vunpack.c.l.b16 %v1569_v11  ;;  %v365_v48 = vunpack.c.l.b16 %v1571_v12 }
  0x3a   : > { %v367_v32 = vunpack.c.l.b16 %v1573_v37  ;;  %v369_v14 = vunpack.c.l.b16 %v1575_v13  ;;  %v371_v49 = vunpack.c.l.b16 %v1577_v18  ;;  %v373_v1 = vunpack.c.l.b16 %v1579_v44 }
  0x3b   : > { %v375_v55 = vrot.slane %v345_v57, 7  ;;  %v378_v56 = vrot.slane %v347_v50, 6  ;;  %v381_v59 = vrot.slane %v349_v25, 5  ;;  %v384_v2 = vrot.slane %v351_v62, 4  ;;  %v2516_v57 = vld [vmem:[#allocation4_spill] sm:$0xff]  ;;  %v2517_v50 = vld [vmem:[#allocation5_spill] sm:$0xff] }
  0x3c   : > { %v387_v60 = vrot.slane %v353_v34, 3  ;;  %v390_v61 = vrot.slane %v355_v26, 2  ;;  %v393_v8 = vrot.slane %v357_v35, 1  ;;  %v410_v9 = vrot.slane %v361_v41, 7 }
  0x3d   : > { %v377_v7 = vsel %vm376_vm0, %v375_v55, %v343_v51  ;;  %v412_v16 = vrot.slane %v363_v42, 6  ;;  %v414_v22 = vrot.slane %v365_v48, 5  ;;  %v416_v17 = vrot.slane %v367_v32, 4 }
  0x3e   : > { %v380_v21 = vsel %vm379_vm1, %v378_v56, %v377_v7  ;;  %v418_v46 = vrot.slane %v369_v14, 3  ;;  %v411_v10 = vsel %vm376_vm0, %v410_v9, %v359_v27  ;;  %v420_v52 = vrot.slane %v371_v49, 2 }
  0x3f   : > { %v383_v47 = vsel %vm382_vm2, %v381_v59, %v380_v21  ;;  %v422_v0 = vrot.slane %v373_v1, 1  ;;  %v413_v4 = vsel %vm379_vm1, %v412_v16, %v411_v10  ;;  %v1583_v54 = vcombine.low %v2003_v53, %v2003_v53 }
  0x40   : > { %v386_v3 = vsel %vm385_vm3, %v384_v2, %v383_v47  ;;  %v1585_v29 = vcombine.low %v2006_v58, %v2006_v58  ;;  %v415_v6 = vsel %vm382_vm2, %v414_v22, %v413_v4  ;;  %v1587_v30 = vcombine.low %v2010_v63, %v2010_v63 }
  0x41   : > { %v389_v5 = vsel %vm388_vm4, %v387_v60, %v386_v3  ;;  %v1589_v23 = vcombine.low %v2014_v15, %v2014_v15  ;;  %v417_v12 = vsel %vm385_vm3, %v416_v17, %v415_v6  ;;  %v1591_v53 = vcombine.low %v2019_v24, %v2019_v24  ;;  %v2199_v17 = vld [vmem:[%s1916_s19] sm:$0x44] }
  0x42   : > { %v392_v11 = vsel %vm391_vm5, %v390_v61, %v389_v5  ;;  %v1593_v58 = vcombine.low %v2022_v28, %v2022_v28  ;;  %v419_v37 = vsel %vm388_vm4, %v418_v46, %v417_v12  ;;  %v1595_v63 = vcombine.low %v2027_v31, %v2027_v31  ;;  %v2514_v31 = vld [vmem:[#allocation2_spill] sm:$0xff]  ;;  %v2208_v5 = vld [vmem:[%s1916_s19 + $0x10] sm:$0x44] }
  0x43   : > { %v395_v36 = vsel %vm394_vm6, %v393_v8, %v392_v11  ;;  %v1597_v15 = vcombine.low %v2030_v33, %v2030_v33  ;;  %v421_v13 = vsel %vm391_vm5, %v420_v52, %v419_v37  ;;  %v1599_v18 = vcombine.low %v2039_v38, %v2039_v38  ;;  %v2515_v33 = vld [vmem:[#allocation3_spill] sm:$0xff]  ;;  %v2218_v11 = vld [vmem:[%s1916_s19 + $0x18] sm:$0x44]  ;;  %v2227_v37 = vld [vmem:[%s1916_s19 + $0x20] sm:$0x44] }
  0x44   : > { %v1601_v24 = vcombine.low %v2042_v39, %v2042_v39  ;;  %v1603_v28 = vcombine.low %v2045_v40, %v2045_v40  ;;  %v423_v43 = vsel %vm394_vm6, %v422_v0, %v421_v13  ;;  %v1605_v44 = vcombine.low %v2054_v45, %v2054_v45  ;;  %v2193_v45 = vld [vmem:[%s2499_s1] sm:$0xff]   ;;  %v2203_v0 = vld [vmem:[%s1916_s19 + $0x8] sm:$0x44] }
  0x45   : > { %v1607_v19 = vcombine.low %v2514_v31, %v2514_v31  ;;  %v1609_v51 = vcombine.low %v2515_v33, %v2515_v33  ;;  %v438_v20 = vpack.c.b16 %v423_v43, %v395_v36  ;;  %v1611_v38 = vcombine.low %v2516_v57, %v2516_v57  ;;  %v830_v33 = vld [vmem:[%s1916_s19 + $0x38] sm:$0x44] }
  0x46   : > { %v1613_v39 = vcombine.low %v2517_v50, %v2517_v50  ;;  %v638_v25 = vunpack.c.l.b16 %v1583_v54  ;;  %v640_v40 = vunpack.c.l.b16 %v1585_v29  ;;  %v642_v62 = vunpack.c.l.b16 %v1587_v30  ;;  %v831_v50 = vld [vmem:[%s1916_s19 + $0x40] sm:$0x44] }
  0x47   : > { %v644_v34 = vunpack.c.l.b16 %v1589_v23  ;;  %v646_v26 = vunpack.c.l.b16 %v1591_v53  ;;  %450 = vmatpush1.bf16.msra.mxu0 %v438_v20  ;;  %v648_v35 = vunpack.c.l.b16 %v1593_v58  ;;  %v650_v27 = vunpack.c.l.b16 %v1595_v63  ;;  %v2215_v23 = vld [vmem:[%s2499_s1 + $0x8] sm:$0xff]  }
  0x48   : > { %v652_v41 = vunpack.c.l.b16 %v1597_v15  ;;  %v654_v42 = vunpack.c.l.b16 %v1599_v18  ;;  %v656_v48 = vunpack.c.l.b16 %v1601_v24  ;;  %v658_v32 = vunpack.c.l.b16 %v1603_v28  ;;  %v828_v24 = vld [vmem:[%s1916_s19 + $0x28] sm:$0x44]  ;;  %v829_v28 = vld [vmem:[%s1916_s19 + $0x30] sm:$0x44] }
  0x49   : > { %v660_v14 = vunpack.c.l.b16 %v1605_v44  ;;  %v662_v49 = vunpack.c.l.b16 %v1607_v19  ;;  %v664_v1 = vunpack.c.l.b16 %v1609_v51  ;;  %v666_v55 = vunpack.c.l.b16 %v1611_v38 }
  0x4a   : > { %v668_v56 = vunpack.c.l.b16 %v1613_v39  ;;  %v670_v59 = vrot.slane %v638_v25, 2  ;;  %v671_v2 = vrot.slane %v640_v40, 1  ;;  %v674_v60 = vrot.slane %v644_v34, 7  ;;  %1581 = vmatmul.mubr.msk.bf16.vlgmr.msra.gmra.mrb[0].mxu0 %vm442_vm7, %v2193_v45  ;;  %v832_v39 = vld [vmem:[%s1916_s19 + $0x48] sm:$0x44] }
  0x4b   : > { %v676_v61 = vrot.slane %v646_v26, 6  ;;  %v678_v7 = vrot.slane %v648_v35, 5  ;;  %v680_v8 = vrot.slane %v650_v27, 4  ;;  %v682_v9 = vrot.slane %v652_v41, 3  ;;  %v833_v34 = vld [vmem:[%s1916_s19 + $0x50] sm:$0x44] }
  0x4c   : > { %v698_v16 = vrot.slane %v654_v42, 2  ;;  %v699_v21 = vrot.slane %v656_v48, 1  ;;  %v2518_v22 = vmov 0   ;;  %v672_v46 = vsel %vm376_vm0, %v671_v2, %v670_v59  ;;  %v834_v26 = vld [vmem:[%s1916_s19 + $0x58] sm:$0x44] }
  0x4d   : > { %491 = vmatprep.mubr.bf16.mxu0 %v2518_v22  ;;  %v702_v47 = vrot.slane %v660_v14, 7  ;;  %v704_v10 = vrot.slane %v662_v49, 6  ;;  %v706_v52 = vrot.slane %v664_v1, 5  ;;  %v673_v3 = vsel %vm379_vm1, %v642_v62, %v672_v46  ;;  %v835_v48 = vld [vmem:[%s1916_s19 + $0x60] sm:$0x44] }
  0x4e   : > { %v700_v4 = vsel %vm376_vm0, %v699_v21, %v698_v16  ;;  %v708_v54 = vrot.slane %v666_v55, 4  ;;  %v710_v29 = vrot.slane %v668_v56, 3  ;;  %v675_v6 = vsel %vm382_vm2, %v674_v60, %v673_v3  ;;  %v837_v55 = vld [vmem:[%s1916_s19 + $0x70] sm:$0x44]  ;;  %v838_v56 = vld [vmem:[%s1916_s19 + $0x78] sm:$0x44] }
  0x4f   : > { %v701_v30 = vsel %vm379_vm1, %v658_v32, %v700_v4  ;;  %v1617_v12 = vcombine.low %v2199_v17, %v2199_v17  ;;  %v1618_v53 = vcombine.high %v2199_v17, %v2199_v17  ;;  %v677_v58 = vsel %vm385_vm3, %v676_v61, %v675_v6  ;;  %v836_v32 = vld [vmem:[%s1916_s19 + $0x68] sm:$0x44] }
  0x50   : > { %v703_v36 = vsel %vm382_vm2, %v702_v47, %v701_v30  ;;  %v1619_v63 = vcombine.low %v2203_v0, %v2203_v0  ;;  %v1620_v15 = vcombine.high %v2203_v0, %v2203_v0  ;;  %v679_v13 = vsel %vm388_vm4, %v678_v7, %v677_v58 }
  0x51   : > { %v705_v18 = vsel %vm385_vm3, %v704_v10, %v703_v36  ;;  %v1621_v43 = vcombine.low %v2208_v5, %v2208_v5  ;;  %v1622_v44 = vcombine.high %v2208_v5, %v2208_v5  ;;  %v681_v31 = vsel %vm391_vm5, %v680_v8, %v679_v13 }
  0x52   : > { %v707_v19 = vsel %vm388_vm4, %v706_v52, %v705_v18  ;;  %v1623_v51 = vcombine.low %v2218_v11, %v2218_v11  ;;  %v1624_v20 = vcombine.high %v2218_v11, %v2218_v11  ;;  %v683_v57 = vsel %vm394_vm6, %v682_v9, %v681_v31  ;;  %1582 = vmatmul.mubr.msk.bf16.gmra.mrb[4].mxu0 %vm442_vm7, %v2215_v23 }
  0x53   : > { %v709_v38 = vsel %vm391_vm5, %v708_v54, %v707_v19  ;;  %v1625_v25 = vcombine.low %v2227_v37, %v2227_v37  ;;  %v1626_v40 = vcombine.high %v2227_v37, %v2227_v37  ;;  %v1627_v35 = vcombine.low %v828_v24, %v828_v24  ;;  %1043 = vmatprep.mubr.bf16.mxu0 %v2518_v22 }
  0x54   : > { %v711_v62 = vsel %vm394_vm6, %v710_v29, %v709_v38  ;;  %v1628_v27 = vcombine.high %v828_v24, %v828_v24  ;;  %v1629_v41 = vcombine.low %v829_v28, %v829_v28  ;;  %v1630_v14 = vcombine.high %v829_v28, %v829_v28 }
  0x55   : > { %v726_v42 = vpack.c.b16 %v711_v62, %v683_v57  ;;  %v1631_v49 = vcombine.low %v830_v33, %v830_v33  ;;  %v1632_v1 = vcombine.high %v830_v33, %v830_v33  ;;  %v1633_v59 = vcombine.low %v831_v50, %v831_v50 }
  0x56   : > { %v1634_v2 = vcombine.high %v831_v50, %v831_v50  ;;  %v1635_v60 = vcombine.low %v832_v39, %v832_v39  ;;  %v1636_v61 = vcombine.high %v832_v39, %v832_v39  ;;  %v1637_v7 = vcombine.low %v833_v34, %v833_v34 }
  0x57   : > { %731 = vmatpush1.bf16.msra.mxu1 %v726_v42  ;;  %v1638_v8 = vcombine.high %v833_v34, %v833_v34  ;;  %v1639_v9 = vcombine.low %v834_v26, %v834_v26  ;;  %v1640_v16 = vcombine.high %v834_v26, %v834_v26  ;;  %v1641_v21 = vcombine.low %v835_v48, %v835_v48 }
  0x58   : > { %v1642_v17 = vcombine.high %v835_v48, %v835_v48  ;;  %v1643_v46 = vcombine.low %v836_v32, %v836_v32  ;;  %v1644_v47 = vcombine.high %v836_v32, %v836_v32  ;;  %v1645_v10 = vcombine.low %v837_v55, %v837_v55 }
  0x59   : > { %v1646_v52 = vcombine.high %v837_v55, %v837_v55  ;;  %v1647_v0 = vcombine.low %v838_v56, %v838_v56  ;;  %v1648_v3 = vcombine.high %v838_v56, %v838_v56  ;;  %v2268_v4 = vunpack.c.l.b16 %v1617_v12 }
  0x5a   : > { %1615 = vmatmul.mubr.msk.bf16.vlgmr.msra.gmra.mrb[0].mxu1 %vm442_vm7, %v2193_v45  ;;  %v920_v54 = vunpack.c.l.b16 %v1618_v53  ;;  %v921_v29 = vunpack.c.l.b16 %v1619_v63  ;;  %v922_v5 = vunpack.c.l.b16 %v1620_v15  ;;  %v2270_v6 = vunpack.c.l.b16 %v1621_v43 }
  0x5b   : > { %v924_v30 = vunpack.c.l.b16 %v1622_v44  ;;  %v2272_v11 = vunpack.c.l.b16 %v1623_v51  ;;  %v926_v58 = vunpack.c.l.b16 %v1624_v20  ;;  %772 = vmatprep.mubr.bf16.mxu1 %v2518_v22  ;;  %v2275_v36 = vunpack.c.l.b16 %v1625_v25 }
  0x5c   : > { %v928_v37 = vunpack.c.l.b16 %v1626_v40  ;;  %v2277_v13 = vunpack.c.l.b16 %v1627_v35  ;;  %v930_v18 = vunpack.c.l.b16 %v1628_v27  ;;  %v2279_v24 = vunpack.c.l.b16 %v1629_v41 }
  0x5d   : > { %v932_v12 = vunpack.c.l.b16 %v1630_v14  ;;  %v2281_v53 = vunpack.c.l.b16 %v1631_v49  ;;  %v934_v63 = vunpack.c.l.b16 %v1632_v1  ;;  %v2283_v15 = vunpack.c.l.b16 %v1633_v59 }
  0x5e   : > { %v936_v28 = vunpack.c.l.b16 %v1634_v2  ;;  %v2285_v43 = vunpack.c.l.b16 %v1635_v60  ;;  %v938_v44 = vunpack.c.l.b16 %v1636_v61  ;;  %v2287_v31 = vunpack.c.l.b16 %v1637_v7 }
  0x5f   : > { %v940_v19 = vunpack.c.l.b16 %v1638_v8  ;;  %v2289_v33 = vunpack.c.l.b16 %v1639_v9  ;;  %v942_v51 = vunpack.c.l.b16 %v1640_v16  ;;  %v2291_v20 = vunpack.c.l.b16 %v1641_v21 }
  0x60   : > { %v944_v57 = vunpack.c.l.b16 %v1642_v17  ;;  %v2293_v38 = vunpack.c.l.b16 %v1643_v46  ;;  %v946_v50 = vunpack.c.l.b16 %v1644_v47  ;;  %v2295_v39 = vunpack.c.l.b16 %v1645_v10 }
  0x61   : > { %v948_v25 = vunpack.c.l.b16 %v1646_v52  ;;  %v2297_v40 = vunpack.c.l.b16 %v1647_v0  ;;  %v950_v62 = vunpack.c.l.b16 %v1648_v3  ;;  %v965_v34 = vrot.slane %v920_v54, 4 }
  0x62   : > { %v966_v26 = vrot.slane %v922_v5, 3  ;;  %v968_v35 = vrot.slane %v924_v30, 2  ;;  %v970_v27 = vrot.slane %v926_v58, 1  ;;  %1616 = vmatmul.mubr.msk.bf16.gmra.mrb[4].mxu1 %vm442_vm7, %v2215_v23  ;;  %v973_v41 = vrot.slane %v930_v18, 7 }
  0x63   : > { %v975_v42 = vrot.slane %v932_v12, 6  ;;  %v977_v48 = vrot.slane %v934_v63, 5  ;;  %v993_v32 = vrot.slane %v936_v28, 4  ;;  %1324 = vmatprep.mubr.bf16.mxu1 %v2518_v22  ;;  %v994_v49 = vrot.slane %v938_v44, 3  ;;  %v2333_v28 = vld [vmem:[%s1916_s19] sm:$0x88] }
  0x64   : > { %v967_v14 = vsel %vm376_vm0, %v966_v26, %v965_v34  ;;  %v996_v1 = vrot.slane %v940_v19, 2  ;;  %v998_v55 = vrot.slane %v942_v51, 1  ;;  %v1001_v59 = vrot.slane %v946_v50, 7  ;;  %v1105_v19 = vld [vmem:[%s1916_s19 + $0x8] sm:$0x88] }
  0x65   : > { %v969_v56 = vsel %vm379_vm1, %v968_v35, %v967_v14  ;;  %v1003_v2 = vrot.slane %v948_v25, 6  ;;  %v1005_v60 = vrot.slane %v950_v62, 5  ;;  %v995_v7 = vsel %vm376_vm0, %v994_v49, %v993_v32  ;;  %v2343_v50 = vld [vmem:[%s1916_s19 + $0x18] sm:$0x88]  ;;  %v1108_v34 = vld [vmem:[%s1916_s19 + $0x20] sm:$0x88] }
  0x66   : > { %v971_v61 = vsel %vm382_vm2, %v970_v27, %v969_v56  ;;  %v951_v8 = vrot.slane %v2268_v4, 4  ;;  %v952_v9 = vrot.slane %v921_v29, 3  ;;  %v997_v21 = vsel %vm379_vm1, %v996_v1, %v995_v7  ;;  %v1109_v26 = vld [vmem:[%s1916_s19 + $0x28] sm:$0x88]  ;;  %v1110_v35 = vld [vmem:[%s1916_s19 + $0x30] sm:$0x88] }
  0x67   : > { %v972_v16 = vsel %vm385_vm3, %v928_v37, %v971_v61  ;;  %v954_v17 = vrot.slane %v2270_v6, 2  ;;  %v956_v46 = vrot.slane %v2272_v11, 1  ;;  %v999_v10 = vsel %vm382_vm2, %v998_v55, %v997_v21  ;;  %v1112_v1 = vld [vmem:[%s1916_s19 + $0x40] sm:$0x88]  ;;  %v1113_v55 = vld [vmem:[%s1916_s19 + $0x48] sm:$0x88] }
  0x68   : > { %v974_v47 = vsel %vm388_vm4, %v973_v41, %v972_v16  ;;  %v953_v52 = vsel %vm376_vm0, %v952_v9, %v951_v8  ;;  %v959_v0 = vrot.slane %v2277_v13, 7  ;;  %v1000_v4 = vsel %vm385_vm3, %v944_v57, %v999_v10  ;;  %v1114_v61 = vld [vmem:[%s1916_s19 + $0x50] sm:$0x88]  ;;  %v1115_v7 = vld [vmem:[%s1916_s19 + $0x58] sm:$0x88] }
  0x69   : > { %v976_v3 = vsel %vm391_vm5, %v975_v42, %v974_v47  ;;  %v955_v54 = vsel %vm379_vm1, %v954_v17, %v953_v52  ;;  %v961_v29 = vrot.slane %v2279_v24, 6  ;;  %v1002_v6 = vsel %vm388_vm4, %v1001_v59, %v1000_v4  ;;  %v1116_v17 = vld [vmem:[%s1916_s19 + $0x60] sm:$0x88] }
  0x6a   : > { %v978_v5 = vsel %vm394_vm6, %v977_v48, %v976_v3  ;;  %v957_v30 = vsel %vm382_vm2, %v956_v46, %v955_v54  ;;  %v963_v11 = vrot.slane %v2281_v53, 5  ;;  %v1004_v58 = vsel %vm391_vm5, %v1003_v2, %v1002_v6  ;;  %v1117_v46 = vld [vmem:[%s1916_s19 + $0x68] sm:$0x88]  ;;  %v2375_v3 = vld [vmem:[%s1916_s19 + $0x78] sm:$0x88] }
  0x6b   : > { %v958_v37 = vsel %vm385_vm3, %v2275_v36, %v957_v30  ;;  %v979_v13 = vrot.slane %v2283_v15, 4  ;;  %v980_v18 = vrot.slane %v2285_v43, 3  ;;  %v1006_v24 = vsel %vm394_vm6, %v1005_v60, %v1004_v58 }
  0x6c   : > { %v960_v12 = vsel %vm388_vm4, %v959_v0, %v958_v37  ;;  %v982_v63 = vrot.slane %v2287_v31, 2  ;;  %v984_v53 = vrot.slane %v2289_v33, 1  ;;  %v1008_v44 = vpack.c.b16 %v1006_v24, %v978_v5  ;;  %v1106_v31 = vld [vmem:[%s1916_s19 + $0x10] sm:$0x88] }
  0x6d   : > { %v962_v36 = vsel %vm391_vm5, %v961_v29, %v960_v12  ;;  %v981_v15 = vsel %vm376_vm0, %v980_v18, %v979_v13  ;;  %v987_v43 = vrot.slane %v2293_v38, 7  ;;  %v989_v57 = vrot.slane %v2295_v39, 6  ;;  %v2372_v0 = vld [vmem:[%s1916_s19 + $0x70] sm:$0x88] }
  0x6e   : > { %v983_v51 = vsel %vm379_vm1, %v982_v63, %v981_v15  ;;  %1011 = vmatprep.subr.bf16.mxu0 %v1008_v44  ;;  %v964_v33 = vsel %vm394_vm6, %v963_v11, %v962_v36  ;;  %v991_v62 = vrot.slane %v2297_v40, 5  ;;  %v1651_v38 = vcombine.low %v2333_v28, %v2333_v28  ;;  %v1111_v40 = vld [vmem:[%s1916_s19 + $0x38] sm:$0x88] }
  0x6f   : > { %v985_v25 = vsel %vm382_vm2, %v984_v53, %v983_v51  ;;  %v1652_v27 = vcombine.high %v2333_v28, %v2333_v28  ;;  %v1653_v41 = vcombine.low %v1105_v19, %v1105_v19  ;;  %v1654_v42 = vcombine.high %v1105_v19, %v1105_v19 }
  0x70   : > { %v986_v39 = vsel %vm385_vm3, %v2291_v20, %v985_v25  ;;  %v1655_v32 = vcombine.low %v1106_v31, %v1106_v31  ;;  %v1656_v14 = vcombine.high %v1106_v31, %v1106_v31  ;;  %v1657_v49 = vcombine.low %v2343_v50, %v2343_v50 }
  0x71   : > { %v988_v48 = vsel %vm388_vm4, %v987_v43, %v986_v39  ;;  %v1658_v56 = vcombine.high %v2343_v50, %v2343_v50  ;;  %v1659_v59 = vcombine.low %v1108_v34, %v1108_v34  ;;  %v1660_v2 = vcombine.high %v1108_v34, %v1108_v34 }
  0x72   : > { %v990_v20 = vsel %vm391_vm5, %v989_v57, %v988_v48  ;;  %v1661_v8 = vcombine.low %v1109_v26, %v1109_v26  ;;  %v1662_v9 = vcombine.high %v1109_v26, %v1109_v26  ;;  %v1663_v16 = vcombine.low %v1110_v35, %v1110_v35 }
  0x73   : > { %v992_v60 = vsel %vm394_vm6, %v991_v62, %v990_v20  ;;  %v1664_v47 = vcombine.high %v1110_v35, %v1110_v35  ;;  %v1665_v10 = vcombine.low %v1111_v40, %v1111_v40  ;;  %v1666_v52 = vcombine.high %v1111_v40, %v1111_v40 }
  0x74   : > { %v1007_v21 = vpack.c.b16 %v992_v60, %v964_v33  ;;  %v1667_v4 = vcombine.low %v1112_v1, %v1112_v1  ;;  %v1668_v54 = vcombine.high %v1112_v1, %v1112_v1  ;;  %v1669_v29 = vcombine.low %v1113_v55, %v1113_v55 }
  0x75   : > { %v1670_v5 = vcombine.high %v1113_v55, %v1113_v55  ;;  %v1671_v6 = vcombine.low %v1114_v61, %v1114_v61  ;;  %v1672_v30 = vcombine.high %v1114_v61, %v1114_v61  ;;  %v1673_v11 = vcombine.low %v1115_v7, %v1115_v7 }
  0x76   : > { %1012 = vmatpush1.bf16.msra.mxu0 %v1007_v21  ;;  %v1674_v58 = vcombine.high %v1115_v7, %v1115_v7  ;;  %v1675_v37 = vcombine.low %v1116_v17, %v1116_v17  ;;  %v1676_v13 = vcombine.high %v1116_v17, %v1116_v17  ;;  %v1677_v18 = vcombine.low %v1117_v46, %v1117_v46 }
  0x77   : > { %v1678_v24 = vcombine.high %v1117_v46, %v1117_v46  ;;  %v1679_v12 = vcombine.low %v2372_v0, %v2372_v0  ;;  %v1680_v63 = vcombine.high %v2372_v0, %v2372_v0  ;;  %v1681_v53 = vcombine.low %v2375_v3, %v2375_v3 }
  0x78   : > { %v1682_v28 = vcombine.high %v2375_v3, %v2375_v3  ;;  %v2385_v44 = vunpack.c.l.b16 %v1651_v38  ;;  %v1201_v36 = vunpack.c.l.b16 %v1652_v27  ;;  %v1202_v15 = vunpack.c.l.b16 %v1653_v41 }
  0x79   : > { %v1203_v43 = vunpack.c.l.b16 %v1654_v42  ;;  %1649 = vmatmul.mubr.msk.bf16.vlgmr.msra.gmra.mrb[8].mxu0 %vm442_vm7, %v2193_v45  ;;  %v1204_v19 = vunpack.c.l.b16 %v1655_v32  ;;  %v1205_v51 = vunpack.c.l.b16 %v1656_v14  ;;  %v2389_v57 = vunpack.c.l.b16 %v1657_v49 }
  0x7a   : > { %v1207_v31 = vunpack.c.l.b16 %v1658_v56  ;;  %1053 = vmatprep.mubr.bf16.mxu0 %v2518_v22  ;;  %v2392_v50 = vunpack.c.l.b16 %v1659_v59  ;;  %v1209_v33 = vunpack.c.l.b16 %v1660_v2  ;;  %v2394_v25 = vunpack.c.l.b16 %v1661_v8 }
  0x7b   : > { %v1211_v62 = vunpack.c.l.b16 %v1662_v9  ;;  %v2396_v34 = vunpack.c.l.b16 %v1663_v16  ;;  %v1213_v38 = vunpack.c.l.b16 %v1664_v47  ;;  %v2398_v39 = vunpack.c.l.b16 %v1665_v10 }
  0x7c   : > { %v1215_v26 = vunpack.c.l.b16 %v1666_v52  ;;  %v2400_v35 = vunpack.c.l.b16 %v1667_v4  ;;  %v1217_v27 = vunpack.c.l.b16 %v1668_v54  ;;  %v1218_v41 = vunpack.c.l.b16 %v1669_v29 }
  0x7d   : > { %v1219_v42 = vunpack.c.l.b16 %v1670_v5  ;;  %v2402_v48 = vunpack.c.l.b16 %v1671_v6  ;;  %v1221_v40 = vunpack.c.l.b16 %v1672_v30  ;;  %v2404_v32 = vunpack.c.l.b16 %v1673_v11 }
  0x7e   : > { %v1223_v14 = vunpack.c.l.b16 %v1674_v58  ;;  %v2406_v49 = vunpack.c.l.b16 %v1675_v37  ;;  %v1225_v20 = vunpack.c.l.b16 %v1676_v13  ;;  %v2408_v1 = vunpack.c.l.b16 %v1677_v18 }
  0x7f   : > { %v1227_v55 = vunpack.c.l.b16 %v1678_v24  ;;  %v1229_v56 = vunpack.c.l.b16 %v1680_v63  ;;  %v1231_v59 = vunpack.c.l.b16 %v1682_v28  ;;  %v1246_v2 = vrot.slane %v1201_v36, 6 }
  0x80   : > { %v1247_v60 = vrot.slane %v1203_v43, 5  ;;  %v1249_v61 = vrot.slane %v1205_v51, 4  ;;  %v1251_v7 = vrot.slane %v1207_v31, 3  ;;  %v1253_v8 = vrot.slane %v1209_v33, 2 }
  0x81   : > { %v1255_v9 = vrot.slane %v1211_v62, 1  ;;  %1650 = vmatmul.mubr.msk.bf16.gmra.mrb[12].mxu0 %vm442_vm7, %v2215_v23  ;;  %v1258_v21 = vrot.slane %v1215_v26, 7  ;;  %v1274_v17 = vrot.slane %v1217_v27, 6  ;;  %v1275_v46 = vrot.slane %v1219_v42, 5 }
  0x82   : > { %v1248_v16 = vsel %vm376_vm0, %v1247_v60, %v1246_v2  ;;  %v1277_v10 = vrot.slane %v1221_v40, 4  ;;  %v1279_v52 = vrot.slane %v1223_v14, 3  ;;  %v1281_v4 = vrot.slane %v1225_v20, 2 }
  0x83   : > { %v1250_v47 = vsel %vm379_vm1, %v1249_v61, %v1248_v16  ;;  %v1276_v29 = vsel %vm376_vm0, %v1275_v46, %v1274_v17  ;;  %v1283_v5 = vrot.slane %v1227_v55, 1  ;;  %v1286_v6 = vrot.slane %v1231_v59, 7 }
  0x84   : > { %v1252_v54 = vsel %vm382_vm2, %v1251_v7, %v1250_v47  ;;  %v1278_v11 = vsel %vm379_vm1, %v1277_v10, %v1276_v29  ;;  %v1232_v58 = vrot.slane %v2385_v44, 6  ;;  %v1233_v37 = vrot.slane %v1202_v15, 5 }
  0x85   : > { %v1254_v30 = vsel %vm385_vm3, %v1253_v8, %v1252_v54  ;;  %v1280_v18 = vsel %vm382_vm2, %v1279_v52, %v1278_v11  ;;  %v1235_v24 = vrot.slane %v1204_v19, 4  ;;  %v1237_v63 = vrot.slane %v2389_v57, 3 }
  0x86   : > { %v1256_v13 = vsel %vm388_vm4, %v1255_v9, %v1254_v30  ;;  %v1282_v36 = vsel %vm385_vm3, %v1281_v4, %v1280_v18  ;;  %v1234_v43 = vsel %vm376_vm0, %v1233_v37, %v1232_v58  ;;  %v1239_v51 = vrot.slane %v2392_v50, 2 }
  0x87   : > { %v1257_v28 = vsel %vm391_vm5, %v1213_v38, %v1256_v13  ;;  %v1284_v44 = vsel %vm388_vm4, %v1283_v5, %v1282_v36  ;;  %v1236_v15 = vsel %vm379_vm1, %v1235_v24, %v1234_v43  ;;  %v1241_v33 = vrot.slane %v2394_v25, 1 }
  0x88   : > { %v1259_v31 = vsel %vm394_vm6, %v1258_v21, %v1257_v28  ;;  %v1230_v19 = vunpack.c.l.b16 %v1681_v53  ;;  %v1285_v57 = vsel %vm391_vm5, %v1229_v56, %v1284_v44  ;;  %v1238_v62 = vsel %vm382_vm2, %v1237_v63, %v1236_v15 }
  0x89   : > { %v1260_v38 = vrot.slane %v2400_v35, 6  ;;  %v1287_v50 = vsel %vm394_vm6, %v1286_v6, %v1285_v57  ;;  %v1240_v26 = vsel %vm385_vm3, %v1239_v51, %v1238_v62  ;;  %v1261_v27 = vrot.slane %v1218_v41, 5 }
  0x8a   : > { %v1263_v42 = vrot.slane %v2402_v48, 4  ;;  %v1289_v40 = vpack.c.b16 %v1287_v50, %v1259_v31  ;;  %v1242_v25 = vsel %vm388_vm4, %v1241_v33, %v1240_v26  ;;  %v1265_v14 = vrot.slane %v2404_v32, 3 }
  0x8b   : > { %v1267_v3 = vrot.slane %v2406_v49, 2  ;;  %v1244_v53 = vrot.slane %v2398_v39, 7  ;;  %v1262_v20 = vsel %vm376_vm0, %v1261_v27, %v1260_v38  ;;  %v1269_v35 = vrot.slane %v2408_v1, 1 }
  0x8c   : > { %v1228_v55 = vunpack.c.l.b16 %v1679_v12  ;;  %1292 = vmatprep.subr.bf16.mxu1 %v1289_v40  ;;  %v1243_v41 = vsel %vm391_vm5, %v2396_v34, %v1242_v25  ;;  %v1264_v48 = vsel %vm379_vm1, %v1263_v42, %v1262_v20  ;;  %v1272_v56 = vrot.slane %v1230_v19, 7 }
  0x8d   : > { %v1266_v32 = vsel %vm382_vm2, %v1265_v14, %v1264_v48  ;;  %v1245_v39 = vsel %vm394_vm6, %v1244_v53, %v1243_v41 }
  0x8e   : > { %v1268_v49 = vsel %vm385_vm3, %v1267_v3, %v1266_v32 }
  0x8f   : > { %v1270_v59 = vsel %vm388_vm4, %v1269_v35, %v1268_v49 }
  0x90   : > { %v1271_v1 = vsel %vm391_vm5, %v1228_v55, %v1270_v59 }
  0x91   : > { %v1273_v0 = vsel %vm394_vm6, %v1272_v56, %v1271_v1 }
  0x92   : > { %v1288_v12 = vpack.c.b16 %v1273_v0, %v1245_v39 }
  0x94   : > { %1293 = vmatpush1.bf16.msra.mxu1 %v1288_v12 }
  0x97   : > { %1683 = vmatmul.mubr.msk.bf16.vlgmr.msra.gmra.mrb[8].mxu1 %vm442_vm7, %v2193_v45 }
  0x98   : > { %1334 = vmatprep.mubr.bf16.mxu1 %v2518_v22 }
  0x9f   : > { %1684 = vmatmul.mubr.msk.bf16.gmra.mrb[12].mxu1 %vm442_vm7, %v2215_v23 }
 0x11d   : > { %v483_v34 = vpop.f32.mrb[0].mxu0 }
 0x11e   : > { %v518_v2 = vmul.f32 %v483_v34, %v483_v34  ;;  %v485_v60 = vpop.f32.mrb[1].mxu0 }
 0x11f   : > { %v519_v61 = vmul.f32 %v485_v60, %v485_v60  ;;  %v487_v7 = vpop.f32.mrb[2].mxu0  ;;  %v502_v8 = vadd.f32 %v485_v60, %v483_v34 }
 0x120   : > { %v520_v9 = vmul.f32 %v487_v7, %v487_v7  ;;  %v489_v16 = vpop.f32.mrb[3].mxu0 }
 0x121   : > { %v521_v21 = vmul.f32 %v489_v16, %v489_v16  ;;  %503 = vadd.xlane.f32.xlu0 %v502_v8  ;;  %v505_v17 = vadd.f32 %v489_v16, %v487_v7  ;;  %v526_v46 = vadd.f32 %v519_v61, %v518_v2 }
 0x123   : > { %v529_v47 = vadd.f32 %v521_v21, %v520_v9 }
 0x125   : > { %v493_v10 = vpop.f32.mrb[4].mxu0 }
 0x126   : > { %v522_v45 = vmul.f32 %v493_v10, %v493_v10  ;;  %v495_v52 = vpop.f32.mrb[5].mxu0 }
 0x127   : > { %v523_v22 = vmul.f32 %v495_v52, %v495_v52  ;;  %v497_v4 = vpop.f32.mrb[6].mxu0  ;;  %v508_v54 = vadd.f32 %v495_v52, %v493_v10 }
 0x128   : > { %v524_v23 = vmul.f32 %v497_v4, %v497_v4  ;;  %v499_v29 = vpop.f32.mrb[7].mxu0 }
 0x129   : > { %v525_v5 = vmul.f32 %v499_v29, %v499_v29  ;;  %v511_v6 = vadd.f32 %v499_v29, %v497_v4  ;;  %v532_v30 = vadd.f32 %v523_v22, %v522_v45 }
 0x12b   : > { %v535_v11 = vadd.f32 %v525_v5, %v524_v23 }
 0x12d   : > { %v764_v58 = vpop.f32.mrb[0].mxu1 }
 0x12e   : > { %v799_v37 = vmul.f32 %v764_v58, %v764_v58  ;;  %v766_v13 = vpop.f32.mrb[1].mxu1 }
 0x12f   : > { %v800_v18 = vmul.f32 %v766_v13, %v766_v13  ;;  %v768_v24 = vpop.f32.mrb[2].mxu1  ;;  %v783_v63 = vadd.f32 %v766_v13, %v764_v58 }
 0x130   : > { %v801_v28 = vmul.f32 %v768_v24, %v768_v24  ;;  %v770_v36 = vpop.f32.mrb[3].mxu1 }
 0x131   : > { %v802_v43 = vmul.f32 %v770_v36, %v770_v36  ;;  %v786_v51 = vadd.f32 %v770_v36, %v768_v24  ;;  %784 = vadd.xlane.f32.xlu0 %v783_v63  ;;  %v807_v31 = vadd.f32 %v800_v18, %v799_v37 }
 0x133   : > { %787 = vadd.xlane.f32.xlu1 %v786_v51  ;;  %v810_v44 = vadd.f32 %v802_v43, %v801_v28 }
 0x135   : > { %506 = vadd.xlane.f32.xlu0 %v505_v17  ;;  %v774_v15 = vpop.f32.mrb[4].mxu1 }
 0x136   : > { %v803_v33 = vmul.f32 %v774_v15, %v774_v15  ;;  %v776_v19 = vpop.f32.mrb[5].mxu1 }
 0x137   : > { %530 = vadd.xlane.f32.xlu1 %v529_v47  ;;  %v804_v57 = vmul.f32 %v776_v19, %v776_v19  ;;  %v778_v62 = vpop.f32.mrb[6].mxu1  ;;  %v789_v38 = vadd.f32 %v776_v19, %v774_v15 }
 0x138   : > { %v805_v50 = vmul.f32 %v778_v62, %v778_v62  ;;  %v780_v26 = vpop.f32.mrb[7].mxu1 }
 0x139   : > { %527 = vadd.xlane.f32.xlu0 %v526_v46  ;;  %v806_v27 = vmul.f32 %v780_v26, %v780_v26  ;;  %v792_v42 = vadd.f32 %v780_v26, %v778_v62  ;;  %v813_v40 = vadd.f32 %v804_v57, %v803_v33 }
 0x13b   : > { %811 = vadd.xlane.f32.xlu1 %v810_v44  ;;  %v816_v25 = vadd.f32 %v806_v27, %v805_v50 }
 0x13d   : > { %808 = vadd.xlane.f32.xlu0 %v807_v31 }
 0x13f   : > { %509 = vadd.xlane.f32.xlu1 %v508_v54 }
 0x141   : > { %790 = vadd.xlane.f32.xlu0 %v789_v38 }
 0x143   : > { %512 = vadd.xlane.f32.xlu1 %v511_v6 }
 0x145   : > { %533 = vadd.xlane.f32.xlu0 %v532_v30 }
 0x147   : > { %793 = vadd.xlane.f32.xlu1 %v792_v42 }
 0x149   : > { %814 = vadd.xlane.f32.xlu0 %v813_v40 }
 0x14b   : > { %536 = vadd.xlane.f32.xlu1 %v535_v11 }
 0x14c   : > { %v1045_v14 = vpop.f32.mrb[8].mxu0 }
 0x14d   : > { %v1080_v3 = vmul.f32 %v1045_v14, %v1045_v14  ;;  %v1047_v53 = vpop.f32.mrb[9].mxu0 }
 0x14e   : > { %v1081_v20 = vmul.f32 %v1047_v53, %v1047_v53  ;;  %v1049_v35 = vpop.f32.mrb[10].mxu0  ;;  %v1064_v55 = vadd.f32 %v1047_v53, %v1045_v14 }
 0x14f   : > { %v1082_v41 = vmul.f32 %v1049_v35, %v1049_v35  ;;  %v1051_v48 = vpop.f32.mrb[11].mxu0  ;;  %817 = vadd.xlane.f32.xlu1 %v816_v25 }
 0x150   : > { %v1083_v32 = vmul.f32 %v1051_v48, %v1051_v48  ;;  %1065 = vadd.xlane.f32.xlu0 %v1064_v55  ;;  %v1067_v56 = vadd.f32 %v1051_v48, %v1049_v35  ;;  %v1088_v49 = vadd.f32 %v1081_v20, %v1080_v3 }
 0x152   : > { %v1091_v39 = vadd.f32 %v1083_v32, %v1082_v41 }
 0x153   : > { %1068 = vadd.xlane.f32.xlu1 %v1067_v56 }
 0x154   : > { %v1055_v59 = vpop.f32.mrb[12].mxu0 }
 0x155   : > { %v1084_v1 = vmul.f32 %v1055_v59, %v1055_v59  ;;  %v1057_v0 = vpop.f32.mrb[13].mxu0 }
 0x156   : > { %v1085_v12 = vmul.f32 %v1057_v0, %v1057_v0  ;;  %v1059_v34 = vpop.f32.mrb[14].mxu0  ;;  %v1070_v2 = vadd.f32 %v1057_v0, %v1055_v59 }
 0x157   : > { %v1086_v60 = vmul.f32 %v1059_v34, %v1059_v34  ;;  %v1061_v61 = vpop.f32.mrb[15].mxu0 }
 0x158   : > { %v1073_v7 = vadd.f32 %v1061_v61, %v1059_v34  ;;  %v1087_v8 = vmul.f32 %v1061_v61, %v1061_v61  ;;  %v1094_v9 = vadd.f32 %v1085_v12, %v1084_v1 }
 0x15a   : > { %v1097_v16 = vadd.f32 %v1087_v8, %v1086_v60 }
 0x16a   : > { %v1326_v21 = vpop.f32.mrb[8].mxu1 }
 0x16b   : > { %v1361_v17 = vmul.f32 %v1326_v21, %v1326_v21  ;;  %v1328_v46 = vpop.f32.mrb[9].mxu1 }
 0x16c   : > { %v1362_v47 = vmul.f32 %v1328_v46, %v1328_v46  ;;  %v1330_v10 = vpop.f32.mrb[10].mxu1  ;;  %v1345_v45 = vadd.f32 %v1328_v46, %v1326_v21 }
 0x16d   : > { %v1363_v52 = vmul.f32 %v1330_v10, %v1330_v10  ;;  %v1332_v22 = vpop.f32.mrb[11].mxu1 }
 0x16e   : > { %v1364_v4 = vmul.f32 %v1332_v22, %v1332_v22  ;;  %1346 = vadd.xlane.f32.xlu0 %v1345_v45  ;;  %v1348_v54 = vadd.f32 %v1332_v22, %v1330_v10  ;;  %v1369_v23 = vadd.f32 %v1362_v47, %v1361_v17 }
 0x170   : > { %1349 = vadd.xlane.f32.xlu1 %v1348_v54  ;;  %v1372_v29 = vadd.f32 %v1364_v4, %v1363_v52 }
 0x172   : > { %1089 = vadd.xlane.f32.xlu0 %v1088_v49  ;;  %v1336_v5 = vpop.f32.mrb[12].mxu1 }
 0x173   : > { %v1365_v6 = vmul.f32 %v1336_v5, %v1336_v5  ;;  %v1338_v30 = vpop.f32.mrb[13].mxu1 }
 0x174   : > { %1092 = vadd.xlane.f32.xlu1 %v1091_v39  ;;  %v1366_v11 = vmul.f32 %v1338_v30, %v1338_v30  ;;  %v1340_v58 = vpop.f32.mrb[14].mxu1  ;;  %v1351_v37 = vadd.f32 %v1338_v30, %v1336_v5 }
 0x175   : > { %v1367_v13 = vmul.f32 %v1340_v58, %v1340_v58  ;;  %v1342_v18 = vpop.f32.mrb[15].mxu1 }
 0x176   : > { %1370 = vadd.xlane.f32.xlu0 %v1369_v23  ;;  %v1354_v24 = vadd.f32 %v1342_v18, %v1340_v58  ;;  %v1368_v63 = vmul.f32 %v1342_v18, %v1342_v18  ;;  %v1375_v28 = vadd.f32 %v1366_v11, %v1365_v6 }
 0x178   : > { %1373 = vadd.xlane.f32.xlu1 %v1372_v29  ;;  %v1378_v36 = vadd.f32 %v1368_v63, %v1367_v13 }
 0x17a   : > { %1071 = vadd.xlane.f32.xlu0 %v1070_v2 }
 0x17c   : > { %1074 = vadd.xlane.f32.xlu1 %v1073_v7 }
 0x17e   : > { %1352 = vadd.xlane.f32.xlu0 %v1351_v37 }
 0x180   : > { %1355 = vadd.xlane.f32.xlu1 %v1354_v24 }
 0x182   : > { %1095 = vadd.xlane.f32.xlu0 %v1094_v9 }
 0x184   : > { %1098 = vadd.xlane.f32.xlu1 %v1097_v16 }
 0x186   : > { %1376 = vadd.xlane.f32.xlu0 %v1375_v28 }
 0x188   : > { %1379 = vadd.xlane.f32.xlu1 %v1378_v36 }
 0x1ae   : > { %v504_v43 = vpop.xlane.xlu0 %503 }
 0x1be   : > { %v785_v31 = vpop.xlane.xlu0 %784 }
 0x1bf   : > { %v795_v53 = vadd.f32 %v785_v31, %v504_v43 }
 0x1c0   : > { %v788_v51 = vpop.xlane.xlu1 %787 }
 0x1c2   : > { %v507_v15 = vpop.xlane.xlu0 %506 }
 0x1c3   : > { %v796_v20 = vadd.f32 %v788_v51, %v507_v15 }
 0x1c4   : > { %v531_v44 = vpop.xlane.xlu1 %530 }
 0x1c6   : > { %v528_v19 = vpop.xlane.xlu0 %527 }
 0x1c8   : > { %v812_v33 = vpop.xlane.xlu1 %811 }
 0x1c9   : > { %v820_v1 = vadd.f32 %v812_v33, %v531_v44 }
 0x1ca   : > { %v809_v62 = vpop.xlane.xlu0 %808 }
 0x1cb   : > { %v819_v39 = vadd.f32 %v809_v62, %v528_v19 }
 0x1cc   : > { %v510_v57 = vpop.xlane.xlu1 %509 }
 0x1ce   : > { %v791_v50 = vpop.xlane.xlu0 %790 }
 0x1cf   : > { %v797_v8 = vadd.f32 %v791_v50, %v510_v57 }
 0x1d0   : > { %v513_v38 = vpop.xlane.xlu1 %512 }
 0x1d2   : > { %v534_v27 = vpop.xlane.xlu0 %533 }
 0x1d4   : > { %v794_v26 = vpop.xlane.xlu1 %793 }
 0x1d5   : > { %v798_v16 = vadd.f32 %v794_v26, %v513_v38 }
 0x1d6   : > { %v815_v40 = vpop.xlane.xlu0 %814 }
 0x1d7   : > { %v821_v22 = vadd.f32 %v815_v40, %v534_v27 }
 0x1d8   : > { %v537_v42 = vpop.xlane.xlu1 %536 }
 0x1dc   : > { %v818_v25 = vpop.xlane.xlu1 %817 }
 0x1dd   : > { %v1066_v14 = vpop.xlane.xlu0 %1065  ;;  %v822_v54 = vadd.f32 %v818_v25, %v537_v42 }
 0x1de   : > { %v1076_v35 = vadd.f32 %v1066_v14, %v795_v53 }
 0x1e0   : > { %v1069_v3 = vpop.xlane.xlu1 %1068 }
 0x1e1   : > { %v1077_v41 = vadd.f32 %v1069_v3, %v796_v20 }
 0x1fb   : > { %v1347_v55 = vpop.xlane.xlu0 %1346 }
 0x1fc   : > { %v1357_v48 = vadd.f32 %v1347_v55, %v1076_v35 }
 0x1fd   : > { %v1350_v32 = vpop.xlane.xlu1 %1349 }
 0x1fe   : > { %1386 = vst.msk [vmem:[%s2466_s27] sm:$0xff] %vm1385_vm8, %v1357_v48  ;;  %v1358_v56 = vadd.f32 %v1350_v32, %v1077_v41 }
 0x1ff   : > { %v1090_v49 = vpop.xlane.xlu0 %1089 }
 0x200   : > { %1387 = vst.msk [vmem:[%s2466_s27 + $0x8] sm:$0xff] %vm1385_vm8, %v1358_v56  ;;  %v1100_v0 = vadd.f32 %v1090_v49, %v819_v39 }
 0x201   : > { %v1093_v59 = vpop.xlane.xlu1 %1092 }
 0x202   : > { %v1101_v34 = vadd.f32 %v1093_v59, %v820_v1 }
 0x203   : > { %v1371_v12 = vpop.xlane.xlu0 %1370 }
 0x204   : > { %v1381_v2 = vadd.f32 %v1371_v12, %v1100_v0 }
 0x205   : > { %v1374_v60 = vpop.xlane.xlu1 %1373 }
 0x206   : > { %1390 = vst.msk [vmem:[%s2475_s30] sm:$0xff] %vm1385_vm8, %v1381_v2  ;;  %v1382_v61 = vadd.f32 %v1374_v60, %v1101_v34 }
 0x207   : > { %v1072_v7 = vpop.xlane.xlu0 %1071 }
 0x208   : > { %1391 = vst.msk [vmem:[%s2475_s30 + $0x8] sm:$0xff] %vm1385_vm8, %v1382_v61  ;;  %v1078_v21 = vadd.f32 %v1072_v7, %v797_v8 }
 0x209   : > { %v1075_v9 = vpop.xlane.xlu1 %1074 }
 0x20a   : > { %v1079_v46 = vadd.f32 %v1075_v9, %v798_v16 }
 0x20b   : > { %v1353_v17 = vpop.xlane.xlu0 %1352 }
 0x20c   : > { %v1359_v47 = vadd.f32 %v1353_v17, %v1078_v21 }
 0x20d   : > { %v1356_v10 = vpop.xlane.xlu1 %1355 }
 0x20e   : > { %1388 = vst.msk [vmem:[%s2466_s27 + $0x10] sm:$0xff] %vm1385_vm8, %v1359_v47  ;;  %v1360_v45 = vadd.f32 %v1356_v10, %v1079_v46 }
 0x20f   : > { %v1096_v52 = vpop.xlane.xlu0 %1095 }
 0x210   : > { %1389 = vst.msk [vmem:[%s2466_s27 + $0x18] sm:$0xff] %vm1385_vm8, %v1360_v45  ;;  %v1102_v23 = vadd.f32 %v1096_v52, %v821_v22 }
 0x211   : > { %v1099_v4 = vpop.xlane.xlu1 %1098 }
 0x212   : > { %v1103_v5 = vadd.f32 %v1099_v4, %v822_v54 }
 0x213   : > { %v1377_v29 = vpop.xlane.xlu0 %1376 }
 0x214   : > { %v1383_v6 = vadd.f32 %v1377_v29, %v1102_v23 }
 0x215   : > { %v1380_v30 = vpop.xlane.xlu1 %1379 }
 0x216   : > { %1392 = vst.msk [vmem:[%s2475_s30 + $0x10] sm:$0xff] %vm1385_vm8, %v1383_v6  ;;  %v1384_v11 = vadd.f32 %v1380_v30, %v1103_v5 }
 0x218   : > { %1393 = vst.msk [vmem:[%s2475_s30 + $0x18] sm:$0xff] %vm1385_vm8, %v1384_v11 }
 0x219 PF: > { %s14_s14 = sadd.s32 1, %s1867_s14   ;;  %s2519_s12 = smov %s1863_s13 }
 0x21a   : > { %p11_p5 = scmp.ge.s32.totalorder %s14_s14, 4   ;;  %s2520_s13 = smov %s2522_s15 }
 0x21c   :  { %13 = sbr.rel (!%p11_p5) target bundleno = 2 (0x2), region = 70 }

// kernel: projfeat3d_forward.3
= control target key start
LH: loop header
LB: loop body
LE: loop exit
PB: predicated region body
PF: predicated region fallthrough
CT: control target
= control target key end

     0   :  { %s3135_s15 = smov 0   ;;  %s3137_s16 = smov 0   ;;  %s4364_s0 = inlined_call_operand.vmem [shape: bf16[2,16,8,256], index: 0, kind: input, shape index: {}]   ;;  %s4365_s1 = inlined_call_operand.vmem [shape: bf16[32,16], index: 1, kind: input, shape index: {}]   ;;  %s4366_s2 = inlined_call_operand.vmem [shape: f32[32,1], index: 2, kind: input, shape index: {}]   ;;  %s4367_s3 = inlined_call_operand.vmem [shape: f32[32,1], index: 3, kind: input, shape index: {}]   ;;  %s4368_s4 = inlined_call_operand.vmem [shape: f32[2,32,4,256], index: 4, kind: output, shape index: {}]  }
   0x1   :  { %s3139_s17 = smov 0  }
   0x2 LB: > { %s26_s18 = sadd.s32 1, %s3102_s16  ;;  %p2652_p0 = scmp.ge.s32.totalorder %s3106_s17, 1  ;;  %s3106_s17 = sphi %s3139_s17, %s14_s17   ;;  %s3102_s16 = sphi %s3137_s16, %s4393_s16   ;;  %s3098_s15 = sphi %s3135_s15, %s4392_s15  }
   0x3   : > { %p28_p1 = scmp.ge.s32.totalorder %s26_s18, 2  ;;  %p183_p2 = scmp.lt.s32.totalorder %s3106_s17, 3 }
   0x5   : > { %s4395_s18 = smov (%p28_p1, %s26_s18), 0  ;;  %p184_p3 = pnand %p2652_p0, %p183_p2 }
   0x7   : > { %187 = sbr.rel (%p184_p3) target bundleno = 407 (0x197), region = 36 }
   0xe   : > { %p218_p4 = scmp.lt.s32.totalorder %s3098_s15, 1  ;;  %v4369_v0 = vmov 0   ;;  %vm429_vm0 = vcmask 1041409   ;;  %vm432_vm1 = vcmask 1042434   ;;  %vm435_vm2 = vcmask 1043459   ;;  %v242_v62 = vld [vmem:[%s4366_s2] sm:$0xff] }
   0xf   : > { %534 = vmatprep.mubr.bf16.mxu0 %v4369_v0  ;;  %1098 = vmatprep.mubr.bf16.mxu1 %v4369_v0  ;;  %vm438_vm3 = vcmask 1044484   ;;  %vm441_vm4 = vcmask 1045509   ;;  %vm444_vm5 = vcmask 1046534   ;;  %vm447_vm6 = vcmask 1047559  }
  0x10   : > { %s4397_s15 = smov (!%p218_p4, %s3098_s15), 1  ;;  %2952 = vset.pattern.permute.xlu0 %v4369_v0  ;;  %2953 = vset.pattern.permute.xlu1 %v4369_v0  ;;  %vm495_vm7 = vcmask 130048  }
  0x11   : > { %s2924_s19 = sshll.u32 %s4397_s15, 7  ;;  %248 = vperm.xlu0 %2952, %v242_v62   ;;  %s2925_s21 = sshll.u32 %s4397_s15, 8 }
  0x12   : > { %s3163_s22 = scalar_lea.vmem %s4364_s0, %s2924_s19  ;;  %s3779_s24 = scalar_lea.vmem %s4368_s4, %s2925_s21 }
  0x13   : > { %v3166_v1 = vld [vmem:[%s3163_s22] sm:$0x11]  ;;  %v3169_v2 = vld [vmem:[%s3163_s22 + $0x8] sm:$0x11]  ;;  %v3172_v3 = vld [vmem:[%s3163_s22 + $0x10] sm:$0x11] }
  0x14   : > { %v3175_v4 = vld [vmem:[%s3163_s22 + $0x18] sm:$0x11]  ;;  %v3178_v5 = vld [vmem:[%s3163_s22 + $0x20] sm:$0x11]  ;;  %v3181_v6 = vld [vmem:[%s3163_s22 + $0x28] sm:$0x11]  ;;  %v2660_v7 = vcombine.high %v3166_v1, %v3166_v1  ;;  %v2662_v8 = vcombine.high %v3169_v2, %v3169_v2  ;;  %v2664_v9 = vcombine.high %v3172_v3, %v3172_v3 }
  0x15   : > { %v3190_v10 = vld [vmem:[%s3163_s22 + $0x30] sm:$0x11]  ;;  %v3193_v11 = vld [vmem:[%s3163_s22 + $0x38] sm:$0x11]  ;;  %v3196_v12 = vld [vmem:[%s3163_s22 + $0x40] sm:$0x11]  ;;  %v2666_v13 = vcombine.high %v3175_v4, %v3175_v4  ;;  %v2668_v14 = vcombine.high %v3178_v5, %v3178_v5  ;;  %v2670_v15 = vcombine.high %v3181_v6, %v3181_v6 }
  0x16   : > { %v3207_v17 = vld [vmem:[%s3163_s22 + $0x48] sm:$0x11]  ;;  %v3210_v18 = vld [vmem:[%s3163_s22 + $0x50] sm:$0x11]  ;;  %v3213_v19 = vld [vmem:[%s3163_s22 + $0x58] sm:$0x11]  ;;  %v2672_v20 = vcombine.high %v3190_v10, %v3190_v10  ;;  %v2674_v21 = vcombine.high %v3193_v11, %v3193_v11  ;;  %v2676_v22 = vcombine.high %v3196_v12, %v3196_v12  ;;  %v399_v30 = vunpack.c.l.b16 %v2662_v8 }
  0x17   : > { %v3224_v24 = vld [vmem:[%s3163_s22 + $0x60] sm:$0x11]  ;;  %v3227_v25 = vld [vmem:[%s3163_s22 + $0x68] sm:$0x11]  ;;  %v3230_v26 = vld [vmem:[%s3163_s22 + $0x70] sm:$0x11]  ;;  %v2678_v27 = vcombine.high %v3207_v17, %v3207_v17  ;;  %v2680_v28 = vcombine.high %v3210_v18, %v3210_v18  ;;  %v2682_v29 = vcombine.high %v3213_v19, %v3213_v19  ;;  %v401_v35 = vunpack.c.l.b16 %v2664_v9 }
  0x18   : > { %v3239_v31 = vld [vmem:[%s3163_s22 + $0x78] sm:$0x11]  ;;  %v2684_v32 = vcombine.high %v3224_v24, %v3224_v24  ;;  %v2686_v33 = vcombine.high %v3227_v25, %v3227_v25  ;;  %v2688_v34 = vcombine.high %v3230_v26, %v3230_v26  ;;  %v403_v37 = vunpack.c.l.b16 %v2666_v13  ;;  %v3250_v56 = vld [vmem:[%s3163_s22] sm:$0x22]  ;;  %v3254_v61 = vld [vmem:[%s3163_s22 + $0x8] sm:$0x22] }
  0x19   : > { %v2690_v36 = vcombine.high %v3239_v31, %v3239_v31  ;;  %v405_v38 = vunpack.c.l.b16 %v2668_v14  ;;  %v407_v39 = vunpack.c.l.b16 %v2670_v15  ;;  %v397_v40 = vunpack.c.l.b16 %v2660_v7  ;;  %v3261_v13 = vld [vmem:[%s3163_s22 + $0x10] sm:$0x22] }
  0x1a   : > { %v409_v41 = vunpack.c.l.b16 %v2672_v20  ;;  %v411_v42 = vunpack.c.l.b16 %v2674_v21  ;;  %v415_v43 = vunpack.c.l.b16 %v2678_v27  ;;  %v413_v44 = vunpack.c.l.b16 %v2676_v22  ;;  %v244_v14 = vld [vmem:[%s4366_s2 + $0x10] sm:$0xff]  ;;  %v3269_v27 = vld [vmem:[%s3163_s22 + $0x18] sm:$0x22] }
  0x1b   : > { %v417_v45 = vunpack.c.l.b16 %v2680_v28  ;;  %v419_v46 = vunpack.c.l.b16 %v2682_v29  ;;  %v421_v47 = vunpack.c.l.b16 %v2684_v32  ;;  %v423_v48 = vunpack.c.l.b16 %v2686_v33  ;;  %v3272_v28 = vld [vmem:[%s3163_s22 + $0x20] sm:$0x22]  ;;  %258 = vperm.xlu1 %2953, %v244_v14   ;;  %v3277_v33 = vld [vmem:[%s3163_s22 + $0x28] sm:$0x22] }
  0x1c   : > { %v425_v49 = vunpack.c.l.b16 %v2688_v34  ;;  %v449_v50 = vrot.slane %v399_v30, 7  ;;  %v451_v51 = vrot.slane %v401_v35, 6  ;;  %v427_v52 = vunpack.c.l.b16 %v2690_v36  ;;  %v3280_v34 = vld [vmem:[%s3163_s22 + $0x30] sm:$0x22] }
  0x1d   : > { %v453_v53 = vrot.slane %v403_v37, 5  ;;  %v455_v54 = vrot.slane %v405_v38, 4  ;;  %v457_v55 = vrot.slane %v407_v39, 3  ;;  %v459_v58 = vrot.slane %v409_v41, 2  ;;  %v3287_v38 = vld [vmem:[%s3163_s22 + $0x38] sm:$0x22] }
  0x1e   : > { %v450_v57 = vsel %vm429_vm0, %v449_v50, %v397_v40  ;;  %v477_v59 = vrot.slane %v415_v43, 7  ;;  %v479_v60 = vrot.slane %v417_v45, 6  ;;  %v461_v7 = vrot.slane %v411_v42, 1  ;;  %v3290_v39 = vld [vmem:[%s3163_s22 + $0x40] sm:$0x22] }
  0x1f   : > { %v452_v63 = vsel %vm432_vm1, %v451_v51, %v450_v57  ;;  %v481_v8 = vrot.slane %v419_v46, 5  ;;  %v483_v9 = vrot.slane %v421_v47, 4  ;;  %v485_v21 = vrot.slane %v423_v48, 3  ;;  %v3293_v40 = vld [vmem:[%s3163_s22 + $0x48] sm:$0x22] }
  0x20   : > { %v454_v15 = vsel %vm435_vm2, %v453_v53, %v452_v63  ;;  %v478_v20 = vsel %vm429_vm0, %v477_v59, %v413_v44  ;;  %v487_v22 = vrot.slane %v425_v49, 2  ;;  %v489_v32 = vrot.slane %v427_v52, 1  ;;  %v3302_v45 = vld [vmem:[%s3163_s22 + $0x50] sm:$0x22]  ;;  %v3305_v46 = vld [vmem:[%s3163_s22 + $0x58] sm:$0x22] }
  0x21   : > { %v456_v29 = vsel %vm438_vm3, %v455_v54, %v454_v15  ;;  %v480_v30 = vsel %vm432_vm1, %v479_v60, %v478_v20  ;;  %v2725_v35 = vcombine.high %v3250_v56, %v3250_v56  ;;  %v2727_v41 = vcombine.high %v3254_v61, %v3254_v61  ;;  %v3308_v47 = vld [vmem:[%s3163_s22 + $0x60] sm:$0x22]  ;;  %v3317_v52 = vld [vmem:[%s3163_s22 + $0x68] sm:$0x22]  ;;  %v3320_v53 = vld [vmem:[%s3163_s22 + $0x70] sm:$0x22] }
  0x22   : > { %v458_v36 = vsel %vm441_vm4, %v457_v55, %v456_v29  ;;  %v482_v37 = vsel %vm435_vm2, %v481_v8, %v480_v30  ;;  %v2729_v42 = vcombine.high %v3261_v13, %v3261_v13  ;;  %v2731_v48 = vcombine.high %v3269_v27, %v3269_v27  ;;  %4377 = vst [vmem:[#allocation2_spill] sm:$0xff] %v3320_v53 }
  0x23   : > { %v460_v43 = vsel %vm444_vm5, %v459_v58, %v458_v36  ;;  %v484_v44 = vsel %vm438_vm3, %v483_v9, %v482_v37  ;;  %v2733_v49 = vcombine.high %v3272_v28, %v3272_v28  ;;  %v2735_v54 = vcombine.high %v3277_v33, %v3277_v33  ;;  %v3328_v58 = vld [vmem:[%s3163_s22 + $0x78] sm:$0x22] }
  0x24   : > { %v462_v50 = vsel %vm447_vm6, %v461_v7, %v460_v43  ;;  %v486_v51 = vsel %vm441_vm4, %v485_v21, %v484_v44  ;;  %v2737_v55 = vcombine.high %v3280_v34, %v3280_v34  ;;  %v2739_v59 = vcombine.high %v3287_v38, %v3287_v38 }
  0x25   : > { %v488_v57 = vsel %vm444_vm5, %v487_v22, %v486_v51  ;;  %v2741_v60 = vcombine.high %v3290_v39, %v3290_v39  ;;  %v2743_v62 = vcombine.high %v3293_v40, %v3293_v40  ;;  %v2745_v7 = vcombine.high %v3302_v45, %v3302_v45 }
  0x26   : > { %v490_v63 = vsel %vm447_vm6, %v489_v32, %v488_v57  ;;  %v2747_v8 = vcombine.high %v3305_v46, %v3305_v46  ;;  %v2749_v9 = vcombine.high %v3308_v47, %v3308_v47  ;;  %v2751_v15 = vcombine.high %v3317_v52, %v3317_v52 }
  0x27   : > { %v492_v14 = vpack.c.b16 %v490_v63, %v462_v50  ;;  %v2753_v20 = vcombine.high %v3320_v53, %v3320_v53  ;;  %v975_v21 = vunpack.c.l.b16 %v2725_v35  ;;  %v2755_v22 = vcombine.high %v3328_v58, %v3328_v58  ;;  %v243_v35 = vld [vmem:[%s4366_s2 + $0x8] sm:$0xff] }
  0x28   : > { %v977_v29 = vunpack.c.l.b16 %v2727_v41  ;;  %v981_v30 = vunpack.c.l.b16 %v2731_v48  ;;  %v983_v32 = vunpack.c.l.b16 %v2733_v49  ;;  %v979_v36 = vunpack.c.l.b16 %v2729_v42  ;;  %v245_v41 = vld [vmem:[%s4366_s2 + $0x18] sm:$0xff]  ;;  %253 = vperm.xlu0 %2952, %v243_v35  }
  0x29   : > { %502 = vmatprep.subr.bf16.mxu0 %v492_v14  ;;  %v985_v37 = vunpack.c.l.b16 %v2735_v54  ;;  %v987_v43 = vunpack.c.l.b16 %v2737_v55  ;;  %v991_v44 = vunpack.c.l.b16 %v2741_v60  ;;  %v989_v51 = vunpack.c.l.b16 %v2739_v59  ;;  %263 = vperm.xlu1 %2953, %v245_v41  }
  0x2a   : > { %v993_v50 = vunpack.c.l.b16 %v2743_v62  ;;  %v997_v57 = vunpack.c.l.b16 %v2747_v8  ;;  %v999_v63 = vunpack.c.l.b16 %v2749_v9  ;;  %v995_v0 = vunpack.c.l.b16 %v2745_v7  ;;  %v266_v7 = vld [vmem:[%s4367_s3] sm:$0xff] }
  0x2b   : > { %v1001_v16 = vunpack.c.l.b16 %v2751_v15  ;;  %v1003_v23 = vunpack.c.l.b16 %v2753_v20  ;;  %v1020_v53 = vrot.slane %v975_v21, 2  ;;  %v1005_v42 = vunpack.c.l.b16 %v2755_v22  ;;  %v267_v20 = vld [vmem:[%s4367_s3 + $0x8] sm:$0xff] }
  0x2c   : > { %v1021_v48 = vrot.slane %v977_v29, 1  ;;  %v1024_v49 = vrot.slane %v981_v30, 7  ;;  %v1026_v54 = vrot.slane %v983_v32, 6  ;;  %v1028_v55 = vrot.slane %v985_v37, 5  ;;  %272 = vperm.xlu0 %2952, %v266_v7  }
  0x2d   : > { %v1030_v59 = vrot.slane %v987_v43, 4  ;;  %v1048_v60 = vrot.slane %v991_v44, 2  ;;  %v1049_v62 = vrot.slane %v993_v50, 1  ;;  %v1032_v9 = vrot.slane %v989_v51, 3  ;;  %277 = vperm.xlu1 %2953, %v267_v20  }
  0x2e   : > { %v1022_v8 = vsel %vm429_vm0, %v1021_v48, %v1020_v53  ;;  %v1052_v14 = vrot.slane %v997_v57, 7  ;;  %v1054_v15 = vrot.slane %v999_v63, 6  ;;  %v1056_v29 = vrot.slane %v1001_v16, 5 }
  0x2f   : > { %v1023_v21 = vsel %vm432_vm1, %v979_v36, %v1022_v8  ;;  %v1050_v22 = vsel %vm429_vm0, %v1049_v62, %v1048_v60  ;;  %v1058_v30 = vrot.slane %v1003_v23, 4  ;;  %v1060_v43 = vrot.slane %v1005_v42, 3 }
  0x30   : > { %v1025_v32 = vsel %vm435_vm2, %v1024_v49, %v1023_v21  ;;  %v1051_v37 = vsel %vm432_vm1, %v995_v0, %v1050_v22  ;;  %v2663_v53 = vcombine.low %v3172_v3, %v3172_v3  ;;  %v2665_v36 = vcombine.low %v3175_v4, %v3175_v4  ;;  %v268_v0 = vld [vmem:[%s4367_s3 + $0x10] sm:$0xff]  ;;  %v269_v4 = vld [vmem:[%s4367_s3 + $0x18] sm:$0xff] }
  0x31   : > { %v1027_v44 = vsel %vm438_vm3, %v1026_v54, %v1025_v32  ;;  %v1053_v51 = vsel %vm435_vm2, %v1052_v14, %v1051_v37  ;;  %v2667_v16 = vcombine.low %v3178_v5, %v3178_v5  ;;  %v2669_v50 = vcombine.low %v3181_v6, %v3181_v6  ;;  %282 = vperm.xlu0 %2952, %v268_v0  }
  0x32   : > { %v1029_v23 = vsel %vm441_vm4, %v1028_v55, %v1027_v44  ;;  %v1055_v3 = vsel %vm438_vm3, %v1054_v15, %v1053_v51  ;;  %v2671_v57 = vcombine.low %v3190_v10, %v3190_v10  ;;  %v2673_v35 = vcombine.low %v3193_v11, %v3193_v11  ;;  %287 = vperm.xlu1 %2953, %v269_v4  }
  0x33   : > { %v1031_v5 = vsel %vm444_vm5, %v1030_v59, %v1029_v23  ;;  %v1057_v63 = vsel %vm441_vm4, %v1056_v29, %v1055_v3  ;;  %v2675_v41 = vcombine.low %v3196_v12, %v3196_v12  ;;  %v2677_v10 = vcombine.low %v3207_v17, %v3207_v17 }
  0x34   : > { %v1033_v42 = vsel %vm447_vm6, %v1032_v9, %v1031_v5  ;;  %v1059_v6 = vsel %vm444_vm5, %v1058_v30, %v1057_v63  ;;  %v2679_v48 = vcombine.low %v3210_v18, %v3210_v18  ;;  %v2681_v54 = vcombine.low %v3213_v19, %v3213_v19 }
  0x35   : > { %v1061_v49 = vsel %vm447_vm6, %v1060_v43, %v1059_v6  ;;  %v2683_v11 = vcombine.low %v3224_v24, %v3224_v24  ;;  %v2685_v12 = vcombine.low %v3227_v25, %v3227_v25  ;;  %v2687_v17 = vcombine.low %v3230_v26, %v3230_v26 }
  0x36   : > { %v1063_v55 = vpack.c.b16 %v1061_v49, %v1033_v42  ;;  %v2689_v18 = vcombine.low %v3239_v31, %v3239_v31  ;;  %v4378_v59 = vcombine.low %v3169_v2, %v3169_v2  ;;  %v400_v62 = vunpack.c.l.b16 %v2663_v53 }
  0x37   : > { %v402_v19 = vunpack.c.l.b16 %v2665_v36  ;;  %v404_v7 = vunpack.c.l.b16 %v2667_v16  ;;  %v406_v8 = vunpack.c.l.b16 %v2669_v50  ;;  %v4379_v24 = vcombine.low %v3166_v1, %v3166_v1 }
  0x38   : > { %v398_v60 = vunpack.c.l.b16 %v4378_v59  ;;  %1066 = vmatprep.subr.bf16.mxu1 %v1063_v55  ;;  %v408_v9 = vunpack.c.l.b16 %v2671_v57  ;;  %v410_v14 = vunpack.c.l.b16 %v2673_v35  ;;  %v414_v15 = vunpack.c.l.b16 %v2677_v10 }
  0x39   : > { %v396_v25 = vunpack.c.l.b16 %v4379_v24  ;;  %v412_v26 = vunpack.c.l.b16 %v2675_v41  ;;  %v416_v20 = vunpack.c.l.b16 %v2679_v48  ;;  %v418_v21 = vunpack.c.l.b16 %v2681_v54 }
  0x3a   : > { %v420_v31 = vunpack.c.l.b16 %v2683_v11  ;;  %v422_v22 = vunpack.c.l.b16 %v2685_v12  ;;  %v424_v29 = vunpack.c.l.b16 %v2687_v17  ;;  %v428_v2 = vrot.slane %v398_v60, 7 }
  0x3b   : > { %v431_v30 = vrot.slane %v400_v62, 6  ;;  %v426_v32 = vunpack.c.l.b16 %v2689_v18  ;;  %v434_v37 = vrot.slane %v402_v19, 5  ;;  %v437_v43 = vrot.slane %v404_v7, 4  ;;  %v4380_v7 = vld [vmem:[#allocation2_spill] sm:$0xff] }
  0x3c   : > { %v440_v53 = vrot.slane %v406_v8, 3  ;;  %v430_v44 = vsel %vm429_vm0, %v428_v2, %v396_v25  ;;  %v443_v51 = vrot.slane %v408_v9, 2  ;;  %v463_v1 = vrot.slane %v414_v15, 7 }
  0x3d   : > { %v465_v36 = vrot.slane %v416_v20, 6  ;;  %v433_v16 = vsel %vm432_vm1, %v431_v30, %v430_v44  ;;  %v446_v0 = vrot.slane %v410_v14, 1  ;;  %v467_v23 = vrot.slane %v418_v21, 5 }
  0x3e   : > { %v469_v3 = vrot.slane %v420_v31, 4  ;;  %v436_v50 = vsel %vm435_vm2, %v434_v37, %v433_v16  ;;  %v464_v57 = vsel %vm429_vm0, %v463_v1, %v412_v26  ;;  %v471_v4 = vrot.slane %v422_v22, 3  ;;  %v3469_v1 = vld [vmem:[%s3163_s22] sm:$0x44] }
  0x3f   : > { %v473_v5 = vrot.slane %v424_v29, 2  ;;  %v439_v63 = vsel %vm438_vm3, %v437_v43, %v436_v50  ;;  %v466_v35 = vsel %vm432_vm1, %v465_v36, %v464_v57  ;;  %v475_v41 = vrot.slane %v426_v32, 1  ;;  %v3474_v50 = vld [vmem:[%s3163_s22 + $0x8] sm:$0x44] }
  0x40   : > { %v2724_v42 = vcombine.low %v3250_v56, %v3250_v56  ;;  %v442_v6 = vsel %vm441_vm4, %v440_v53, %v439_v63  ;;  %v468_v10 = vsel %vm435_vm2, %v467_v23, %v466_v35  ;;  %v2726_v48 = vcombine.low %v3254_v61, %v3254_v61  ;;  %v3479_v35 = vld [vmem:[%s3163_s22 + $0x10] sm:$0x44] }
  0x41   : > { %v2728_v49 = vcombine.low %v3261_v13, %v3261_v13  ;;  %v445_v54 = vsel %vm444_vm5, %v443_v51, %v442_v6  ;;  %v470_v11 = vsel %vm438_vm3, %v469_v3, %v468_v10  ;;  %v2730_v12 = vcombine.low %v3269_v27, %v3269_v27  ;;  %v3484_v10 = vld [vmem:[%s3163_s22 + $0x18] sm:$0x44] }
  0x42   : > { %v2732_v56 = vcombine.low %v3272_v28, %v3272_v28  ;;  %v448_v55 = vsel %vm447_vm6, %v446_v0, %v445_v54  ;;  %v472_v17 = vsel %vm441_vm4, %v471_v4, %v470_v11  ;;  %v2734_v61 = vcombine.low %v3277_v33, %v3277_v33 }
  0x43   : > { %v2736_v13 = vcombine.low %v3280_v34, %v3280_v34  ;;  %v474_v18 = vsel %vm444_vm5, %v473_v5, %v472_v17  ;;  %v2738_v59 = vcombine.low %v3287_v38, %v3287_v38  ;;  %v2740_v27 = vcombine.low %v3290_v39, %v3290_v39 }
  0x44   : > { %v2742_v28 = vcombine.low %v3293_v40, %v3293_v40  ;;  %v476_v60 = vsel %vm447_vm6, %v475_v41, %v474_v18  ;;  %v2744_v62 = vcombine.low %v3302_v45, %v3302_v45  ;;  %v2746_v33 = vcombine.low %v3305_v46, %v3305_v46  ;;  %v3464_v46 = vld [vmem:[%s4365_s1] sm:$0xff]  }
  0x45   : > { %v2748_v34 = vcombine.low %v3308_v47, %v3308_v47  ;;  %v491_v19 = vpack.c.b16 %v476_v60, %v448_v55  ;;  %v2750_v38 = vcombine.low %v3317_v52, %v3317_v52  ;;  %v2752_v39 = vcombine.low %v4380_v7, %v4380_v7  ;;  %4381 = vst [vmem:[#allocation2_spill] sm:$0xff] %v3464_v46  ;;  %v1445_v60 = vld [vmem:[%s3163_s22 + $0x30] sm:$0x44]  ;;  %v1447_v7 = vld [vmem:[%s3163_s22 + $0x40] sm:$0x44] }
  0x46   : > { %v974_v8 = vunpack.c.l.b16 %v2724_v42  ;;  %v2754_v40 = vcombine.low %v3328_v58, %v3328_v58  ;;  %v976_v24 = vunpack.c.l.b16 %v2726_v48  ;;  %v980_v25 = vunpack.c.l.b16 %v2730_v12  ;;  %v3496_v12 = vld [vmem:[%s3163_s22 + $0x20] sm:$0x44] }
  0x47   : > { %v982_v45 = vunpack.c.l.b16 %v2732_v56  ;;  %503 = vmatpush1.bf16.msra.mxu0 %v491_v19  ;;  %v978_v47 = vunpack.c.l.b16 %v2728_v49  ;;  %v984_v9 = vunpack.c.l.b16 %v2734_v61  ;;  %v986_v14 = vunpack.c.l.b16 %v2736_v13  ;;  %v3491_v49 = vld [vmem:[%s4365_s1 + $0x8] sm:$0xff]  }
  0x48   : > { %v990_v52 = vunpack.c.l.b16 %v2740_v27  ;;  %v988_v15 = vunpack.c.l.b16 %v2738_v59  ;;  %v992_v26 = vunpack.c.l.b16 %v2742_v28  ;;  %v996_v20 = vunpack.c.l.b16 %v2746_v33  ;;  %4383 = vst [vmem:[#allocation3_spill] sm:$0xff] %v3491_v49  ;;  %v1444_v13 = vld [vmem:[%s3163_s22 + $0x28] sm:$0x44] }
  0x49   : > { %v998_v21 = vunpack.c.l.b16 %v2748_v34  ;;  %v994_v31 = vunpack.c.l.b16 %v2744_v62  ;;  %v1000_v58 = vunpack.c.l.b16 %v2750_v38  ;;  %v1002_v22 = vunpack.c.l.b16 %v2752_v39  ;;  %v1446_v62 = vld [vmem:[%s3163_s22 + $0x38] sm:$0x44]  ;;  %v1448_v39 = vld [vmem:[%s3163_s22 + $0x48] sm:$0x44] }
  0x4a   : > { %v1006_v29 = vrot.slane %v974_v8, 2  ;;  %v1004_v2 = vunpack.c.l.b16 %v2754_v40  ;;  %v1007_v30 = vrot.slane %v976_v24, 1  ;;  %v1010_v32 = vrot.slane %v980_v25, 7  ;;  %2691 = vmatmul.mubr.msk.bf16.vlgmr.msra.gmra.mrb[0].mxu0 %vm495_vm7, %v3464_v46  ;;  %v1449_v25 = vld [vmem:[%s3163_s22 + $0x50] sm:$0x44] }
  0x4b   : > { %v1012_v37 = vrot.slane %v982_v45, 6  ;;  %v1014_v43 = vrot.slane %v984_v9, 5  ;;  %v1016_v53 = vrot.slane %v986_v14, 4  ;;  %v1034_v44 = vrot.slane %v990_v52, 2  ;;  %v1450_v45 = vld [vmem:[%s3163_s22 + $0x58] sm:$0x44] }
  0x4c   : > { %v1035_v51 = vrot.slane %v992_v26, 1  ;;  %v4382_v36 = vmov 0   ;;  %v1008_v16 = vsel %vm429_vm0, %v1007_v30, %v1006_v29  ;;  %v1018_v0 = vrot.slane %v988_v15, 3  ;;  %v1451_v15 = vld [vmem:[%s3163_s22 + $0x60] sm:$0x44] }
  0x4d   : > { %544 = vmatprep.mubr.bf16.mxu0 %v4382_v36  ;;  %v1038_v23 = vrot.slane %v996_v20, 7  ;;  %v1040_v3 = vrot.slane %v998_v21, 6  ;;  %v1009_v57 = vsel %vm432_vm1, %v978_v47, %v1008_v16  ;;  %v1042_v5 = vrot.slane %v1000_v58, 5  ;;  %v1452_v26 = vld [vmem:[%s3163_s22 + $0x68] sm:$0x44] }
  0x4e   : > { %v1036_v4 = vsel %vm429_vm0, %v1035_v51, %v1034_v44  ;;  %v1044_v63 = vrot.slane %v1002_v22, 4  ;;  %v1011_v41 = vsel %vm435_vm2, %v1010_v32, %v1009_v57  ;;  %v1046_v6 = vrot.slane %v1004_v2, 3  ;;  %v1453_v58 = vld [vmem:[%s3163_s22 + $0x70] sm:$0x44]  ;;  %v1454_v22 = vld [vmem:[%s3163_s22 + $0x78] sm:$0x44] }
  0x4f   : > { %v1037_v42 = vsel %vm432_vm1, %v994_v31, %v1036_v4  ;;  %v2790_v48 = vcombine.low %v3469_v1, %v3469_v1  ;;  %v1013_v54 = vsel %vm438_vm3, %v1012_v37, %v1011_v41  ;;  %v2791_v56 = vcombine.high %v3469_v1, %v3469_v1 }
  0x50   : > { %v1039_v11 = vsel %vm435_vm2, %v1038_v23, %v1037_v42  ;;  %v2792_v55 = vcombine.low %v3474_v50, %v3474_v50  ;;  %v1015_v17 = vsel %vm441_vm4, %v1014_v43, %v1013_v54  ;;  %v2793_v18 = vcombine.high %v3474_v50, %v3474_v50 }
  0x51   : > { %v1041_v61 = vsel %vm438_vm3, %v1040_v3, %v1039_v11  ;;  %v2794_v59 = vcombine.low %v3479_v35, %v3479_v35  ;;  %v1017_v27 = vsel %vm444_vm5, %v1016_v53, %v1015_v17  ;;  %v2795_v33 = vcombine.high %v3479_v35, %v3479_v35 }
  0x52   : > { %v1043_v28 = vsel %vm441_vm4, %v1042_v5, %v1041_v61  ;;  %v2796_v34 = vcombine.low %v3484_v10, %v3484_v10  ;;  %v1019_v19 = vsel %vm447_vm6, %v1018_v0, %v1017_v27  ;;  %v2797_v8 = vcombine.high %v3484_v10, %v3484_v10  ;;  %2692 = vmatmul.mubr.msk.bf16.gmra.mrb[4].mxu0 %vm495_vm7, %v3491_v49 }
  0x53   : > { %v1045_v38 = vsel %vm444_vm5, %v1044_v63, %v1043_v28  ;;  %v2798_v40 = vcombine.low %v3496_v12, %v3496_v12  ;;  %v2799_v47 = vcombine.high %v3496_v12, %v3496_v12  ;;  %v2800_v9 = vcombine.low %v1444_v13, %v1444_v13  ;;  %1659 = vmatprep.mubr.bf16.mxu0 %v4382_v36 }
  0x54   : > { %v1047_v24 = vsel %vm447_vm6, %v1046_v6, %v1045_v38  ;;  %v2801_v14 = vcombine.high %v1444_v13, %v1444_v13  ;;  %v2802_v20 = vcombine.low %v1445_v60, %v1445_v60  ;;  %v2803_v21 = vcombine.high %v1445_v60, %v1445_v60 }
  0x55   : > { %v1062_v52 = vpack.c.b16 %v1047_v24, %v1019_v19  ;;  %v2804_v31 = vcombine.low %v1446_v62, %v1446_v62  ;;  %v2805_v29 = vcombine.high %v1446_v62, %v1446_v62  ;;  %v2806_v2 = vcombine.low %v1447_v7, %v1447_v7 }
  0x56   : > { %v2807_v30 = vcombine.high %v1447_v7, %v1447_v7  ;;  %v2808_v32 = vcombine.low %v1448_v39, %v1448_v39  ;;  %v2809_v37 = vcombine.high %v1448_v39, %v1448_v39  ;;  %v2810_v43 = vcombine.low %v1449_v25, %v1449_v25 }
  0x57   : > { %1067 = vmatpush1.bf16.msra.mxu1 %v1062_v52  ;;  %v2811_v53 = vcombine.high %v1449_v25, %v1449_v25  ;;  %v2812_v44 = vcombine.low %v1450_v45, %v1450_v45  ;;  %v2813_v51 = vcombine.high %v1450_v45, %v1450_v45  ;;  %v2814_v1 = vcombine.low %v1451_v15, %v1451_v15 }
  0x58   : > { %v2815_v16 = vcombine.high %v1451_v15, %v1451_v15  ;;  %v2816_v0 = vcombine.low %v1452_v26, %v1452_v26  ;;  %v2817_v23 = vcombine.high %v1452_v26, %v1452_v26  ;;  %v2818_v3 = vcombine.low %v1453_v58, %v1453_v58 }
  0x59   : > { %v2819_v50 = vcombine.high %v1453_v58, %v1453_v58  ;;  %v2820_v57 = vcombine.low %v1454_v22, %v1454_v22  ;;  %v2821_v4 = vcombine.high %v1454_v22, %v1454_v22  ;;  %v3539_v5 = vunpack.c.l.b16 %v2790_v48 }
  0x5a   : > { %2756 = vmatmul.mubr.msk.bf16.vlgmr.msra.gmra.mrb[0].mxu1 %vm495_vm7, %v3464_v46  ;;  %v1536_v63 = vunpack.c.l.b16 %v2791_v56  ;;  %v3541_v35 = vunpack.c.l.b16 %v2792_v55  ;;  %v1538_v41 = vunpack.c.l.b16 %v2793_v18  ;;  %v3543_v42 = vunpack.c.l.b16 %v2794_v59 }
  0x5b   : > { %v1540_v6 = vunpack.c.l.b16 %v2795_v33  ;;  %v3545_v10 = vunpack.c.l.b16 %v2796_v34  ;;  %1108 = vmatprep.mubr.bf16.mxu1 %v4382_v36  ;;  %v1542_v54 = vunpack.c.l.b16 %v2797_v8  ;;  %v3548_v11 = vunpack.c.l.b16 %v2798_v40 }
  0x5c   : > { %v1544_v12 = vunpack.c.l.b16 %v2799_v47  ;;  %v3550_v17 = vunpack.c.l.b16 %v2800_v9  ;;  %v1546_v61 = vunpack.c.l.b16 %v2801_v14  ;;  %v3552_v48 = vunpack.c.l.b16 %v2802_v20  ;;  %v3575_v20 = vld [vmem:[%s3163_s22] sm:$0x88] }
  0x5d   : > { %v1548_v56 = vunpack.c.l.b16 %v2803_v21  ;;  %v3554_v55 = vunpack.c.l.b16 %v2804_v31  ;;  %v1550_v13 = vunpack.c.l.b16 %v2805_v29  ;;  %v3556_v18 = vunpack.c.l.b16 %v2806_v2  ;;  %v3580_v29 = vld [vmem:[%s3163_s22 + $0x8] sm:$0x88] }
  0x5e   : > { %v1552_v59 = vunpack.c.l.b16 %v2807_v30  ;;  %v3558_v27 = vunpack.c.l.b16 %v2808_v32  ;;  %v1554_v28 = vunpack.c.l.b16 %v2809_v37  ;;  %v3560_v60 = vunpack.c.l.b16 %v2810_v43  ;;  %v3584_v43 = vld [vmem:[%s3163_s22 + $0x10] sm:$0x88] }
  0x5f   : > { %v1556_v62 = vunpack.c.l.b16 %v2811_v53  ;;  %v3562_v33 = vunpack.c.l.b16 %v2812_v44  ;;  %v1558_v34 = vunpack.c.l.b16 %v2813_v51  ;;  %v3564_v19 = vunpack.c.l.b16 %v2814_v1  ;;  %v3589_v1 = vld [vmem:[%s3163_s22 + $0x18] sm:$0x88] }
  0x60   : > { %v1560_v38 = vunpack.c.l.b16 %v2815_v16  ;;  %v3566_v7 = vunpack.c.l.b16 %v2816_v0  ;;  %v1562_v39 = vunpack.c.l.b16 %v2817_v23  ;;  %v3568_v8 = vunpack.c.l.b16 %v2818_v3  ;;  %v2004_v3 = vld [vmem:[%s3163_s22 + $0x20] sm:$0x88] }
  0x61   : > { %v1564_v40 = vunpack.c.l.b16 %v2819_v50  ;;  %v1566_v24 = vunpack.c.l.b16 %v2821_v4  ;;  %v1581_v25 = vrot.slane %v1536_v63, 4  ;;  %v1582_v45 = vrot.slane %v1538_v41, 3  ;;  %v2005_v41 = vld [vmem:[%s3163_s22 + $0x28] sm:$0x88] }
  0x62   : > { %v1584_v47 = vrot.slane %v1540_v6, 2  ;;  %v1586_v9 = vrot.slane %v1542_v54, 1  ;;  %2757 = vmatmul.mubr.msk.bf16.gmra.mrb[4].mxu1 %vm495_vm7, %v3491_v49  ;;  %v3572_v14 = vunpack.c.l.b16 %v2820_v57  ;;  %v1589_v52 = vrot.slane %v1546_v61, 7 }
  0x63   : > { %v1591_v15 = vrot.slane %v1548_v56, 6  ;;  %v1609_v26 = vrot.slane %v1552_v59, 4  ;;  %2220 = vmatprep.mubr.bf16.mxu1 %v4382_v36  ;;  %v1583_v21 = vsel %vm429_vm0, %v1582_v45, %v1581_v25  ;;  %v1610_v31 = vrot.slane %v1554_v28, 3  ;;  %v2006_v56 = vld [vmem:[%s3163_s22 + $0x30] sm:$0x88] }
  0x64   : > { %v1612_v58 = vrot.slane %v1556_v62, 2  ;;  %v1614_v22 = vrot.slane %v1558_v34, 1  ;;  %v1585_v2 = vsel %vm432_vm1, %v1584_v47, %v1583_v21  ;;  %v1593_v30 = vrot.slane %v1550_v13, 5  ;;  %v2007_v13 = vld [vmem:[%s3163_s22 + $0x38] sm:$0x88] }
  0x65   : > { %v1617_v32 = vrot.slane %v1562_v39, 7  ;;  %v1619_v37 = vrot.slane %v1564_v40, 6  ;;  %v1587_v53 = vsel %vm435_vm2, %v1586_v9, %v1585_v2  ;;  %v1611_v44 = vsel %vm429_vm0, %v1610_v31, %v1609_v26  ;;  %v2008_v39 = vld [vmem:[%s3163_s22 + $0x40] sm:$0x88]  ;;  %v2009_v25 = vld [vmem:[%s3163_s22 + $0x48] sm:$0x88] }
  0x66   : > { %v1621_v51 = vrot.slane %v1566_v24, 5  ;;  %v2856_v16 = vcombine.low %v3575_v20, %v3575_v20  ;;  %v1588_v0 = vsel %vm438_vm3, %v1544_v12, %v1587_v53  ;;  %v1613_v23 = vsel %vm432_vm1, %v1612_v58, %v1611_v44  ;;  %v2010_v45 = vld [vmem:[%s3163_s22 + $0x50] sm:$0x88]  ;;  %v2011_v26 = vld [vmem:[%s3163_s22 + $0x58] sm:$0x88] }
  0x67   : > { %v2857_v50 = vcombine.high %v3575_v20, %v3575_v20  ;;  %v2858_v57 = vcombine.low %v3580_v29, %v3580_v29  ;;  %v1590_v4 = vsel %vm441_vm4, %v1589_v52, %v1588_v0  ;;  %v1615_v63 = vsel %vm435_vm2, %v1614_v22, %v1613_v23  ;;  %v2012_v20 = vld [vmem:[%s3163_s22 + $0x60] sm:$0x88]  ;;  %v3628_v2 = vld [vmem:[%s3163_s22 + $0x70] sm:$0x88] }
  0x68   : > { %v2859_v6 = vcombine.high %v3580_v29, %v3580_v29  ;;  %v2860_v54 = vcombine.low %v3584_v43, %v3584_v43  ;;  %v1592_v12 = vsel %vm444_vm5, %v1591_v15, %v1590_v4  ;;  %v1616_v61 = vsel %vm438_vm3, %v1560_v38, %v1615_v63  ;;  %v2013_v29 = vld [vmem:[%s3163_s22 + $0x68] sm:$0x88] }
  0x69   : > { %v2861_v59 = vcombine.high %v3584_v43, %v3584_v43  ;;  %v2862_v28 = vcombine.low %v3589_v1, %v3589_v1  ;;  %v1594_v62 = vsel %vm447_vm6, %v1593_v30, %v1592_v12  ;;  %v1618_v34 = vsel %vm441_vm4, %v1617_v32, %v1616_v61  ;;  %v2015_v43 = vld [vmem:[%s3163_s22 + $0x78] sm:$0x88] }
  0x6a   : > { %v2863_v40 = vcombine.high %v3589_v1, %v3589_v1  ;;  %v2864_v38 = vcombine.low %v2004_v3, %v2004_v3  ;;  %v1620_v24 = vsel %vm444_vm5, %v1619_v37, %v1618_v34  ;;  %v2865_v47 = vcombine.high %v2004_v3, %v2004_v3 }
  0x6b   : > { %v2866_v9 = vcombine.low %v2005_v41, %v2005_v41  ;;  %v2867_v52 = vcombine.high %v2005_v41, %v2005_v41  ;;  %v1622_v15 = vsel %vm447_vm6, %v1621_v51, %v1620_v24  ;;  %v2868_v21 = vcombine.low %v2006_v56, %v2006_v56 }
  0x6c   : > { %v2869_v31 = vcombine.high %v2006_v56, %v2006_v56  ;;  %v2870_v58 = vcombine.low %v2007_v13, %v2007_v13  ;;  %v1624_v22 = vpack.c.b16 %v1622_v15, %v1594_v62  ;;  %v2871_v30 = vcombine.high %v2007_v13, %v2007_v13 }
  0x6d   : > { %v2872_v32 = vcombine.low %v2008_v39, %v2008_v39  ;;  %v2873_v37 = vcombine.high %v2008_v39, %v2008_v39  ;;  %v2874_v53 = vcombine.low %v2009_v25, %v2009_v25  ;;  %v2875_v44 = vcombine.high %v2009_v25, %v2009_v25 }
  0x6e   : > { %v2876_v1 = vcombine.low %v2010_v45, %v2010_v45  ;;  %v2877_v0 = vcombine.high %v2010_v45, %v2010_v45  ;;  %1627 = vmatprep.subr.bf16.mxu0 %v1624_v22  ;;  %v2878_v23 = vcombine.low %v2011_v26, %v2011_v26  ;;  %v2879_v51 = vcombine.high %v2011_v26, %v2011_v26 }
  0x6f   : > { %v2880_v3 = vcombine.low %v2012_v20, %v2012_v20  ;;  %v2881_v4 = vcombine.high %v2012_v20, %v2012_v20  ;;  %v2882_v63 = vcombine.low %v2013_v29, %v2013_v29  ;;  %v2883_v41 = vcombine.high %v2013_v29, %v2013_v29 }
  0x70   : > { %v2885_v61 = vcombine.high %v3628_v2, %v3628_v2  ;;  %v2886_v56 = vcombine.low %v2015_v43, %v2015_v43  ;;  %v2887_v13 = vcombine.high %v2015_v43, %v2015_v43  ;;  %v3635_v62 = vunpack.c.l.b16 %v2856_v16 }
  0x71   : > { %v2097_v34 = vunpack.c.l.b16 %v2857_v50  ;;  %v3637_v39 = vunpack.c.l.b16 %v2858_v57  ;;  %v2099_v24 = vunpack.c.l.b16 %v2859_v6  ;;  %v3639_v25 = vunpack.c.l.b16 %v2860_v54 }
  0x72   : > { %v2101_v45 = vunpack.c.l.b16 %v2861_v59  ;;  %v3641_v15 = vunpack.c.l.b16 %v2862_v28  ;;  %v2103_v26 = vunpack.c.l.b16 %v2863_v40  ;;  %v3643_v20 = vunpack.c.l.b16 %v2864_v38 }
  0x73   : > { %v2105_v22 = vunpack.c.l.b16 %v2865_v47  ;;  %v3645_v29 = vunpack.c.l.b16 %v2866_v9  ;;  %v2107_v12 = vunpack.c.l.b16 %v2867_v52  ;;  %v3647_v49 = vunpack.c.l.b16 %v2868_v21 }
  0x74   : > { %v2109_v16 = vunpack.c.l.b16 %v2869_v31  ;;  %v3649_v43 = vunpack.c.l.b16 %v2870_v58  ;;  %v2111_v50 = vunpack.c.l.b16 %v2871_v30  ;;  %v3651_v57 = vunpack.c.l.b16 %v2872_v32 }
  0x75   : > { %4384 = vst [vmem:[#allocation4_spill] sm:$0xff] %v3647_v49  ;;  %v2113_v6 = vunpack.c.l.b16 %v2873_v37  ;;  %v3653_v54 = vunpack.c.l.b16 %v2874_v53  ;;  %v2115_v59 = vunpack.c.l.b16 %v2875_v44  ;;  %v3655_v28 = vunpack.c.l.b16 %v2876_v1 }
  0x76   : > { %v2117_v40 = vunpack.c.l.b16 %v2877_v0  ;;  %v3657_v38 = vunpack.c.l.b16 %v2878_v23  ;;  %v2119_v47 = vunpack.c.l.b16 %v2879_v51  ;;  %v3659_v9 = vunpack.c.l.b16 %v2880_v3 }
  0x77   : > { %v2121_v52 = vunpack.c.l.b16 %v2881_v4  ;;  %v3661_v21 = vunpack.c.l.b16 %v2882_v63  ;;  %v2123_v31 = vunpack.c.l.b16 %v2883_v41  ;;  %v2125_v58 = vunpack.c.l.b16 %v2885_v61 }
  0x78   : > { %v3663_v30 = vunpack.c.l.b16 %v2886_v56  ;;  %v2127_v32 = vunpack.c.l.b16 %v2887_v13  ;;  %v2142_v37 = vrot.slane %v2097_v34, 6  ;;  %v2143_v53 = vrot.slane %v2099_v24, 5 }
  0x79   : > { %v2145_v36 = vrot.slane %v2101_v45, 4  ;;  %v2147_v44 = vrot.slane %v2103_v26, 3  ;;  %v2149_v1 = vrot.slane %v2105_v22, 2  ;;  %v2151_v46 = vrot.slane %v2107_v12, 1 }
  0x7a   : > { %v2154_v0 = vrot.slane %v2111_v50, 7  ;;  %v2144_v23 = vsel %vm429_vm0, %v2143_v53, %v2142_v37  ;;  %v2170_v51 = vrot.slane %v2113_v6, 6  ;;  %v2171_v3 = vrot.slane %v2115_v59, 5 }
  0x7b   : > { %v2173_v49 = vrot.slane %v2117_v40, 4  ;;  %v2146_v4 = vsel %vm432_vm1, %v2145_v36, %v2144_v23  ;;  %v2175_v63 = vrot.slane %v2119_v47, 3  ;;  %v2177_v41 = vrot.slane %v2121_v52, 2 }
  0x7c   : > { %v2179_v61 = vrot.slane %v2123_v31, 1  ;;  %v2148_v56 = vsel %vm435_vm2, %v2147_v44, %v2146_v4  ;;  %v2172_v13 = vsel %vm429_vm0, %v2171_v3, %v2170_v51  ;;  %v2182_v34 = vrot.slane %v2127_v32, 7 }
  0x7d   : > { %v1567_v24 = vrot.slane %v3539_v5, 4  ;;  %v2150_v12 = vsel %vm438_vm3, %v2149_v1, %v2148_v56  ;;  %v2174_v45 = vsel %vm432_vm1, %v2173_v49, %v2172_v13  ;;  %v1568_v26 = vrot.slane %v3541_v35, 3 }
  0x7e   : > { %v1570_v22 = vrot.slane %v3543_v42, 2  ;;  %v2152_v36 = vsel %vm441_vm4, %v2151_v46, %v2150_v12  ;;  %v2176_v50 = vsel %vm435_vm2, %v2175_v63, %v2174_v45  ;;  %v1572_v6 = vrot.slane %v3545_v10, 1 }
  0x7f   : > { %v1575_v59 = vrot.slane %v3550_v17, 7  ;;  %v2153_v40 = vsel %vm444_vm5, %v2109_v16, %v2152_v36  ;;  %v2178_v5 = vsel %vm438_vm3, %v2177_v41, %v2176_v50  ;;  %v1569_v47 = vsel %vm429_vm0, %v1568_v26, %v1567_v24 }
  0x80   : > { %v1577_v49 = vrot.slane %v3552_v48, 6  ;;  %v2155_v35 = vsel %vm447_vm6, %v2154_v0, %v2153_v40  ;;  %v2180_v42 = vsel %vm441_vm4, %v2179_v61, %v2178_v5  ;;  %v1571_v46 = vsel %vm432_vm1, %v1570_v22, %v1569_v47 }
  0x81   : > { %v1579_v52 = vrot.slane %v3554_v55, 5  ;;  %v2181_v10 = vsel %vm444_vm5, %v2125_v58, %v2180_v42  ;;  %v1573_v17 = vsel %vm435_vm2, %v1572_v6, %v1571_v46  ;;  %v1595_v16 = vrot.slane %v3556_v18, 4 }
  0x82   : > { %v1596_v31 = vrot.slane %v3558_v27, 3  ;;  %v2183_v32 = vsel %vm447_vm6, %v2182_v34, %v2181_v10  ;;  %v1574_v48 = vsel %vm438_vm3, %v3548_v11, %v1573_v17  ;;  %v1598_v37 = vrot.slane %v3560_v60, 2 }
  0x83   : > { %v1600_v53 = vrot.slane %v3562_v33, 1  ;;  %v2185_v44 = vpack.c.b16 %v2183_v32, %v2155_v35  ;;  %v1576_v55 = vsel %vm441_vm4, %v1575_v59, %v1574_v48  ;;  %v1603_v1 = vrot.slane %v3566_v7, 7  ;;  %v4387_v59 = vld [vmem:[#allocation2_spill] sm:$0xff] }
  0x84   : > { %v1597_v58 = vsel %vm429_vm0, %v1596_v31, %v1595_v16  ;;  %v1578_v18 = vsel %vm444_vm5, %v1577_v49, %v1576_v55  ;;  %v1605_v0 = vrot.slane %v3568_v8, 6  ;;  %v1607_v23 = vrot.slane %v3572_v14, 5 }
  0x85   : > { %v1599_v27 = vsel %vm432_vm1, %v1598_v37, %v1597_v58  ;;  %2188 = vmatprep.subr.bf16.mxu1 %v2185_v44  ;;  %v1580_v11 = vsel %vm447_vm6, %v1579_v52, %v1578_v18  ;;  %v2128_v33 = vrot.slane %v3635_v62, 6  ;;  %v2129_v51 = vrot.slane %v3637_v39, 5 }
  0x86   : > { %v1601_v60 = vsel %vm435_vm2, %v1600_v53, %v1599_v27  ;;  %v2131_v3 = vrot.slane %v3639_v25, 4  ;;  %v2133_v4 = vrot.slane %v3641_v15, 3  ;;  %v2135_v8 = vrot.slane %v3643_v20, 2 }
  0x87   : > { %v1602_v7 = vsel %vm438_vm3, %v3564_v19, %v1601_v60  ;;  %v2130_v63 = vsel %vm429_vm0, %v2129_v51, %v2128_v33  ;;  %v2137_v41 = vrot.slane %v3645_v29, 1  ;;  %v2140_v61 = vrot.slane %v3649_v43, 7 }
  0x88   : > { %v1604_v14 = vsel %vm441_vm4, %v1603_v1, %v1602_v7  ;;  %v2132_v39 = vsel %vm432_vm1, %v2131_v3, %v2130_v63  ;;  %v2156_v19 = vrot.slane %v3651_v57, 6  ;;  %v2157_v25 = vrot.slane %v3653_v54, 5 }
  0x89   : > { %v1606_v62 = vsel %vm444_vm5, %v1605_v0, %v1604_v14  ;;  %v2134_v20 = vsel %vm435_vm2, %v2133_v4, %v2132_v39  ;;  %v2159_v56 = vrot.slane %v3655_v28, 4  ;;  %v2161_v13 = vrot.slane %v3657_v38, 3  ;;  %v4386_v28 = vld [vmem:[#allocation4_spill] sm:$0xff] }
  0x8a   : > { %v1608_v15 = vsel %vm447_vm6, %v1607_v23, %v1606_v62  ;;  %v2136_v29 = vsel %vm438_vm3, %v2135_v8, %v2134_v20  ;;  %v2158_v43 = vsel %vm429_vm0, %v2157_v25, %v2156_v19  ;;  %v2163_v24 = vrot.slane %v3659_v9, 2 }
  0x8b   : > { %v1623_v34 = vpack.c.b16 %v1608_v15, %v1580_v11  ;;  %v4385_v57 = vcombine.low %v3628_v2, %v3628_v2  ;;  %v2138_v54 = vsel %vm441_vm4, %v2137_v41, %v2136_v29  ;;  %v2160_v45 = vsel %vm432_vm1, %v2159_v56, %v2158_v43 }
  0x8c   : > { %v2165_v26 = vrot.slane %v3661_v21, 1  ;;  %v2139_v38 = vsel %vm444_vm5, %v4386_v28, %v2138_v54  ;;  %v2162_v22 = vsel %vm435_vm2, %v2161_v13, %v2160_v45  ;;  %v2168_v36 = vrot.slane %v3663_v30, 7  ;;  %v4389_v30 = vld [vmem:[#allocation3_spill] sm:$0xff] }
  0x8d   : > { %v2124_v12 = vunpack.c.l.b16 %v4385_v57  ;;  %1628 = vmatpush1.bf16.msra.mxu0 %v1623_v34  ;;  %v2164_v9 = vsel %vm438_vm3, %v2163_v24, %v2162_v22  ;;  %v2141_v50 = vsel %vm447_vm6, %v2140_v61, %v2139_v38  ;;  %v4388_v40 = vmov 0  }
  0x8e   : > { %v2166_v2 = vsel %vm441_vm4, %v2165_v26, %v2164_v9  ;;  %v3109_v46 = vmov 1966171168   ;;  %v584_v10 = vlaneseq }
  0x8f   : > { %v2167_v6 = vsel %vm444_vm5, %v2124_v12, %v2166_v2  ;;  %v582_v52 = vunpack.c.l.s4 %v3109_v46 }
  0x90   : > { %2822 = vmatmul.mubr.msk.bf16.vlgmr.msra.gmra.mrb[8].mxu0 %vm495_vm7, %v4387_v59  ;;  %v2169_v21 = vsel %vm447_vm6, %v2168_v36, %v2167_v6  ;;  %v3751_v47 = vpop.permute.xlu0 %248  ;;  %v585_v31 = vshrl.u32 %v584_v10, 7  ;;  %vm3781_vm8 = vcmp.lt.s32.totalorder %v584_v10, 256 }
  0x91   : > { %1669 = vmatprep.mubr.bf16.mxu0 %v4388_v40  ;;  %v2184_v5 = vpack.c.b16 %v2169_v21, %v2141_v50  ;;  %v583_v16 = vunpack.c.0.s8 %v582_v52 }
  0x93   : > { %2189 = vmatpush1.bf16.msra.mxu1 %v2184_v5  ;;  %v3767_v27 = vsub.s32 %v583_v16, %v585_v31 }
  0x96   : > { %2888 = vmatmul.mubr.msk.bf16.vlgmr.msra.gmra.mrb[8].mxu1 %vm495_vm7, %v4387_v59 }
  0x97   : > { %2230 = vmatprep.mubr.bf16.mxu1 %v4388_v40 }
  0x98   : > { %2823 = vmatmul.mubr.msk.bf16.gmra.mrb[12].mxu0 %vm495_vm7, %v4389_v30 }
  0x9a   : > { %v3753_v49 = vpop.permute.xlu1 %258 }
  0x9e   : > { %2889 = vmatmul.mubr.msk.bf16.gmra.mrb[12].mxu1 %vm495_vm7, %v4389_v30 }
  0xa7   : > { %v3755_v35 = vpop.permute.xlu0 %253 }
  0xa8   : > { %v3757_v42 = vpop.permute.xlu1 %263 }
  0xab   : > { %v3759_v32 = vpop.permute.xlu0 %272 }
  0xac   : > { %v3763_v55 = vpop.permute.xlu1 %277 }
  0xb0   : > { %v3792_v29 = vpop.permute.xlu0 %282 }
  0xb1   : > { %v3818_v2 = vpop.permute.xlu1 %287 }
 0x11d   : > { %v536_v17 = vpop.f32.mrb[0].mxu0 }
 0x11e   : > { %v555_v48 = vmul.f32 %v536_v17, %v3751_v47  ;;  %v538_v37 = vpop.f32.mrb[1].mxu0 }
 0x11f   : > { %v556_v53 = vmul.f32 %v538_v37, %v3751_v47  ;;  %v540_v44 = vpop.f32.mrb[2].mxu0 }
 0x120   : > { %v557_v58 = vmul.f32 %v540_v44, %v3755_v35  ;;  %v563_v1 = vadd.f32 %v555_v48, %v3759_v32  ;;  %v542_v18 = vpop.f32.mrb[3].mxu0 }
 0x121   : > { %v564_v0 = vadd.f32 %v556_v53, %v3759_v32  ;;  %v558_v23 = vmul.f32 %v542_v18, %v3755_v35 }
 0x122   : > { %v565_v11 = vadd.f32 %v557_v58, %v3763_v55 }
 0x123   : > { %v579_v60 = vcombine.low %v563_v1, %v564_v0  ;;  %v580_v33 = vcombine.high %v563_v1, %v564_v0  ;;  %v566_v51 = vadd.f32 %v558_v23, %v3763_v55 }
 0x125   : > { %v587_v7 = vrot.slane %v579_v60, %v3767_v27  ;;  %v594_v3 = vrot.slane %v580_v33, %v3767_v27  ;;  %v629_v4 = vcombine.low %v565_v11, %v566_v51  ;;  %v630_v8 = vcombine.high %v565_v11, %v566_v51  ;;  %v546_v14 = vpop.f32.mrb[4].mxu0 }
 0x126   : > { %v559_v41 = vmul.f32 %v546_v14, %v3753_v49  ;;  %v548_v61 = vpop.f32.mrb[5].mxu0 }
 0x127   : > { %v595_v62 = vcombine.high %v587_v7, %v587_v7  ;;  %v596_v39 = vcombine.high %v594_v3, %v594_v3  ;;  %v603_v19 = vrot.slane %v587_v7, %v3767_v27  ;;  %v610_v25 = vrot.slane %v594_v3, %v3767_v27  ;;  %v550_v15 = vpop.f32.mrb[6].mxu0 }
 0x128   : > { %v637_v20 = vrot.slane %v629_v4, %v3767_v27  ;;  %v644_v56 = vrot.slane %v630_v8, %v3767_v27  ;;  %v560_v13 = vmul.f32 %v548_v61, %v3753_v49  ;;  %v561_v34 = vmul.f32 %v550_v15, %v3757_v42  ;;  %v552_v43 = vpop.f32.mrb[7].mxu0 }
 0x129   : > { %v617_v24 = vrot.slane %v595_v62, %v3767_v27  ;;  %v624_v57 = vrot.slane %v596_v39, %v3767_v27  ;;  %v625_v12 = vcombine.high %v603_v19, %v603_v19  ;;  %v626_v54 = vcombine.high %v610_v25, %v610_v25  ;;  %815 = vst.msk [vmem:[%s3779_s24] ss:$4 sm:$0x3] %vm3781_vm8, %v603_v19 }
 0x12a   : > { %2696 = vst.msk [vmem:[%s3779_s24 + $0x20] ss:$4 sm:$0x3] %vm3781_vm8, %v610_v25  ;;  %v645_v45 = vcombine.high %v637_v20, %v637_v20  ;;  %v646_v26 = vcombine.high %v644_v56, %v644_v56  ;;  %v653_v28 = vrot.slane %v637_v20, %v3767_v27  ;;  %v660_v38 = vrot.slane %v644_v56, %v3767_v27 }
 0x12b   : > { %v627_v22 = vcombine.high %v617_v24, %v617_v24  ;;  %v628_v36 = vcombine.high %v624_v57, %v624_v57  ;;  %2693 = vst.msk [vmem:[%s3779_s24 + $0x8] ss:$4 sm:$0x3] %vm3781_vm8, %v617_v24  ;;  %2694 = vst.msk [vmem:[%s3779_s24 + $0x10] ss:$4 sm:$0x3] %vm3781_vm8, %v625_v12  ;;  %v567_v9 = vadd.f32 %v559_v41, %v3792_v29 }
 0x12c   : > { %2697 = vst.msk [vmem:[%s3779_s24 + $0x28] ss:$4 sm:$0x3] %vm3781_vm8, %v624_v57  ;;  %2698 = vst.msk [vmem:[%s3779_s24 + $0x30] ss:$4 sm:$0x3] %vm3781_vm8, %v626_v54  ;;  %v568_v50 = vadd.f32 %v560_v13, %v3792_v29  ;;  %v667_v59 = vrot.slane %v645_v45, %v3767_v27  ;;  %v674_v21 = vrot.slane %v646_v26, %v3767_v27 }
 0x12d   : > { %v1100_v6 = vpop.f32.mrb[0].mxu1  ;;  %v675_v40 = vcombine.high %v653_v28, %v653_v28  ;;  %v676_v5 = vcombine.high %v660_v38, %v660_v38  ;;  %2700 = vst.msk [vmem:[%s3779_s24 + $0x40] ss:$4 sm:$0x3] %vm3781_vm8, %v653_v28  ;;  %v562_v17 = vmul.f32 %v552_v43, %v3757_v42  ;;  %v3850_v53 = vadd.f32 %v561_v34, %v3818_v2 }
 0x12e   : > { %2704 = vst.msk [vmem:[%s3779_s24 + $0x60] ss:$4 sm:$0x3] %vm3781_vm8, %v660_v38  ;;  %v1119_v30 = vmul.f32 %v1100_v6, %v3751_v47  ;;  %v1102_v46 = vpop.f32.mrb[1].mxu1  ;;  %v679_v52 = vcombine.low %v567_v9, %v568_v50  ;;  %v680_v10 = vcombine.high %v567_v9, %v568_v50  ;;  %v677_v48 = vcombine.high %v667_v59, %v667_v59 }
 0x12f   : > { %2695 = vst.msk [vmem:[%s3779_s24 + $0x18] ss:$4 sm:$0x3] %vm3781_vm8, %v627_v22  ;;  %2699 = vst.msk [vmem:[%s3779_s24 + $0x38] ss:$4 sm:$0x3] %vm3781_vm8, %v628_v36  ;;  %v1120_v16 = vmul.f32 %v1102_v46, %v3751_v47  ;;  %v678_v37 = vcombine.high %v674_v21, %v674_v21  ;;  %v3865_v60 = vadd.f32 %v562_v17, %v3818_v2 }
 0x130   : > { %v1104_v31 = vpop.f32.mrb[2].mxu1  ;;  %2701 = vst.msk [vmem:[%s3779_s24 + $0x48] ss:$4 sm:$0x3] %vm3781_vm8, %v667_v59  ;;  %v1127_v58 = vadd.f32 %v1119_v30, %v3759_v32  ;;  %v687_v18 = vrot.slane %v679_v52, %v3767_v27  ;;  %v694_v0 = vrot.slane %v680_v10, %v3767_v27 }
 0x131   : > { %2702 = vst.msk [vmem:[%s3779_s24 + $0x50] ss:$4 sm:$0x3] %vm3781_vm8, %v675_v40  ;;  %2705 = vst.msk [vmem:[%s3779_s24 + $0x68] ss:$4 sm:$0x3] %vm3781_vm8, %v674_v21  ;;  %v1121_v44 = vmul.f32 %v1104_v31, %v3755_v35  ;;  %v1128_v23 = vadd.f32 %v1120_v16, %v3759_v32  ;;  %v729_v19 = vcombine.low %v3850_v53, %v3865_v60 }
 0x132   : > { %2706 = vst.msk [vmem:[%s3779_s24 + $0x70] ss:$4 sm:$0x3] %vm3781_vm8, %v676_v5  ;;  %v1106_v1 = vpop.f32.mrb[3].mxu1  ;;  %v695_v51 = vcombine.high %v687_v18, %v687_v18  ;;  %v696_v7 = vcombine.high %v694_v0, %v694_v0  ;;  %v703_v3 = vrot.slane %v687_v18, %v3767_v27  ;;  %v710_v41 = vrot.slane %v694_v0, %v3767_v27 }
 0x133   : > { %v1122_v11 = vmul.f32 %v1106_v1, %v3755_v35  ;;  %2703 = vst.msk [vmem:[%s3779_s24 + $0x58] ss:$4 sm:$0x3] %vm3781_vm8, %v677_v48  ;;  %2707 = vst.msk [vmem:[%s3779_s24 + $0x78] ss:$4 sm:$0x3] %vm3781_vm8, %v678_v37  ;;  %v1129_v33 = vadd.f32 %v1121_v44, %v3763_v55  ;;  %v1143_v4 = vcombine.low %v1127_v58, %v1128_v23 }
 0x134   : > { %v1144_v8 = vcombine.high %v1127_v58, %v1128_v23  ;;  %v717_v61 = vrot.slane %v695_v51, %v3767_v27  ;;  %v724_v62 = vrot.slane %v696_v7, %v3767_v27  ;;  %v725_v39 = vcombine.high %v703_v3, %v703_v3  ;;  %2708 = vst.msk [vmem:[%s3779_s24 + $0x80] ss:$4 sm:$0x3] %vm3781_vm8, %v703_v3 }
 0x135   : > { %v1130_v14 = vadd.f32 %v1122_v11, %v3763_v55  ;;  %v1151_v25 = vrot.slane %v1143_v4, %v3767_v27  ;;  %v1110_v13 = vpop.f32.mrb[4].mxu1  ;;  %2712 = vst.msk [vmem:[%s3779_s24 + $0xa0] ss:$4 sm:$0x3] %vm3781_vm8, %v710_v41  ;;  %v726_v24 = vcombine.high %v710_v41, %v710_v41  ;;  %v730_v11 = vcombine.high %v3850_v53, %v3865_v60 }
 0x136   : > { %v1158_v15 = vrot.slane %v1144_v8, %v3767_v27  ;;  %v1123_v34 = vmul.f32 %v1110_v13, %v3753_v49  ;;  %v1112_v43 = vpop.f32.mrb[5].mxu1  ;;  %v727_v57 = vcombine.high %v717_v61, %v717_v61  ;;  %v728_v12 = vcombine.high %v724_v62, %v724_v62  ;;  %2709 = vst.msk [vmem:[%s3779_s24 + $0x88] ss:$4 sm:$0x3] %vm3781_vm8, %v717_v61 }
 0x137   : > { %v1193_v20 = vcombine.low %v1129_v33, %v1130_v14  ;;  %v1194_v56 = vcombine.high %v1129_v33, %v1130_v14  ;;  %2710 = vst.msk [vmem:[%s3779_s24 + $0x90] ss:$4 sm:$0x3] %vm3781_vm8, %v725_v39  ;;  %2713 = vst.msk [vmem:[%s3779_s24 + $0xa8] ss:$4 sm:$0x3] %vm3781_vm8, %v724_v62  ;;  %v1159_v54 = vcombine.high %v1151_v25, %v1151_v25 }
 0x138   : > { %v1160_v45 = vcombine.high %v1158_v15, %v1158_v15  ;;  %v1167_v26 = vrot.slane %v1151_v25, %v3767_v27  ;;  %v1174_v28 = vrot.slane %v1158_v15, %v3767_v27  ;;  %v1114_v38 = vpop.f32.mrb[6].mxu1  ;;  %v1124_v9 = vmul.f32 %v1112_v43, %v3753_v49  ;;  %2711 = vst.msk [vmem:[%s3779_s24 + $0x98] ss:$4 sm:$0x3] %vm3781_vm8, %v727_v57 }
 0x139   : > { %v1201_v22 = vrot.slane %v1193_v20, %v3767_v27  ;;  %v1208_v36 = vrot.slane %v1194_v56, %v3767_v27  ;;  %v1125_v50 = vmul.f32 %v1114_v38, %v3757_v42  ;;  %2714 = vst.msk [vmem:[%s3779_s24 + $0xb0] ss:$4 sm:$0x3] %vm3781_vm8, %v726_v24  ;;  %2715 = vst.msk [vmem:[%s3779_s24 + $0xb8] ss:$4 sm:$0x3] %vm3781_vm8, %v728_v12 }
 0x13a   : > { %v1116_v6 = vpop.f32.mrb[7].mxu1  ;;  %v1181_v59 = vrot.slane %v1159_v54, %v3767_v27  ;;  %v1188_v21 = vrot.slane %v1160_v45, %v3767_v27  ;;  %v1189_v40 = vcombine.high %v1167_v26, %v1167_v26  ;;  %v1190_v5 = vcombine.high %v1174_v28, %v1174_v28  ;;  %2758 = vst.msk [vmem:[%s3779_s24 + $0x1] ss:$4 sm:$0x3] %vm3781_vm8, %v1167_v26 }
 0x13b   : > { %2762 = vst.msk [vmem:[%s3779_s24 + $0x21] ss:$4 sm:$0x3] %vm3781_vm8, %v1174_v28  ;;  %v1209_v30 = vcombine.high %v1201_v22, %v1201_v22  ;;  %v1210_v46 = vcombine.high %v1208_v36, %v1208_v36  ;;  %v1217_v52 = vrot.slane %v1201_v22, %v3767_v27  ;;  %v1224_v10 = vrot.slane %v1208_v36, %v3767_v27 }
 0x13c   : > { %v1191_v17 = vcombine.high %v1181_v59, %v1181_v59  ;;  %v1192_v16 = vcombine.high %v1188_v21, %v1188_v21  ;;  %2759 = vst.msk [vmem:[%s3779_s24 + $0x9] ss:$4 sm:$0x3] %vm3781_vm8, %v1181_v59  ;;  %2760 = vst.msk [vmem:[%s3779_s24 + $0x11] ss:$4 sm:$0x3] %vm3781_vm8, %v1189_v40  ;;  %v1131_v31 = vadd.f32 %v1123_v34, %v3792_v29 }
 0x13d   : > { %2763 = vst.msk [vmem:[%s3779_s24 + $0x29] ss:$4 sm:$0x3] %vm3781_vm8, %v1188_v21  ;;  %2764 = vst.msk [vmem:[%s3779_s24 + $0x31] ss:$4 sm:$0x3] %vm3781_vm8, %v1190_v5  ;;  %v1132_v48 = vadd.f32 %v1124_v9, %v3792_v29  ;;  %v1231_v37 = vrot.slane %v1209_v30, %v3767_v27  ;;  %v1238_v44 = vrot.slane %v1210_v46, %v3767_v27 }
 0x13e   : > { %v1239_v58 = vcombine.high %v1217_v52, %v1217_v52  ;;  %v1240_v1 = vcombine.high %v1224_v10, %v1224_v10  ;;  %2766 = vst.msk [vmem:[%s3779_s24 + $0x41] ss:$4 sm:$0x3] %vm3781_vm8, %v1217_v52  ;;  %2770 = vst.msk [vmem:[%s3779_s24 + $0x61] ss:$4 sm:$0x3] %vm3781_vm8, %v1224_v10  ;;  %v1126_v23 = vmul.f32 %v1116_v6, %v3757_v42 }
 0x13f   : > { %2761 = vst.msk [vmem:[%s3779_s24 + $0x19] ss:$4 sm:$0x3] %vm3781_vm8, %v1191_v17  ;;  %2765 = vst.msk [vmem:[%s3779_s24 + $0x39] ss:$4 sm:$0x3] %vm3781_vm8, %v1192_v16  ;;  %v1243_v18 = vcombine.low %v1131_v31, %v1132_v48  ;;  %v1244_v0 = vcombine.high %v1131_v31, %v1132_v48  ;;  %v1241_v33 = vcombine.high %v1231_v37, %v1231_v37 }
 0x140   : > { %v1242_v51 = vcombine.high %v1238_v44, %v1238_v44  ;;  %2767 = vst.msk [vmem:[%s3779_s24 + $0x49] ss:$4 sm:$0x3] %vm3781_vm8, %v1231_v37  ;;  %2768 = vst.msk [vmem:[%s3779_s24 + $0x51] ss:$4 sm:$0x3] %vm3781_vm8, %v1239_v58  ;;  %v737_v7 = vrot.slane %v729_v19, %v3767_v27  ;;  %v744_v8 = vrot.slane %v730_v11, %v3767_v27 }
 0x141   : > { %2771 = vst.msk [vmem:[%s3779_s24 + $0x69] ss:$4 sm:$0x3] %vm3781_vm8, %v1238_v44  ;;  %2772 = vst.msk [vmem:[%s3779_s24 + $0x71] ss:$4 sm:$0x3] %vm3781_vm8, %v1240_v1  ;;  %v1251_v3 = vrot.slane %v1243_v18, %v3767_v27  ;;  %v1258_v4 = vrot.slane %v1244_v0, %v3767_v27  ;;  %v1133_v53 = vadd.f32 %v1125_v50, %v3818_v2 }
 0x142   : > { %2769 = vst.msk [vmem:[%s3779_s24 + $0x59] ss:$4 sm:$0x3] %vm3781_vm8, %v1241_v33  ;;  %2773 = vst.msk [vmem:[%s3779_s24 + $0x79] ss:$4 sm:$0x3] %vm3781_vm8, %v1242_v51  ;;  %v745_v14 = vcombine.high %v737_v7, %v737_v7  ;;  %v753_v41 = vrot.slane %v737_v7, %v3767_v27  ;;  %v1134_v60 = vadd.f32 %v1126_v23, %v3818_v2 }
 0x143   : > { %v1259_v61 = vcombine.high %v1251_v3, %v1251_v3  ;;  %v1260_v62 = vcombine.high %v1258_v4, %v1258_v4  ;;  %v1267_v39 = vrot.slane %v1251_v3, %v3767_v27  ;;  %v1274_v19 = vrot.slane %v1258_v4, %v3767_v27 }
 0x144   : > { %v746_v25 = vcombine.high %v744_v8, %v744_v8  ;;  %v760_v15 = vrot.slane %v744_v8, %v3767_v27  ;;  %v767_v20 = vrot.slane %v745_v14, %v3767_v27  ;;  %v775_v56 = vcombine.high %v753_v41, %v753_v41  ;;  %2716 = vst.msk [vmem:[%s3779_s24 + $0xc0] ss:$4 sm:$0x3] %vm3781_vm8, %v753_v41 }
 0x145   : > { %v1281_v13 = vrot.slane %v1259_v61, %v3767_v27  ;;  %v1288_v34 = vrot.slane %v1260_v62, %v3767_v27  ;;  %v1289_v43 = vcombine.high %v1267_v39, %v1267_v39  ;;  %v1290_v24 = vcombine.high %v1274_v19, %v1274_v19  ;;  %2774 = vst.msk [vmem:[%s3779_s24 + $0x81] ss:$4 sm:$0x3] %vm3781_vm8, %v1267_v39 }
 0x146   : > { %2778 = vst.msk [vmem:[%s3779_s24 + $0xa1] ss:$4 sm:$0x3] %vm3781_vm8, %v1274_v19  ;;  %v774_v57 = vrot.slane %v746_v25, %v3767_v27  ;;  %v776_v12 = vcombine.high %v760_v15, %v760_v15  ;;  %v777_v54 = vcombine.high %v767_v20, %v767_v20  ;;  %2717 = vst.msk [vmem:[%s3779_s24 + $0xc8] ss:$4 sm:$0x3] %vm3781_vm8, %v767_v20 }
 0x147   : > { %2718 = vst.msk [vmem:[%s3779_s24 + $0xd0] ss:$4 sm:$0x3] %vm3781_vm8, %v775_v56  ;;  %2720 = vst.msk [vmem:[%s3779_s24 + $0xe0] ss:$4 sm:$0x3] %vm3781_vm8, %v760_v15  ;;  %v1293_v45 = vcombine.low %v1133_v53, %v1134_v60  ;;  %v1291_v26 = vcombine.high %v1281_v13, %v1281_v13  ;;  %v1292_v28 = vcombine.high %v1288_v34, %v1288_v34 }
 0x148   : > { %2775 = vst.msk [vmem:[%s3779_s24 + $0x89] ss:$4 sm:$0x3] %vm3781_vm8, %v1281_v13  ;;  %2776 = vst.msk [vmem:[%s3779_s24 + $0x91] ss:$4 sm:$0x3] %vm3781_vm8, %v1289_v43  ;;  %v1294_v38 = vcombine.high %v1133_v53, %v1134_v60  ;;  %v778_v22 = vcombine.high %v774_v57, %v774_v57 }
 0x149   : > { %2779 = vst.msk [vmem:[%s3779_s24 + $0xa9] ss:$4 sm:$0x3] %vm3781_vm8, %v1288_v34  ;;  %2780 = vst.msk [vmem:[%s3779_s24 + $0xb1] ss:$4 sm:$0x3] %vm3781_vm8, %v1290_v24  ;;  %v1301_v36 = vrot.slane %v1293_v45, %v3767_v27 }
 0x14a   : > { %2719 = vst.msk [vmem:[%s3779_s24 + $0xd8] ss:$4 sm:$0x3] %vm3781_vm8, %v777_v54  ;;  %2721 = vst.msk [vmem:[%s3779_s24 + $0xe8] ss:$4 sm:$0x3] %vm3781_vm8, %v774_v57  ;;  %v1308_v9 = vrot.slane %v1294_v38, %v3767_v27 }
 0x14b   : > { %2722 = vst.msk [vmem:[%s3779_s24 + $0xf0] ss:$4 sm:$0x3] %vm3781_vm8, %v776_v12  ;;  %2777 = vst.msk [vmem:[%s3779_s24 + $0x99] ss:$4 sm:$0x3] %vm3781_vm8, %v1291_v26  ;;  %v1309_v50 = vcombine.high %v1301_v36, %v1301_v36  ;;  %v1317_v6 = vrot.slane %v1301_v36, %v3767_v27 }
 0x14c   : > { %2781 = vst.msk [vmem:[%s3779_s24 + $0xb9] ss:$4 sm:$0x3] %vm3781_vm8, %v1292_v28  ;;  %2723 = vst.msk [vmem:[%s3779_s24 + $0xf8] ss:$4 sm:$0x3] %vm3781_vm8, %v778_v22  ;;  %v1310_v59 = vcombine.high %v1308_v9, %v1308_v9  ;;  %v1324_v21 = vrot.slane %v1308_v9, %v3767_v27 }
 0x14d   : > { %v1331_v40 = vrot.slane %v1309_v50, %v3767_v27  ;;  %v1339_v5 = vcombine.high %v1317_v6, %v1317_v6  ;;  %2782 = vst.msk [vmem:[%s3779_s24 + $0xc1] ss:$4 sm:$0x3] %vm3781_vm8, %v1317_v6 }
 0x14e   : > { %v1338_v30 = vrot.slane %v1310_v59, %v3767_v27  ;;  %v1340_v46 = vcombine.high %v1324_v21, %v1324_v21  ;;  %2786 = vst.msk [vmem:[%s3779_s24 + $0xe1] ss:$4 sm:$0x3] %vm3781_vm8, %v1324_v21 }
 0x14f   : > { %v1341_v52 = vcombine.high %v1331_v40, %v1331_v40  ;;  %2783 = vst.msk [vmem:[%s3779_s24 + $0xc9] ss:$4 sm:$0x3] %vm3781_vm8, %v1331_v40  ;;  %2784 = vst.msk [vmem:[%s3779_s24 + $0xd1] ss:$4 sm:$0x3] %vm3781_vm8, %v1339_v5 }
 0x150   : > { %v1342_v10 = vcombine.high %v1338_v30, %v1338_v30  ;;  %2787 = vst.msk [vmem:[%s3779_s24 + $0xe9] ss:$4 sm:$0x3] %vm3781_vm8, %v1338_v30  ;;  %2788 = vst.msk [vmem:[%s3779_s24 + $0xf1] ss:$4 sm:$0x3] %vm3781_vm8, %v1340_v46 }
 0x151   : > { %2785 = vst.msk [vmem:[%s3779_s24 + $0xd9] ss:$4 sm:$0x3] %vm3781_vm8, %v1341_v52 }
 0x152   : > { %2789 = vst.msk [vmem:[%s3779_s24 + $0xf9] ss:$4 sm:$0x3] %vm3781_vm8, %v1342_v10 }
 0x163   : > { %v1661_v17 = vpop.f32.mrb[8].mxu0 }
 0x164   : > { %v1680_v16 = vmul.f32 %v1661_v17, %v3751_v47  ;;  %v1663_v31 = vpop.f32.mrb[9].mxu0 }
 0x165   : > { %v1681_v48 = vmul.f32 %v1663_v31, %v3751_v47  ;;  %v1665_v37 = vpop.f32.mrb[10].mxu0 }
 0x166   : > { %v1688_v44 = vadd.f32 %v1680_v16, %v3759_v32  ;;  %v1682_v58 = vmul.f32 %v1665_v37, %v3755_v35  ;;  %v1667_v1 = vpop.f32.mrb[11].mxu0 }
 0x167   : > { %v1689_v18 = vadd.f32 %v1681_v48, %v3759_v32  ;;  %v1683_v0 = vmul.f32 %v1667_v1, %v3755_v35 }
 0x168   : > { %v1690_v23 = vadd.f32 %v1682_v58, %v3763_v55 }
 0x169   : > { %v1704_v11 = vcombine.low %v1688_v44, %v1689_v18  ;;  %v1705_v33 = vcombine.high %v1688_v44, %v1689_v18  ;;  %v1691_v51 = vadd.f32 %v1683_v0, %v3763_v55  ;;  %v2222_v7 = vpop.f32.mrb[8].mxu1 }
 0x16a   : > { %v2241_v3 = vmul.f32 %v2222_v7, %v3751_v47  ;;  %v2224_v14 = vpop.f32.mrb[9].mxu1 }
 0x16b   : > { %v1712_v4 = vrot.slane %v1704_v11, %v3767_v27  ;;  %v1719_v8 = vrot.slane %v1705_v33, %v3767_v27  ;;  %v1754_v41 = vcombine.low %v1690_v23, %v1691_v51  ;;  %v1671_v53 = vpop.f32.mrb[12].mxu0  ;;  %v2242_v60 = vmul.f32 %v2224_v14, %v3751_v47  ;;  %v2226_v61 = vpop.f32.mrb[10].mxu1 }
 0x16c   : > { %v1755_v62 = vcombine.high %v1690_v23, %v1691_v51  ;;  %v1684_v39 = vmul.f32 %v1671_v53, %v3753_v49  ;;  %v4075_v19 = vpop.f32.mrb[13].mxu0  ;;  %v2249_v25 = vadd.f32 %v2241_v3, %v3759_v32  ;;  %v2228_v13 = vpop.f32.mrb[11].mxu1  ;;  %v2243_v24 = vmul.f32 %v2226_v61, %v3755_v35 }
 0x16d   : > { %v1720_v15 = vcombine.high %v1712_v4, %v1712_v4  ;;  %v1721_v20 = vcombine.high %v1719_v8, %v1719_v8  ;;  %v1728_v56 = vrot.slane %v1712_v4, %v3767_v27  ;;  %v4079_v34 = vpop.f32.mrb[14].mxu0  ;;  %v1735_v43 = vrot.slane %v1719_v8, %v3767_v27 }
 0x16e   : > { %v2250_v47 = vadd.f32 %v2242_v60, %v3759_v32  ;;  %v1762_v57 = vrot.slane %v1754_v41, %v3767_v27  ;;  %v4085_v12 = vpop.f32.mrb[15].mxu0  ;;  %v1769_v32 = vrot.slane %v1755_v62, %v3767_v27  ;;  %v4097_v36 = vadd.f32 %v2243_v24, %v3763_v55 }
 0x16f   : > { %v1742_v54 = vrot.slane %v1720_v15, %v3767_v27  ;;  %v1749_v45 = vrot.slane %v1721_v20, %v3767_v27  ;;  %v1750_v26 = vcombine.high %v1728_v56, %v1728_v56  ;;  %2824 = vst.msk [vmem:[%s3779_s24 + $0x2] ss:$4 sm:$0x3] %vm3781_vm8, %v1728_v56  ;;  %v1751_v28 = vcombine.high %v1735_v43, %v1735_v43 }
 0x170   : > { %2828 = vst.msk [vmem:[%s3779_s24 + $0x22] ss:$4 sm:$0x3] %vm3781_vm8, %v1735_v43  ;;  %v2265_v38 = vcombine.low %v2249_v25, %v2250_v47  ;;  %v2266_v22 = vcombine.high %v2249_v25, %v2250_v47  ;;  %v1770_v6 = vcombine.high %v1762_v57, %v1762_v57  ;;  %v1771_v59 = vcombine.high %v1769_v32, %v1769_v32 }
 0x171   : > { %v1752_v9 = vcombine.high %v1742_v54, %v1742_v54  ;;  %v1753_v50 = vcombine.high %v1749_v45, %v1749_v45  ;;  %2825 = vst.msk [vmem:[%s3779_s24 + $0xa] ss:$4 sm:$0x3] %vm3781_vm8, %v1742_v54  ;;  %2826 = vst.msk [vmem:[%s3779_s24 + $0x12] ss:$4 sm:$0x3] %vm3781_vm8, %v1750_v26  ;;  %v1778_v5 = vrot.slane %v1762_v57, %v3767_v27 }
 0x172   : > { %2829 = vst.msk [vmem:[%s3779_s24 + $0x2a] ss:$4 sm:$0x3] %vm3781_vm8, %v1749_v45  ;;  %2830 = vst.msk [vmem:[%s3779_s24 + $0x32] ss:$4 sm:$0x3] %vm3781_vm8, %v1751_v28  ;;  %v2273_v21 = vrot.slane %v2265_v38, %v3767_v27  ;;  %v2280_v40 = vrot.slane %v2266_v22, %v3767_v27  ;;  %v1785_v30 = vrot.slane %v1769_v32, %v3767_v27 }
 0x173   : > { %v2232_v46 = vpop.f32.mrb[12].mxu1  ;;  %2827 = vst.msk [vmem:[%s3779_s24 + $0x1a] ss:$4 sm:$0x3] %vm3781_vm8, %v1752_v9  ;;  %v1792_v52 = vrot.slane %v1770_v6, %v3767_v27  ;;  %v1799_v10 = vrot.slane %v1771_v59, %v3767_v27  ;;  %v2244_v17 = vmul.f32 %v2228_v13, %v3755_v35  ;;  %v1692_v16 = vadd.f32 %v1684_v39, %v3792_v29 }
 0x174   : > { %2831 = vst.msk [vmem:[%s3779_s24 + $0x3a] ss:$4 sm:$0x3] %vm3781_vm8, %v1753_v50  ;;  %v2234_v31 = vpop.f32.mrb[13].mxu1  ;;  %v2281_v48 = vcombine.high %v2273_v21, %v2273_v21  ;;  %v2282_v37 = vcombine.high %v2280_v40, %v2280_v40  ;;  %v2289_v44 = vrot.slane %v2273_v21, %v3767_v27  ;;  %v2296_v58 = vrot.slane %v2280_v40, %v3767_v27 }
 0x175   : > { %2832 = vst.msk [vmem:[%s3779_s24 + $0x42] ss:$4 sm:$0x3] %vm3781_vm8, %v1778_v5  ;;  %2836 = vst.msk [vmem:[%s3779_s24 + $0x62] ss:$4 sm:$0x3] %vm3781_vm8, %v1785_v30  ;;  %v1800_v1 = vcombine.high %v1778_v5, %v1778_v5  ;;  %v1801_v18 = vcombine.high %v1785_v30, %v1785_v30  ;;  %v1802_v0 = vcombine.high %v1792_v52, %v1792_v52 }
 0x176   : > { %v2236_v35 = vpop.f32.mrb[14].mxu1  ;;  %v1803_v23 = vcombine.high %v1799_v10, %v1799_v10  ;;  %2833 = vst.msk [vmem:[%s3779_s24 + $0x4a] ss:$4 sm:$0x3] %vm3781_vm8, %v1792_v52  ;;  %v2303_v33 = vrot.slane %v2281_v48, %v3767_v27  ;;  %v2310_v51 = vrot.slane %v2282_v37, %v3767_v27  ;;  %v2311_v7 = vcombine.high %v2289_v44, %v2289_v44 }
 0x177   : > { %2837 = vst.msk [vmem:[%s3779_s24 + $0x6a] ss:$4 sm:$0x3] %vm3781_vm8, %v1799_v10  ;;  %v2238_v11 = vpop.f32.mrb[15].mxu1  ;;  %v2312_v3 = vcombine.high %v2296_v58, %v2296_v58  ;;  %v2252_v4 = vadd.f32 %v2244_v17, %v3763_v55  ;;  %v2245_v8 = vmul.f32 %v2232_v46, %v3753_v49  ;;  %v1685_v14 = vmul.f32 %v4075_v19, %v3753_v49 }
 0x178   : > { %2890 = vst.msk [vmem:[%s3779_s24 + $0x3] ss:$4 sm:$0x3] %vm3781_vm8, %v2289_v44  ;;  %2894 = vst.msk [vmem:[%s3779_s24 + $0x23] ss:$4 sm:$0x3] %vm3781_vm8, %v2296_v58  ;;  %v2246_v41 = vmul.f32 %v2234_v31, %v3753_v49  ;;  %v2313_v53 = vcombine.high %v2303_v33, %v2303_v33  ;;  %v2314_v60 = vcombine.high %v2310_v51, %v2310_v51 }
 0x179   : > { %2834 = vst.msk [vmem:[%s3779_s24 + $0x52] ss:$4 sm:$0x3] %vm3781_vm8, %v1800_v1  ;;  %2835 = vst.msk [vmem:[%s3779_s24 + $0x5a] ss:$4 sm:$0x3] %vm3781_vm8, %v1802_v0  ;;  %v1686_v55 = vmul.f32 %v4079_v34, %v3757_v42  ;;  %v2247_v61 = vmul.f32 %v2236_v35, %v3757_v42  ;;  %v2315_v49 = vcombine.low %v4097_v36, %v2252_v4 }
 0x17a   : > { %2838 = vst.msk [vmem:[%s3779_s24 + $0x72] ss:$4 sm:$0x3] %vm3781_vm8, %v1801_v18  ;;  %2839 = vst.msk [vmem:[%s3779_s24 + $0x7a] ss:$4 sm:$0x3] %vm3781_vm8, %v1803_v23  ;;  %v2316_v62 = vcombine.high %v4097_v36, %v2252_v4  ;;  %v2253_v39 = vadd.f32 %v2245_v8, %v3792_v29  ;;  %v1693_v19 = vadd.f32 %v1685_v14, %v3792_v29 }
 0x17b   : > { %2891 = vst.msk [vmem:[%s3779_s24 + $0xb] ss:$4 sm:$0x3] %vm3781_vm8, %v2303_v33  ;;  %2892 = vst.msk [vmem:[%s3779_s24 + $0x13] ss:$4 sm:$0x3] %vm3781_vm8, %v2311_v7  ;;  %v2254_v25 = vadd.f32 %v2246_v41, %v3792_v29  ;;  %v4191_v15 = vadd.f32 %v1686_v55, %v3818_v2  ;;  %v4194_v20 = vadd.f32 %v2247_v61, %v3818_v2 }
 0x17c   : > { %2895 = vst.msk [vmem:[%s3779_s24 + $0x2b] ss:$4 sm:$0x3] %vm3781_vm8, %v2310_v51  ;;  %2896 = vst.msk [vmem:[%s3779_s24 + $0x33] ss:$4 sm:$0x3] %vm3781_vm8, %v2312_v3  ;;  %v1687_v56 = vmul.f32 %v4085_v12, %v3757_v42  ;;  %v2323_v13 = vrot.slane %v2315_v49, %v3767_v27  ;;  %v2330_v34 = vrot.slane %v2316_v62, %v3767_v27 }
 0x17d   : > { %2893 = vst.msk [vmem:[%s3779_s24 + $0x1b] ss:$4 sm:$0x3] %vm3781_vm8, %v2313_v53  ;;  %2897 = vst.msk [vmem:[%s3779_s24 + $0x3b] ss:$4 sm:$0x3] %vm3781_vm8, %v2314_v60  ;;  %v1804_v43 = vcombine.low %v1692_v16, %v1693_v19  ;;  %v1805_v47 = vcombine.high %v1692_v16, %v1693_v19  ;;  %v2365_v24 = vcombine.low %v2253_v39, %v2254_v25 }
 0x17e   : > { %v2366_v57 = vcombine.high %v2253_v39, %v2254_v25  ;;  %v1695_v29 = vadd.f32 %v1687_v56, %v3818_v2  ;;  %v2248_v54 = vmul.f32 %v2238_v11, %v3757_v42  ;;  %v2331_v45 = vcombine.high %v2323_v13, %v2323_v13 }
 0x17f   : > { %v2332_v26 = vcombine.high %v2330_v34, %v2330_v34  ;;  %v2339_v32 = vrot.slane %v2323_v13, %v3767_v27  ;;  %v2346_v12 = vrot.slane %v2330_v34, %v3767_v27  ;;  %v1812_v28 = vrot.slane %v1804_v43, %v3767_v27 }
 0x180   : > { %v1819_v38 = vrot.slane %v1805_v47, %v3767_v27  ;;  %v2373_v22 = vrot.slane %v2365_v24, %v3767_v27  ;;  %v2380_v36 = vrot.slane %v2366_v57, %v3767_v27  ;;  %v2353_v42 = vrot.slane %v2331_v45, %v3767_v27 }
 0x181   : > { %v2360_v9 = vrot.slane %v2332_v26, %v3767_v27  ;;  %v2361_v50 = vcombine.high %v2339_v32, %v2339_v32  ;;  %v2362_v6 = vcombine.high %v2346_v12, %v2346_v12  ;;  %2898 = vst.msk [vmem:[%s3779_s24 + $0x43] ss:$4 sm:$0x3] %vm3781_vm8, %v2339_v32  ;;  %2902 = vst.msk [vmem:[%s3779_s24 + $0x63] ss:$4 sm:$0x3] %vm3781_vm8, %v2346_v12 }
 0x182   : > { %v1820_v59 = vcombine.high %v1812_v28, %v1812_v28  ;;  %v1821_v21 = vcombine.high %v1819_v38, %v1819_v38  ;;  %v1828_v40 = vrot.slane %v1812_v28, %v3767_v27  ;;  %v1835_v5 = vrot.slane %v1819_v38, %v3767_v27  ;;  %2899 = vst.msk [vmem:[%s3779_s24 + $0x4b] ss:$4 sm:$0x3] %vm3781_vm8, %v2353_v42 }
 0x183   : > { %v2363_v30 = vcombine.high %v2353_v42, %v2353_v42  ;;  %v2364_v46 = vcombine.high %v2360_v9, %v2360_v9  ;;  %2900 = vst.msk [vmem:[%s3779_s24 + $0x53] ss:$4 sm:$0x3] %vm3781_vm8, %v2361_v50  ;;  %2903 = vst.msk [vmem:[%s3779_s24 + $0x6b] ss:$4 sm:$0x3] %vm3781_vm8, %v2360_v9  ;;  %v2381_v52 = vcombine.high %v2373_v22, %v2373_v22 }
 0x184   : > { %2904 = vst.msk [vmem:[%s3779_s24 + $0x73] ss:$4 sm:$0x3] %vm3781_vm8, %v2362_v6  ;;  %v2382_v10 = vcombine.high %v2380_v36, %v2380_v36  ;;  %v1842_v17 = vrot.slane %v1820_v59, %v3767_v27  ;;  %v1849_v16 = vrot.slane %v1821_v21, %v3767_v27  ;;  %v1850_v31 = vcombine.high %v1828_v40, %v1828_v40 }
 0x185   : > { %v1851_v48 = vcombine.high %v1835_v5, %v1835_v5  ;;  %2840 = vst.msk [vmem:[%s3779_s24 + $0x82] ss:$4 sm:$0x3] %vm3781_vm8, %v1828_v40  ;;  %2844 = vst.msk [vmem:[%s3779_s24 + $0xa2] ss:$4 sm:$0x3] %vm3781_vm8, %v1835_v5  ;;  %v2389_v37 = vrot.slane %v2373_v22, %v3767_v27  ;;  %v2396_v44 = vrot.slane %v2380_v36, %v3767_v27 }
 0x186   : > { %2901 = vst.msk [vmem:[%s3779_s24 + $0x5b] ss:$4 sm:$0x3] %vm3781_vm8, %v2363_v30  ;;  %2905 = vst.msk [vmem:[%s3779_s24 + $0x7b] ss:$4 sm:$0x3] %vm3781_vm8, %v2364_v46  ;;  %v2403_v58 = vrot.slane %v2381_v52, %v3767_v27  ;;  %v2410_v35 = vrot.slane %v2382_v10, %v3767_v27  ;;  %v1852_v1 = vcombine.high %v1842_v17, %v1842_v17 }
 0x187   : > { %v1853_v18 = vcombine.high %v1849_v16, %v1849_v16  ;;  %2841 = vst.msk [vmem:[%s3779_s24 + $0x8a] ss:$4 sm:$0x3] %vm3781_vm8, %v1842_v17  ;;  %2842 = vst.msk [vmem:[%s3779_s24 + $0x92] ss:$4 sm:$0x3] %vm3781_vm8, %v1850_v31  ;;  %v1854_v0 = vcombine.low %v4191_v15, %v1695_v29  ;;  %v1855_v23 = vcombine.high %v4191_v15, %v1695_v29 }
 0x188   : > { %2845 = vst.msk [vmem:[%s3779_s24 + $0xaa] ss:$4 sm:$0x3] %vm3781_vm8, %v1849_v16  ;;  %2846 = vst.msk [vmem:[%s3779_s24 + $0xb2] ss:$4 sm:$0x3] %vm3781_vm8, %v1851_v48  ;;  %v2411_v11 = vcombine.high %v2389_v37, %v2389_v37  ;;  %v2412_v33 = vcombine.high %v2396_v44, %v2396_v44  ;;  %v2413_v51 = vcombine.high %v2403_v58, %v2403_v58 }
 0x189   : > { %v2414_v7 = vcombine.high %v2410_v35, %v2410_v35  ;;  %2906 = vst.msk [vmem:[%s3779_s24 + $0x83] ss:$4 sm:$0x3] %vm3781_vm8, %v2389_v37  ;;  %2907 = vst.msk [vmem:[%s3779_s24 + $0x8b] ss:$4 sm:$0x3] %vm3781_vm8, %v2403_v58  ;;  %v1862_v3 = vrot.slane %v1854_v0, %v3767_v27  ;;  %v1869_v4 = vrot.slane %v1855_v23, %v3767_v27 }
 0x18a   : > { %2910 = vst.msk [vmem:[%s3779_s24 + $0xa3] ss:$4 sm:$0x3] %vm3781_vm8, %v2396_v44  ;;  %2911 = vst.msk [vmem:[%s3779_s24 + $0xab] ss:$4 sm:$0x3] %vm3781_vm8, %v2410_v35  ;;  %v2256_v8 = vadd.f32 %v2248_v54, %v3818_v2 }
 0x18b   : > { %2843 = vst.msk [vmem:[%s3779_s24 + $0x9a] ss:$4 sm:$0x3] %vm3781_vm8, %v1852_v1  ;;  %2847 = vst.msk [vmem:[%s3779_s24 + $0xba] ss:$4 sm:$0x3] %vm3781_vm8, %v1853_v18  ;;  %v1870_v14 = vcombine.high %v1862_v3, %v1862_v3  ;;  %v1871_v41 = vcombine.high %v1869_v4, %v1869_v4  ;;  %v1878_v53 = vrot.slane %v1862_v3, %v3767_v27 }
 0x18c   : > { %2908 = vst.msk [vmem:[%s3779_s24 + $0x93] ss:$4 sm:$0x3] %vm3781_vm8, %v2411_v11  ;;  %2909 = vst.msk [vmem:[%s3779_s24 + $0x9b] ss:$4 sm:$0x3] %vm3781_vm8, %v2413_v51  ;;  %v1885_v2 = vrot.slane %v1869_v4, %v3767_v27  ;;  %v2415_v60 = vcombine.low %v4194_v20, %v2256_v8  ;;  %v2416_v55 = vcombine.high %v4194_v20, %v2256_v8 }
 0x18d   : > { %2912 = vst.msk [vmem:[%s3779_s24 + $0xb3] ss:$4 sm:$0x3] %vm3781_vm8, %v2412_v33  ;;  %2913 = vst.msk [vmem:[%s3779_s24 + $0xbb] ss:$4 sm:$0x3] %vm3781_vm8, %v2414_v7  ;;  %v1892_v61 = vrot.slane %v1870_v14, %v3767_v27  ;;  %v1899_v49 = vrot.slane %v1871_v41, %v3767_v27  ;;  %v1900_v62 = vcombine.high %v1878_v53, %v1878_v53 }
 0x18e   : > { %v1901_v39 = vcombine.high %v1885_v2, %v1885_v2  ;;  %2848 = vst.msk [vmem:[%s3779_s24 + $0xc2] ss:$4 sm:$0x3] %vm3781_vm8, %v1878_v53  ;;  %2852 = vst.msk [vmem:[%s3779_s24 + $0xe2] ss:$4 sm:$0x3] %vm3781_vm8, %v1885_v2  ;;  %v2423_v19 = vrot.slane %v2415_v60, %v3767_v27  ;;  %v2430_v25 = vrot.slane %v2416_v55, %v3767_v27 }
 0x18f   : > { %v1902_v15 = vcombine.high %v1892_v61, %v1892_v61  ;;  %v1903_v20 = vcombine.high %v1899_v49, %v1899_v49  ;;  %2849 = vst.msk [vmem:[%s3779_s24 + $0xca] ss:$4 sm:$0x3] %vm3781_vm8, %v1892_v61  ;;  %2850 = vst.msk [vmem:[%s3779_s24 + $0xd2] ss:$4 sm:$0x3] %vm3781_vm8, %v1900_v62 }
 0x190   : > { %2853 = vst.msk [vmem:[%s3779_s24 + $0xea] ss:$4 sm:$0x3] %vm3781_vm8, %v1899_v49  ;;  %2854 = vst.msk [vmem:[%s3779_s24 + $0xf2] ss:$4 sm:$0x3] %vm3781_vm8, %v1901_v39  ;;  %v2431_v56 = vcombine.high %v2423_v19, %v2423_v19  ;;  %v2432_v13 = vcombine.high %v2430_v25, %v2430_v25  ;;  %v2439_v34 = vrot.slane %v2423_v19, %v3767_v27 }
 0x191   : > { %v2446_v43 = vrot.slane %v2430_v25, %v3767_v27  ;;  %2851 = vst.msk [vmem:[%s3779_s24 + $0xda] ss:$4 sm:$0x3] %vm3781_vm8, %v1902_v15  ;;  %2855 = vst.msk [vmem:[%s3779_s24 + $0xfa] ss:$4 sm:$0x3] %vm3781_vm8, %v1903_v20 }
 0x192   : > { %v2453_v47 = vrot.slane %v2431_v56, %v3767_v27  ;;  %v2460_v24 = vrot.slane %v2432_v13, %v3767_v27  ;;  %v2461_v57 = vcombine.high %v2439_v34, %v2439_v34  ;;  %2914 = vst.msk [vmem:[%s3779_s24 + $0xc3] ss:$4 sm:$0x3] %vm3781_vm8, %v2439_v34 }
 0x193   : > { %v2462_v29 = vcombine.high %v2446_v43, %v2446_v43  ;;  %2918 = vst.msk [vmem:[%s3779_s24 + $0xe3] ss:$4 sm:$0x3] %vm3781_vm8, %v2446_v43 }
 0x194   : > { %v2463_v54 = vcombine.high %v2453_v47, %v2453_v47  ;;  %v2464_v45 = vcombine.high %v2460_v24, %v2460_v24  ;;  %2915 = vst.msk [vmem:[%s3779_s24 + $0xcb] ss:$4 sm:$0x3] %vm3781_vm8, %v2453_v47  ;;  %2916 = vst.msk [vmem:[%s3779_s24 + $0xd3] ss:$4 sm:$0x3] %vm3781_vm8, %v2461_v57 }
 0x195   : > { %2919 = vst.msk [vmem:[%s3779_s24 + $0xeb] ss:$4 sm:$0x3] %vm3781_vm8, %v2460_v24  ;;  %2920 = vst.msk [vmem:[%s3779_s24 + $0xf3] ss:$4 sm:$0x3] %vm3781_vm8, %v2462_v29 }
 0x196   : > { %2917 = vst.msk [vmem:[%s3779_s24 + $0xdb] ss:$4 sm:$0x3] %vm3781_vm8, %v2463_v54  ;;  %2921 = vst.msk [vmem:[%s3779_s24 + $0xfb] ss:$4 sm:$0x3] %vm3781_vm8, %v2464_v45 }
 0x197 PF: > { %s14_s17 = sadd.s32 1, %s3106_s17   ;;  %s4392_s15 = smov %s3102_s16 }
 0x198   : > { %p11_p5 = scmp.ge.s32.totalorder %s14_s17, 4   ;;  %s4393_s16 = smov %s4395_s18 }
 0x19a   :  { %13 = sbr.rel (!%p11_p5) target bundleno = 2 (0x2), region = 193 }

</bundles_post_ra>
